<compile_context>
chip_gen: v6e
topology: v6e:2x2x1
jax: 0.10.0
libtpu: 0.0.40
codegen_flags: <defaults>
</compile_context>

<pallas_src>
import functools

import jax
import jax.numpy as jnp
from jax import lax
from jax.experimental import pallas as pl
from jax.experimental.pallas import tpu as pltpu


def _round_up(x, m):
    return (x + m - 1) // m * m


# ----------------------------- Pallas kernels ------------------------------

def _conv_pool_kernel(x_ref, w_ref, b_ref, o_ref, *, q):
    """Fused conv-as-GEMM + bias + ReLU + 2x2 maxpool.

    x_ref: (4*q, Kp) im2col patches, rows ordered [pool-offset g][n,hp,wp].
    w_ref: (Kp, Cp) weights, b_ref: (1, Cp), o_ref: (q, Cp) pooled output.
    """
    acc = jnp.dot(x_ref[...], w_ref[...], preferred_element_type=jnp.float32)
    acc = jnp.maximum(acc + b_ref[...], 0.0)
    # 2x2 maxpool == elementwise max over the 4 contiguous row groups.
    p0 = acc[0 * q:1 * q]
    p1 = acc[1 * q:2 * q]
    p2 = acc[2 * q:3 * q]
    p3 = acc[3 * q:4 * q]
    o_ref[...] = jnp.maximum(jnp.maximum(p0, p1), jnp.maximum(p2, p3))


def _fc_chain_kernel(x_ref, w1_ref, b1_ref, w2_ref, b2_ref, w3_ref, b3_ref,
                     o_ref):
    """Fused fc1 -> ReLU -> fc2 -> ReLU -> fc3 (all weights VMEM-resident)."""
    h = jnp.dot(x_ref[...], w1_ref[...], preferred_element_type=jnp.float32)
    h = jnp.maximum(h + b1_ref[...], 0.0)
    h = jnp.dot(h, w2_ref[...], preferred_element_type=jnp.float32)
    h = jnp.maximum(h + b2_ref[...], 0.0)
    h = jnp.dot(h, w3_ref[...], preferred_element_type=jnp.float32)
    o_ref[...] = h + b3_ref[...]


# ------------------------------ wrappers ------------------------------------

def conv_relu_pool(x_nhwc, w_oihw, b):
    """VALID conv (stride 1) + ReLU + 2x2/2 maxpool, fused in one pallas_call.

    x_nhwc: (N, H, W, C) f32.  w_oihw: (O, C, kh, kw) torch layout.  b: (O,).
    Returns pooled activations (N, Hp, Wp, O) in NHWC.
    """
    N, H, W, C = x_nhwc.shape
    O, Ci, kh, kw = w_oihw.shape
    Ho, Wo = H - kh + 1, W - kw + 1
    Hp, Wp = Ho // 2, Wo // 2
    K = Ci * kh * kw
    Q = N * Hp * Wp

    Qp = _round_up(Q, 8)
    Kp = _round_up(K, 128)
    Cp = _round_up(O, 128)

    # im2col, spatial-major patch ordering: k = (i*kw + j)*C + c.
    cols = [x_nhwc[:, i:i + Ho, j:j + Wo, :]
            for i in range(kh) for j in range(kw)]
    p = jnp.concatenate(cols, axis=-1)                  # (N, Ho, Wo, K)
    # Reorder rows as (dh, dw, n, hp, wp) so the pool is a max over 4
    # contiguous, 8-aligned row groups inside the kernel.
    p = p.reshape(N, Hp, 2, Wp, 2, K).transpose(2, 4, 0, 1, 3, 5)
    p = p.reshape(4, Q, K)
    p = jnp.pad(p, ((0, 0), (0, Qp - Q), (0, Kp - K))).reshape(4 * Qp, Kp)

    # Weight as (K, O) with matching row order, zero-padded to (Kp, Cp).
    w_mat = w_oihw.transpose(2, 3, 1, 0).reshape(K, O)
    w_mat = jnp.pad(w_mat, ((0, Kp - K), (0, Cp - O)))
    b_row = jnp.pad(b, (0, Cp - O)).reshape(1, Cp)

    out = pl.pallas_call(
        functools.partial(_conv_pool_kernel, q=Qp),
        out_shape=jax.ShapeDtypeStruct((Qp, Cp), jnp.float32),
        grid=(1,),
        in_specs=[
            pl.BlockSpec((4 * Qp, Kp), lambda i: (0, 0)),
            pl.BlockSpec((Kp, Cp), lambda i: (0, 0)),
            pl.BlockSpec((1, Cp), lambda i: (0, 0)),
        ],
        out_specs=pl.BlockSpec((Qp, Cp), lambda i: (0, 0)),
    )(p, w_mat, b_row)
    return out[:Q, :O].reshape(N, Hp, Wp, O)


def fc3_chain(x, w1, b1, w2, b2, w3, b3):
    """Fused fc1->ReLU->fc2->ReLU->fc3.  x: (B, K1); w_i are torch (out, in)."""
    B, K1 = x.shape
    N1, N2, N3 = w1.shape[0], w2.shape[0], w3.shape[0]

    Bp = _round_up(B, 8)
    K1p = _round_up(K1, 128)
    N1p = _round_up(N1, 128)
    N2p = _round_up(N2, 128)
    N3p = _round_up(N3, 128)

    x_p = jnp.pad(x, ((0, Bp - B), (0, K1p - K1)))
    w1_p = jnp.pad(w1.T, ((0, K1p - K1), (0, N1p - N1)))
    b1_p = jnp.pad(b1, (0, N1p - N1)).reshape(1, N1p)
    w2_p = jnp.pad(w2.T, ((0, N1p - N1), (0, N2p - N2)))
    b2_p = jnp.pad(b2, (0, N2p - N2)).reshape(1, N2p)
    w3_p = jnp.pad(w3.T, ((0, N2p - N2), (0, N3p - N3)))
    b3_p = jnp.pad(b3, (0, N3p - N3)).reshape(1, N3p)

    args = (x_p, w1_p, b1_p, w2_p, b2_p, w3_p, b3_p)
    out = pl.pallas_call(
        _fc_chain_kernel,
        out_shape=jax.ShapeDtypeStruct((Bp, N3p), jnp.float32),
        grid=(1,),
        in_specs=[pl.BlockSpec(a.shape, lambda i: (0, 0)) for a in args],
        out_specs=pl.BlockSpec((Bp, N3p), lambda i: (0, 0)),
    )(*args)
    return out[:B, :N3]


# ------------------------------ model ---------------------------------------

def init_params(key):
    ks = jax.random.split(key, 10)

    def u(k, shape, fan_in):
        bound = 1.0 / jnp.sqrt(jnp.float32(fan_in))
        return jax.random.uniform(k, shape, jnp.float32, -bound, bound)

    return {
        "conv1_w": u(ks[0], (6, 3, 5, 5), 3 * 25),
        "conv1_b": u(ks[1], (6,), 3 * 25),
        "conv2_w": u(ks[2], (16, 6, 5, 5), 6 * 25),
        "conv2_b": u(ks[3], (16,), 6 * 25),
        "fc1_w": u(ks[4], (120, 400), 400),
        "fc1_b": u(ks[5], (120,), 400),
        "fc2_w": u(ks[6], (84, 120), 120),
        "fc2_b": u(ks[7], (84,), 120),
        "fc3_w": u(ks[8], (10, 84), 84),
        "fc3_b": u(ks[9], (10,), 84),
    }


def net_forward(params, x):
    # x: (N, 3, 32, 32) NCHW float32, like the PyTorch module.
    x = x.transpose(0, 2, 3, 1)                               # NHWC once
    x = conv_relu_pool(x, params["conv1_w"], params["conv1_b"])  # (N,14,14,6)
    x = conv_relu_pool(x, params["conv2_w"], params["conv2_b"])  # (N,5,5,16)
    # TODO(synk): torch `print(x.shape)` debug statements are host-side only; omitted.
    N, Hp, Wp, C = x.shape
    x = x.reshape(N, Hp * Wp * C)                             # NHWC flatten
    # Permute fc1 columns once so NHWC flatten matches torch's view(-1, 400)
    # (which flattens in C,H,W order).
    fc1_w = params["fc1_w"].reshape(-1, C, Hp, Wp)
    fc1_w = fc1_w.transpose(0, 2, 3, 1).reshape(-1, Hp * Wp * C)
    return fc3_chain(x, fc1_w, params["fc1_b"],
                     params["fc2_w"], params["fc2_b"],
                     params["fc3_w"], params["fc3_b"])


def net_forward_ref(params, x):
    """Pure-JAX reference for correctness checking (torch NCHW semantics)."""
    def conv(x, w, b):
        y = lax.conv_general_dilated(
            x, w, (1, 1), "VALID",
            dimension_numbers=("NCHW", "OIHW", "NCHW"))
        return jnp.maximum(y + b[None, :, None, None], 0.0)

    def pool(x):
        N, C, H, W = x.shape
        return x.reshape(N, C, H // 2, 2, W // 2, 2).max(axis=(3, 5))

    x = pool(conv(x, params["conv1_w"], params["conv1_b"]))
    x = pool(conv(x, params["conv2_w"], params["conv2_b"]))
    x = x.reshape(-1, 400)
    x = jnp.maximum(x @ params["fc1_w"].T + params["fc1_b"], 0.0)
    x = jnp.maximum(x @ params["fc2_w"].T + params["fc2_b"], 0.0)
    return x @ params["fc3_w"].T + params["fc3_b"]


if __name__ == "__main__":
    key = jax.random.PRNGKey(0)
    pkey, xkey = jax.random.split(key)
    params = init_params(pkey)
    # fc1 expects 16*5*5 after two conv+pool stages -> input spatial must be 32.
    x = jax.random.normal(xkey, (2, 3, 32, 32), jnp.float32)

    fwd = jax.jit(net_forward)
    out = jax.block_until_ready(fwd(params, x))
    ref = jax.block_until_ready(net_forward_ref(params, x))

    assert out.shape == (2, 10), out.shape
    assert jnp.allclose(out, ref, atol=1e-3, rtol=1e-3), (
        float(jnp.max(jnp.abs(out - ref))))
    print("KERNEL_OK")
</pallas_src>

<mosaic_0001>
module attributes {stable_mosaic.version = 11 : i64} {
  func.func @_conv_pool_kernel(%arg0: i32, %arg1: memref<1568x128xf32, #tpu.memory_space<vmem>>, %arg2: memref<128x128xf32, #tpu.memory_space<vmem>>, %arg3: memref<1x128xf32, #tpu.memory_space<vmem>>, %arg4: memref<392x128xf32, #tpu.memory_space<vmem>>) attributes {dimension_semantics = [#tpu.dimension_semantics<arbitrary>], iteration_bounds = array<i64: 1>, scalar_prefetch = 0 : i64, scratch_operands = 0 : i64, tpu.core_type = #tpu.core_type<tc>, window_params = [{pipeline_mode = #tpu.pipeline_mode<synchronous>, transform_indices = @transform_0, window_bounds = array<i64: 1568, 128>}, {pipeline_mode = #tpu.pipeline_mode<synchronous>, transform_indices = @transform_1, window_bounds = array<i64: 128, 128>}, {pipeline_mode = #tpu.pipeline_mode<synchronous>, transform_indices = @transform_2, window_bounds = array<i64: 1, 128>}, {pipeline_mode = #tpu.pipeline_mode<synchronous>, transform_indices = @transform_3, window_bounds = array<i64: 392, 128>}]} {
    %c0 = arith.constant 0 : index
    %c0_0 = arith.constant 0 : index
    %0 = vector.load %arg1[%c0, %c0_0] : memref<1568x128xf32, #tpu.memory_space<vmem>>, vector<1568x128xf32>
    %c0_1 = arith.constant 0 : index
    %c0_2 = arith.constant 0 : index
    %1 = vector.load %arg2[%c0_1, %c0_2] : memref<128x128xf32, #tpu.memory_space<vmem>>, vector<128x128xf32>
    %cst = arith.constant dense<0.000000e+00> : vector<1568x128xf32>
    %2 = tpu.matmul %0, %1, %cst {dimension_numbers = #tpu.dot_dimension_numbers<[1], [0], [0], [1], [0, 0, 1, 1], [], []>} : vector<1568x128xf32>, vector<128x128xf32>, vector<1568x128xf32> -> vector<1568x128xf32>
    %c0_3 = arith.constant 0 : index
    %c0_4 = arith.constant 0 : index
    %3 = vector.load %arg3[%c0_3, %c0_4] : memref<1x128xf32, #tpu.memory_space<vmem>>, vector<1x128xf32>
    %4 = vector.broadcast %3 : vector<1x128xf32> to vector<1568x128xf32>
    %5 = arith.addf %2, %4 : vector<1568x128xf32>
    %cst_5 = arith.constant 0.000000e+00 : f32
    %6 = vector.broadcast %cst_5 : f32 to vector<1568x128xf32>
    %7 = arith.maximumf %5, %6 : vector<1568x128xf32>
    %8 = vector.extract_strided_slice %7 {offsets = [0, 0], sizes = [392, 128], strides = [1, 1]} : vector<1568x128xf32> to vector<392x128xf32>
    %9 = vector.extract_strided_slice %7 {offsets = [392, 0], sizes = [392, 128], strides = [1, 1]} : vector<1568x128xf32> to vector<392x128xf32>
    %10 = vector.extract_strided_slice %7 {offsets = [784, 0], sizes = [392, 128], strides = [1, 1]} : vector<1568x128xf32> to vector<392x128xf32>
    %11 = vector.extract_strided_slice %7 {offsets = [1176, 0], sizes = [392, 128], strides = [1, 1]} : vector<1568x128xf32> to vector<392x128xf32>
    %12 = arith.maximumf %8, %9 : vector<392x128xf32>
    %13 = arith.maximumf %10, %11 : vector<392x128xf32>
    %14 = arith.maximumf %12, %13 : vector<392x128xf32>
    %c0_6 = arith.constant 0 : index
    %c0_7 = arith.constant 0 : index
    %15 = vector.load %arg4[%c0_6, %c0_7] : memref<392x128xf32, #tpu.memory_space<vmem>>, vector<392x128xf32>
    tpu.vector_store %arg4[%c0_6, %c0_7], %14 {strides = array<i32>} : memref<392x128xf32, #tpu.memory_space<vmem>>, vector<392x128xf32>,
    return
  }
  func.func @transform_0(%arg0: i32) -> (i32, i32) {
    %c0_i32 = arith.constant 0 : i32
    %c0_i32_0 = arith.constant 0 : i32
    %c0_i32_1 = arith.constant 0 : i32
    return %c0_i32, %c0_i32_0 : i32, i32
  }
  func.func @transform_1(%arg0: i32) -> (i32, i32) {
    %c0_i32 = arith.constant 0 : i32
    %c0_i32_0 = arith.constant 0 : i32
    %c0_i32_1 = arith.constant 0 : i32
    return %c0_i32, %c0_i32_0 : i32, i32
  }
  func.func @transform_2(%arg0: i32) -> (i32, i32) {
    %c0_i32 = arith.constant 0 : i32
    %c0_i32_0 = arith.constant 0 : i32
    %c0_i32_1 = arith.constant 0 : i32
    return %c0_i32, %c0_i32_0 : i32, i32
  }
  func.func @transform_3(%arg0: i32) -> (i32, i32) {
    %c0_i32 = arith.constant 0 : i32
    %c0_i32_0 = arith.constant 0 : i32
    %c0_i32_1 = arith.constant 0 : i32
    return %c0_i32, %c0_i32_0 : i32, i32
  }
}

module attributes {stable_mosaic.version = 11 : i64} {
  func.func @_conv_pool_kernel(%arg0: i32, %arg1: memref<224x256xf32, #tpu.memory_space<vmem>>, %arg2: memref<256x128xf32, #tpu.memory_space<vmem>>, %arg3: memref<1x128xf32, #tpu.memory_space<vmem>>, %arg4: memref<56x128xf32, #tpu.memory_space<vmem>>) attributes {dimension_semantics = [#tpu.dimension_semantics<arbitrary>], iteration_bounds = array<i64: 1>, scalar_prefetch = 0 : i64, scratch_operands = 0 : i64, tpu.core_type = #tpu.core_type<tc>, window_params = [{pipeline_mode = #tpu.pipeline_mode<synchronous>, transform_indices = @transform_0, window_bounds = array<i64: 224, 256>}, {pipeline_mode = #tpu.pipeline_mode<synchronous>, transform_indices = @transform_1, window_bounds = array<i64: 256, 128>}, {pipeline_mode = #tpu.pipeline_mode<synchronous>, transform_indices = @transform_2, window_bounds = array<i64: 1, 128>}, {pipeline_mode = #tpu.pipeline_mode<synchronous>, transform_indices = @transform_3, window_bounds = array<i64: 56, 128>}]} {
    %c0 = arith.constant 0 : index
    %c0_0 = arith.constant 0 : index
    %0 = vector.load %arg1[%c0, %c0_0] : memref<224x256xf32, #tpu.memory_space<vmem>>, vector<224x256xf32>
    %c0_1 = arith.constant 0 : index
    %c0_2 = arith.constant 0 : index
    %1 = vector.load %arg2[%c0_1, %c0_2] : memref<256x128xf32, #tpu.memory_space<vmem>>, vector<256x128xf32>
    %cst = arith.constant dense<0.000000e+00> : vector<224x128xf32>
    %2 = tpu.matmul %0, %1, %cst {dimension_numbers = #tpu.dot_dimension_numbers<[1], [0], [0], [1], [0, 0, 1, 1], [], []>} : vector<224x256xf32>, vector<256x128xf32>, vector<224x128xf32> -> vector<224x128xf32>
    %c0_3 = arith.constant 0 : index
    %c0_4 = arith.constant 0 : index
    %3 = vector.load %arg3[%c0_3, %c0_4] : memref<1x128xf32, #tpu.memory_space<vmem>>, vector<1x128xf32>
    %4 = vector.broadcast %3 : vector<1x128xf32> to vector<224x128xf32>
    %5 = arith.addf %2, %4 : vector<224x128xf32>
    %cst_5 = arith.constant 0.000000e+00 : f32
    %6 = vector.broadcast %cst_5 : f32 to vector<224x128xf32>
    %7 = arith.maximumf %5, %6 : vector<224x128xf32>
    %8 = vector.extract_strided_slice %7 {offsets = [0, 0], sizes = [56, 128], strides = [1, 1]} : vector<224x128xf32> to vector<56x128xf32>
    %9 = vector.extract_strided_slice %7 {offsets = [56, 0], sizes = [56, 128], strides = [1, 1]} : vector<224x128xf32> to vector<56x128xf32>
    %10 = vector.extract_strided_slice %7 {offsets = [112, 0], sizes = [56, 128], strides = [1, 1]} : vector<224x128xf32> to vector<56x128xf32>
    %11 = vector.extract_strided_slice %7 {offsets = [168, 0], sizes = [56, 128], strides = [1, 1]} : vector<224x128xf32> to vector<56x128xf32>
    %12 = arith.maximumf %8, %9 : vector<56x128xf32>
    %13 = arith.maximumf %10, %11 : vector<56x128xf32>
    %14 = arith.maximumf %12, %13 : vector<56x128xf32>
    %c0_6 = arith.constant 0 : index
    %c0_7 = arith.constant 0 : index
    %15 = vector.load %arg4[%c0_6, %c0_7] : memref<56x128xf32, #tpu.memory_space<vmem>>, vector<56x128xf32>
    tpu.vector_store %arg4[%c0_6, %c0_7], %14 {strides = array<i32>} : memref<56x128xf32, #tpu.memory_space<vmem>>, vector<56x128xf32>,
    return
  }
  func.func @transform_0(%arg0: i32) -> (i32, i32) {
    %c0_i32 = arith.constant 0 : i32
    %c0_i32_0 = arith.constant 0 : i32
    %c0_i32_1 = arith.constant 0 : i32
    return %c0_i32, %c0_i32_0 : i32, i32
  }
  func.func @transform_1(%arg0: i32) -> (i32, i32) {
    %c0_i32 = arith.constant 0 : i32
    %c0_i32_0 = arith.constant 0 : i32
    %c0_i32_1 = arith.constant 0 : i32
    return %c0_i32, %c0_i32_0 : i32, i32
  }
  func.func @transform_2(%arg0: i32) -> (i32, i32) {
    %c0_i32 = arith.constant 0 : i32
    %c0_i32_0 = arith.constant 0 : i32
    %c0_i32_1 = arith.constant 0 : i32
    return %c0_i32, %c0_i32_0 : i32, i32
  }
  func.func @transform_3(%arg0: i32) -> (i32, i32) {
    %c0_i32 = arith.constant 0 : i32
    %c0_i32_0 = arith.constant 0 : i32
    %c0_i32_1 = arith.constant 0 : i32
    return %c0_i32, %c0_i32_0 : i32, i32
  }
}

module attributes {stable_mosaic.version = 11 : i64} {
  func.func @_fc_chain_kernel(%arg0: i32, %arg1: memref<8x512xf32, #tpu.memory_space<vmem>>, %arg2: memref<512x128xf32, #tpu.memory_space<vmem>>, %arg3: memref<1x128xf32, #tpu.memory_space<vmem>>, %arg4: memref<128x128xf32, #tpu.memory_space<vmem>>, %arg5: memref<1x128xf32, #tpu.memory_space<vmem>>, %arg6: memref<128x128xf32, #tpu.memory_space<vmem>>, %arg7: memref<1x128xf32, #tpu.memory_space<vmem>>, %arg8: memref<8x128xf32, #tpu.memory_space<vmem>>) attributes {dimension_semantics = [#tpu.dimension_semantics<arbitrary>], iteration_bounds = array<i64: 1>, scalar_prefetch = 0 : i64, scratch_operands = 0 : i64, tpu.core_type = #tpu.core_type<tc>, window_params = [{pipeline_mode = #tpu.pipeline_mode<synchronous>, transform_indices = @transform_0, window_bounds = array<i64: 8, 512>}, {pipeline_mode = #tpu.pipeline_mode<synchronous>, transform_indices = @transform_1, window_bounds = array<i64: 512, 128>}, {pipeline_mode = #tpu.pipeline_mode<synchronous>, transform_indices = @transform_2, window_bounds = array<i64: 1, 128>}, {pipeline_mode = #tpu.pipeline_mode<synchronous>, transform_indices = @transform_3, window_bounds = array<i64: 128, 128>}, {pipeline_mode = #tpu.pipeline_mode<synchronous>, transform_indices = @transform_4, window_bounds = array<i64: 1, 128>}, {pipeline_mode = #tpu.pipeline_mode<synchronous>, transform_indices = @transform_5, window_bounds = array<i64: 128, 128>}, {pipeline_mode = #tpu.pipeline_mode<synchronous>, transform_indices = @transform_6, window_bounds = array<i64: 1, 128>}, {pipeline_mode = #tpu.pipeline_mode<synchronous>, transform_indices = @transform_7, window_bounds = array<i64: 8, 128>}]} {
    %c0 = arith.constant 0 : index
    %c0_0 = arith.constant 0 : index
    %0 = vector.load %arg1[%c0, %c0_0] : memref<8x512xf32, #tpu.memory_space<vmem>>, vector<8x512xf32>
    %c0_1 = arith.constant 0 : index
    %c0_2 = arith.constant 0 : index
    %1 = vector.load %arg2[%c0_1, %c0_2] : memref<512x128xf32, #tpu.memory_space<vmem>>, vector<512x128xf32>
    %cst = arith.constant dense<0.000000e+00> : vector<8x128xf32>
    %2 = tpu.matmul %0, %1, %cst {dimension_numbers = #tpu.dot_dimension_numbers<[1], [0], [0], [1], [0, 0, 1, 1], [], []>} : vector<8x512xf32>, vector<512x128xf32>, vector<8x128xf32> -> vector<8x128xf32>
    %c0_3 = arith.constant 0 : index
    %c0_4 = arith.constant 0 : index
    %3 = vector.load %arg3[%c0_3, %c0_4] : memref<1x128xf32, #tpu.memory_space<vmem>>, vector<1x128xf32>
    %4 = vector.broadcast %3 : vector<1x128xf32> to vector<8x128xf32>
    %5 = arith.addf %2, %4 : vector<8x128xf32>
    %cst_5 = arith.constant 0.000000e+00 : f32
    %6 = vector.broadcast %cst_5 : f32 to vector<8x128xf32>
    %7 = arith.maximumf %5, %6 : vector<8x128xf32>
    %c0_6 = arith.constant 0 : index
    %c0_7 = arith.constant 0 : index
    %8 = vector.load %arg4[%c0_6, %c0_7] : memref<128x128xf32, #tpu.memory_space<vmem>>, vector<128x128xf32>
    %cst_8 = arith.constant dense<0.000000e+00> : vector<8x128xf32>
    %9 = tpu.matmul %7, %8, %cst_8 {dimension_numbers = #tpu.dot_dimension_numbers<[1], [0], [0], [1], [0, 0, 1, 1], [], []>} : vector<8x128xf32>, vector<128x128xf32>, vector<8x128xf32> -> vector<8x128xf32>
    %c0_9 = arith.constant 0 : index
    %c0_10 = arith.constant 0 : index
    %10 = vector.load %arg5[%c0_9, %c0_10] : memref<1x128xf32, #tpu.memory_space<vmem>>, vector<1x128xf32>
    %11 = vector.broadcast %10 : vector<1x128xf32> to vector<8x128xf32>
    %12 = arith.addf %9, %11 : vector<8x128xf32>
    %cst_11 = arith.constant 0.000000e+00 : f32
    %13 = vector.broadcast %cst_11 : f32 to vector<8x128xf32>
    %14 = arith.maximumf %12, %13 : vector<8x128xf32>
    %c0_12 = arith.constant 0 : index
    %c0_13 = arith.constant 0 : index
    %15 = vector.load %arg6[%c0_12, %c0_13] : memref<128x128xf32, #tpu.memory_space<vmem>>, vector<128x128xf32>
    %cst_14 = arith.constant dense<0.000000e+00> : vector<8x128xf32>
    %16 = tpu.matmul %14, %15, %cst_14 {dimension_numbers = #tpu.dot_dimension_numbers<[1], [0], [0], [1], [0, 0, 1, 1], [], []>} : vector<8x128xf32>, vector<128x128xf32>, vector<8x128xf32> -> vector<8x128xf32>
    %c0_15 = arith.constant 0 : index
    %c0_16 = arith.constant 0 : index
    %17 = vector.load %arg7[%c0_15, %c0_16] : memref<1x128xf32, #tpu.memory_space<vmem>>, vector<1x128xf32>
    %18 = vector.broadcast %17 : vector<1x128xf32> to vector<8x128xf32>
    %19 = arith.addf %16, %18 : vector<8x128xf32>
    %c0_17 = arith.constant 0 : index
    %c0_18 = arith.constant 0 : index
    %20 = vector.load %arg8[%c0_17, %c0_18] : memref<8x128xf32, #tpu.memory_space<vmem>>, vector<8x128xf32>
    tpu.vector_store %arg8[%c0_17, %c0_18], %19 {strides = array<i32>} : memref<8x128xf32, #tpu.memory_space<vmem>>, vector<8x128xf32>,
    return
  }
  func.func @transform_0(%arg0: i32) -> (i32, i32) {
    %c0_i32 = arith.constant 0 : i32
    %c0_i32_0 = arith.constant 0 : i32
    %c0_i32_1 = arith.constant 0 : i32
    return %c0_i32, %c0_i32_0 : i32, i32
  }
  func.func @transform_1(%arg0: i32) -> (i32, i32) {
    %c0_i32 = arith.constant 0 : i32
    %c0_i32_0 = arith.constant 0 : i32
    %c0_i32_1 = arith.constant 0 : i32
    return %c0_i32, %c0_i32_0 : i32, i32
  }
  func.func @transform_2(%arg0: i32) -> (i32, i32) {
    %c0_i32 = arith.constant 0 : i32
    %c0_i32_0 = arith.constant 0 : i32
    %c0_i32_1 = arith.constant 0 : i32
    return %c0_i32, %c0_i32_0 : i32, i32
  }
  func.func @transform_3(%arg0: i32) -> (i32, i32) {
    %c0_i32 = arith.constant 0 : i32
    %c0_i32_0 = arith.constant 0 : i32
    %c0_i32_1 = arith.constant 0 : i32
    return %c0_i32, %c0_i32_0 : i32, i32
  }
  func.func @transform_4(%arg0: i32) -> (i32, i32) {
    %c0_i32 = arith.constant 0 : i32
    %c0_i32_0 = arith.constant 0 : i32
    %c0_i32_1 = arith.constant 0 : i32
    return %c0_i32, %c0_i32_0 : i32, i32
  }
  func.func @transform_5(%arg0: i32) -> (i32, i32) {
    %c0_i32 = arith.constant 0 : i32
    %c0_i32_0 = arith.constant 0 : i32
    %c0_i32_1 = arith.constant 0 : i32
    return %c0_i32, %c0_i32_0 : i32, i32
  }
  func.func @transform_6(%arg0: i32) -> (i32, i32) {
    %c0_i32 = arith.constant 0 : i32
    %c0_i32_0 = arith.constant 0 : i32
    %c0_i32_1 = arith.constant 0 : i32
    return %c0_i32, %c0_i32_0 : i32, i32
  }
  func.func @transform_7(%arg0: i32) -> (i32, i32) {
    %c0_i32 = arith.constant 0 : i32
    %c0_i32_0 = arith.constant 0 : i32
    %c0_i32_1 = arith.constant 0 : i32
    return %c0_i32, %c0_i32_0 : i32, i32
  }
}

</mosaic_0001>

<bundles_post_ra>
// kernel: net_forward.3
= control target key start
LH: loop header
LB: loop body
LE: loop exit
PB: predicated region body
PF: predicated region fallthrough
CT: control target
= control target key end

     0   :  { %s4018_s1 = inlined_call_operand.vmem [shape: f32[128,128], index: 1, kind: input, shape index: {}]   ;;  %s4019_s0 = inlined_call_operand.vmem [shape: f32[1568,128], index: 0, kind: input, shape index: {}]   ;;  %s4020_s2 = inlined_call_operand.vmem [shape: f32[1,128], index: 2, kind: input, shape index: {}]   ;;  %s4021_s3 = inlined_call_operand.vmem [shape: f32[392,128], index: 3, kind: output, shape index: {}]  }
   0x1   :  { %v225_v0 = vld [vmem:[%s4018_s1 + $0x78] sm:$0xff]  ;;  %v224_v1 = vld [vmem:[%s4018_s1 + $0x70] sm:$0xff]  ;;  %v223_v2 = vld [vmem:[%s4018_s1 + $0x68] sm:$0xff] }
   0x2   :  { %1887 = vmatprep.subr.mxu0 %v225_v0  ;;  %2213 = vmatprep.subr.mxu1 %v225_v0  ;;  %v222_v3 = vld [vmem:[%s4018_s1 + $0x60] sm:$0xff]  ;;  %v221_v4 = vld [vmem:[%s4018_s1 + $0x58] sm:$0xff]  ;;  %v220_v5 = vld [vmem:[%s4018_s1 + $0x50] sm:$0xff] }
   0x3   :  { %1888 = vmatpush3.msra.mxu0 %v225_v0  ;;  %2229 = vmatpush3.msra.mxu1 %v225_v0  ;;  %v219_v6 = vld [vmem:[%s4018_s1 + $0x48] sm:$0xff]  ;;  %v218_v7 = vld [vmem:[%s4018_s1 + $0x40] sm:$0xff]  ;;  %v217_v8 = vld [vmem:[%s4018_s1 + $0x38] sm:$0xff] }
   0x4   :  { %1889 = vmatprep.subr.mxu0 %v224_v1  ;;  %2214 = vmatprep.subr.mxu1 %v224_v1  ;;  %v216_v9 = vld [vmem:[%s4018_s1 + $0x30] sm:$0xff]  ;;  %v215_v10 = vld [vmem:[%s4018_s1 + $0x28] sm:$0xff]  ;;  %v214_v11 = vld [vmem:[%s4018_s1 + $0x20] sm:$0xff] }
   0x5   :  { %1890 = vmatpush3.msra.mxu0 %v224_v1  ;;  %2230 = vmatpush3.msra.mxu1 %v224_v1  ;;  %v213_v12 = vld [vmem:[%s4018_s1 + $0x18] sm:$0xff]  ;;  %v212_v13 = vld [vmem:[%s4018_s1 + $0x10] sm:$0xff]  ;;  %v211_v14 = vld [vmem:[%s4018_s1 + $0x8] sm:$0xff] }
   0x6   :  { %1891 = vmatprep.subr.mxu0 %v223_v2  ;;  %2215 = vmatprep.subr.mxu1 %v223_v2  ;;  %v210_v15 = vld [vmem:[%s4018_s1] sm:$0xff]  ;;  %v112_v17 = vld [vmem:[%s4019_s0 + $0x310] sm:$0xff]  ;;  %v15_v18 = vld [vmem:[%s4019_s0 + $0x8] sm:$0xff] }
   0x7   :  { %1892 = vmatpush3.msra.mxu0 %v223_v2  ;;  %2231 = vmatpush3.msra.mxu1 %v223_v2  ;;  %v14_v16 = vld [vmem:[%s4019_s0] sm:$0xff]  ;;  %v113_v19 = vld [vmem:[%s4019_s0 + $0x318] sm:$0xff]  ;;  %v16_v20 = vld [vmem:[%s4019_s0 + $0x10] sm:$0xff] }
   0x8   :  { %1893 = vmatprep.subr.mxu0 %v222_v3  ;;  %2216 = vmatprep.subr.mxu1 %v222_v3  ;;  %v114_v21 = vld [vmem:[%s4019_s0 + $0x320] sm:$0xff]  ;;  %v17_v22 = vld [vmem:[%s4019_s0 + $0x18] sm:$0xff]  ;;  %v115_v23 = vld [vmem:[%s4019_s0 + $0x328] sm:$0xff] }
   0x9   :  { %1894 = vmatpush3.msra.mxu0 %v222_v3  ;;  %2232 = vmatpush3.msra.mxu1 %v222_v3  ;;  %v18_v24 = vld [vmem:[%s4019_s0 + $0x20] sm:$0xff]  ;;  %v116_v25 = vld [vmem:[%s4019_s0 + $0x330] sm:$0xff]  ;;  %v19_v26 = vld [vmem:[%s4019_s0 + $0x28] sm:$0xff] }
   0xa   :  { %1895 = vmatprep.subr.mxu0 %v221_v4  ;;  %2217 = vmatprep.subr.mxu1 %v221_v4  ;;  %v117_v27 = vld [vmem:[%s4019_s0 + $0x338] sm:$0xff]  ;;  %v20_v28 = vld [vmem:[%s4019_s0 + $0x30] sm:$0xff]  ;;  %v118_v29 = vld [vmem:[%s4019_s0 + $0x340] sm:$0xff] }
   0xb   :  { %1896 = vmatpush3.msra.mxu0 %v221_v4  ;;  %2233 = vmatpush3.msra.mxu1 %v221_v4  ;;  %v21_v30 = vld [vmem:[%s4019_s0 + $0x38] sm:$0xff]  ;;  %v119_v31 = vld [vmem:[%s4019_s0 + $0x348] sm:$0xff]  ;;  %v22_v32 = vld [vmem:[%s4019_s0 + $0x40] sm:$0xff] }
   0xc   :  { %1897 = vmatprep.subr.mxu0 %v220_v5  ;;  %2218 = vmatprep.subr.mxu1 %v220_v5  ;;  %v120_v33 = vld [vmem:[%s4019_s0 + $0x350] sm:$0xff]  ;;  %v23_v34 = vld [vmem:[%s4019_s0 + $0x48] sm:$0xff]  ;;  %v121_v35 = vld [vmem:[%s4019_s0 + $0x358] sm:$0xff] }
   0xd   :  { %1898 = vmatpush3.msra.mxu0 %v220_v5  ;;  %2234 = vmatpush3.msra.mxu1 %v220_v5  ;;  %v24_v36 = vld [vmem:[%s4019_s0 + $0x50] sm:$0xff]  ;;  %v122_v37 = vld [vmem:[%s4019_s0 + $0x360] sm:$0xff]  ;;  %v25_v38 = vld [vmem:[%s4019_s0 + $0x58] sm:$0xff] }
   0xe   :  { %1899 = vmatprep.subr.mxu0 %v219_v6  ;;  %2219 = vmatprep.subr.mxu1 %v219_v6  ;;  %v123_v39 = vld [vmem:[%s4019_s0 + $0x368] sm:$0xff]  ;;  %v26_v40 = vld [vmem:[%s4019_s0 + $0x60] sm:$0xff]  ;;  %v124_v41 = vld [vmem:[%s4019_s0 + $0x370] sm:$0xff] }
   0xf   :  { %1900 = vmatpush3.msra.mxu0 %v219_v6  ;;  %2235 = vmatpush3.msra.mxu1 %v219_v6  ;;  %v27_v42 = vld [vmem:[%s4019_s0 + $0x68] sm:$0xff]  ;;  %v125_v43 = vld [vmem:[%s4019_s0 + $0x378] sm:$0xff]  ;;  %v28_v44 = vld [vmem:[%s4019_s0 + $0x70] sm:$0xff] }
  0x10   :  { %1901 = vmatprep.subr.mxu0 %v218_v7  ;;  %2220 = vmatprep.subr.mxu1 %v218_v7  ;;  %v126_v45 = vld [vmem:[%s4019_s0 + $0x380] sm:$0xff]  ;;  %v29_v46 = vld [vmem:[%s4019_s0 + $0x78] sm:$0xff]  ;;  %v127_v47 = vld [vmem:[%s4019_s0 + $0x388] sm:$0xff] }
  0x11   :  { %1902 = vmatpush3.msra.mxu0 %v218_v7  ;;  %2236 = vmatpush3.msra.mxu1 %v218_v7  ;;  %v30_v48 = vld [vmem:[%s4019_s0 + $0x80] sm:$0xff]  ;;  %v128_v49 = vld [vmem:[%s4019_s0 + $0x390] sm:$0xff]  ;;  %v31_v50 = vld [vmem:[%s4019_s0 + $0x88] sm:$0xff] }
  0x12   :  { %1903 = vmatprep.subr.mxu0 %v217_v8  ;;  %2221 = vmatprep.subr.mxu1 %v217_v8  ;;  %v129_v51 = vld [vmem:[%s4019_s0 + $0x398] sm:$0xff]  ;;  %v32_v52 = vld [vmem:[%s4019_s0 + $0x90] sm:$0xff]  ;;  %v130_v53 = vld [vmem:[%s4019_s0 + $0x3a0] sm:$0xff] }
  0x13   :  { %1904 = vmatpush3.msra.mxu0 %v217_v8  ;;  %2237 = vmatpush3.msra.mxu1 %v217_v8  ;;  %v33_v54 = vld [vmem:[%s4019_s0 + $0x98] sm:$0xff]  ;;  %v131_v55 = vld [vmem:[%s4019_s0 + $0x3a8] sm:$0xff]  ;;  %v34_v56 = vld [vmem:[%s4019_s0 + $0xa0] sm:$0xff] }
  0x14   :  { %1905 = vmatprep.subr.mxu0 %v216_v9  ;;  %2222 = vmatprep.subr.mxu1 %v216_v9  ;;  %v132_v57 = vld [vmem:[%s4019_s0 + $0x3b0] sm:$0xff]  ;;  %v35_v58 = vld [vmem:[%s4019_s0 + $0xa8] sm:$0xff]  ;;  %v133_v59 = vld [vmem:[%s4019_s0 + $0x3b8] sm:$0xff] }
  0x15   :  { %1906 = vmatpush3.msra.mxu0 %v216_v9  ;;  %2238 = vmatpush3.msra.mxu1 %v216_v9  ;;  %v36_v60 = vld [vmem:[%s4019_s0 + $0xb0] sm:$0xff]  ;;  %v134_v61 = vld [vmem:[%s4019_s0 + $0x3c0] sm:$0xff]  ;;  %v37_v62 = vld [vmem:[%s4019_s0 + $0xb8] sm:$0xff] }
  0x16   :  { %1907 = vmatprep.subr.mxu0 %v215_v10  ;;  %2223 = vmatprep.subr.mxu1 %v215_v10  ;;  %v135_v63 = vld [vmem:[%s4019_s0 + $0x3c8] sm:$0xff]  ;;  %v38_v0 = vld [vmem:[%s4019_s0 + $0xc0] sm:$0xff]  ;;  %v136_v1 = vld [vmem:[%s4019_s0 + $0x3d0] sm:$0xff] }
  0x17   :  { %1908 = vmatpush3.msra.mxu0 %v215_v10  ;;  %2239 = vmatpush3.msra.mxu1 %v215_v10  ;;  %v39_v2 = vld [vmem:[%s4019_s0 + $0xc8] sm:$0xff]  ;;  %v137_v3 = vld [vmem:[%s4019_s0 + $0x3d8] sm:$0xff]  ;;  %v40_v4 = vld [vmem:[%s4019_s0 + $0xd0] sm:$0xff] }
  0x18   :  { %1909 = vmatprep.subr.mxu0 %v214_v11  ;;  %2224 = vmatprep.subr.mxu1 %v214_v11  ;;  %v138_v5 = vld [vmem:[%s4019_s0 + $0x3e0] sm:$0xff]  ;;  %v41_v6 = vld [vmem:[%s4019_s0 + $0xd8] sm:$0xff]  ;;  %v139_v7 = vld [vmem:[%s4019_s0 + $0x3e8] sm:$0xff] }
  0x19   :  { %1910 = vmatpush3.msra.mxu0 %v214_v11  ;;  %2240 = vmatpush3.msra.mxu1 %v214_v11  ;;  %v42_v8 = vld [vmem:[%s4019_s0 + $0xe0] sm:$0xff]  ;;  %v140_v9 = vld [vmem:[%s4019_s0 + $0x3f0] sm:$0xff]  ;;  %v43_v10 = vld [vmem:[%s4019_s0 + $0xe8] sm:$0xff] }
  0x1a   :  { %1911 = vmatprep.subr.mxu0 %v213_v12  ;;  %2225 = vmatprep.subr.mxu1 %v213_v12  ;;  %v141_v11 = vld [vmem:[%s4019_s0 + $0x3f8] sm:$0xff] }
  0x1b   :  { %1912 = vmatpush3.msra.mxu0 %v213_v12  ;;  %2241 = vmatpush3.msra.mxu1 %v213_v12  ;;  %v44_v12 = vld [vmem:[%s4019_s0 + $0xf0] sm:$0xff] }
  0x1c   :  { %1913 = vmatprep.subr.mxu0 %v212_v13  ;;  %2226 = vmatprep.subr.mxu1 %v212_v13 }
  0x1d   :  { %1914 = vmatpush3.msra.mxu0 %v212_v13  ;;  %2242 = vmatpush3.msra.mxu1 %v212_v13  ;;  %v142_v13 = vld [vmem:[%s4019_s0 + $0x400] sm:$0xff] }
  0x1e   :  { %1915 = vmatprep.subr.mxu0 %v211_v14  ;;  %2227 = vmatprep.subr.mxu1 %v211_v14 }
  0x1f   :  { %1916 = vmatpush3.msra.mxu0 %v211_v14  ;;  %2243 = vmatpush3.msra.mxu1 %v211_v14  ;;  %v45_v14 = vld [vmem:[%s4019_s0 + $0xf8] sm:$0xff] }
  0x20   :  { %1917 = vmatprep.subr.mxu0 %v210_v15  ;;  %2228 = vmatprep.subr.mxu1 %v210_v15 }
  0x21   :  { %1918 = vmatpush3.msra.mxu0 %v210_v15  ;;  %2244 = vmatpush3.msra.mxu1 %v210_v15  ;;  %v143_v15 = vld [vmem:[%s4019_s0 + $0x408] sm:$0xff] }
  0x22   :  { %1919 = vmatprep.mubr.f32.mxu0 %v14_v16  ;;  %2066 = vmatprep.mubr.f32.mxu1 %v112_v17  ;;  %v46_v16 = vld [vmem:[%s4019_s0 + $0x100] sm:$0xff]  ;;  %v144_v17 = vld [vmem:[%s4019_s0 + $0x410] sm:$0xff] }
  0x23   :  { %1920 = vmatmul.mubr.f32.vlgmr.msra.gmra.mxu0 %v15_v18  ;;  %2067 = vmatmul.mubr.f32.vlgmr.msra.gmra.mxu1 %v113_v19  ;;  %v47_v18 = vld [vmem:[%s4019_s0 + $0x108] sm:$0xff]  ;;  %v145_v19 = vld [vmem:[%s4019_s0 + $0x418] sm:$0xff] }
  0x24   :  { %1922 = vmatprep.mubr.f32.mxu0 %v16_v20  ;;  %2069 = vmatprep.mubr.f32.mxu1 %v114_v21  ;;  %v48_v20 = vld [vmem:[%s4019_s0 + $0x110] sm:$0xff]  ;;  %v146_v21 = vld [vmem:[%s4019_s0 + $0x420] sm:$0xff] }
  0x27   :  { %1923 = vmatmul.mubr.f32.gmra.mxu0 %v17_v22  ;;  %2070 = vmatmul.mubr.f32.gmra.mxu1 %v115_v23  ;;  %v49_v22 = vld [vmem:[%s4019_s0 + $0x118] sm:$0xff]  ;;  %v147_v23 = vld [vmem:[%s4019_s0 + $0x428] sm:$0xff] }
  0x28   :  { %1925 = vmatprep.mubr.f32.mxu0 %v18_v24  ;;  %2072 = vmatprep.mubr.f32.mxu1 %v116_v25  ;;  %v50_v24 = vld [vmem:[%s4019_s0 + $0x120] sm:$0xff]  ;;  %v148_v25 = vld [vmem:[%s4019_s0 + $0x430] sm:$0xff] }
  0x2b   :  { %1926 = vmatmul.mubr.f32.gmra.mxu0 %v19_v26  ;;  %2073 = vmatmul.mubr.f32.gmra.mxu1 %v117_v27  ;;  %v51_v26 = vld [vmem:[%s4019_s0 + $0x128] sm:$0xff]  ;;  %v149_v27 = vld [vmem:[%s4019_s0 + $0x438] sm:$0xff] }
  0x2c   :  { %1928 = vmatprep.mubr.f32.mxu0 %v20_v28  ;;  %2075 = vmatprep.mubr.f32.mxu1 %v118_v29  ;;  %v52_v28 = vld [vmem:[%s4019_s0 + $0x130] sm:$0xff]  ;;  %v150_v29 = vld [vmem:[%s4019_s0 + $0x440] sm:$0xff] }
  0x2f   :  { %1929 = vmatmul.mubr.f32.gmra.mxu0 %v21_v30  ;;  %2076 = vmatmul.mubr.f32.gmra.mxu1 %v119_v31  ;;  %v53_v30 = vld [vmem:[%s4019_s0 + $0x138] sm:$0xff]  ;;  %v151_v31 = vld [vmem:[%s4019_s0 + $0x448] sm:$0xff] }
  0x30   :  { %1931 = vmatprep.mubr.f32.mxu0 %v22_v32  ;;  %2078 = vmatprep.mubr.f32.mxu1 %v120_v33  ;;  %v54_v32 = vld [vmem:[%s4019_s0 + $0x140] sm:$0xff]  ;;  %v152_v33 = vld [vmem:[%s4019_s0 + $0x450] sm:$0xff] }
  0x33   :  { %1932 = vmatmul.mubr.f32.gmra.mxu0 %v23_v34  ;;  %2079 = vmatmul.mubr.f32.gmra.mxu1 %v121_v35  ;;  %v55_v34 = vld [vmem:[%s4019_s0 + $0x148] sm:$0xff]  ;;  %v153_v35 = vld [vmem:[%s4019_s0 + $0x458] sm:$0xff] }
  0x34   :  { %1934 = vmatprep.mubr.f32.mxu0 %v24_v36  ;;  %2081 = vmatprep.mubr.f32.mxu1 %v122_v37  ;;  %v56_v36 = vld [vmem:[%s4019_s0 + $0x150] sm:$0xff]  ;;  %v154_v37 = vld [vmem:[%s4019_s0 + $0x460] sm:$0xff] }
  0x37   :  { %1935 = vmatmul.mubr.f32.gmra.mxu0 %v25_v38  ;;  %2082 = vmatmul.mubr.f32.gmra.mxu1 %v123_v39  ;;  %v57_v38 = vld [vmem:[%s4019_s0 + $0x158] sm:$0xff]  ;;  %v155_v39 = vld [vmem:[%s4019_s0 + $0x468] sm:$0xff] }
  0x38   :  { %1937 = vmatprep.mubr.f32.mxu0 %v26_v40  ;;  %2084 = vmatprep.mubr.f32.mxu1 %v124_v41  ;;  %v58_v40 = vld [vmem:[%s4019_s0 + $0x160] sm:$0xff]  ;;  %v156_v41 = vld [vmem:[%s4019_s0 + $0x470] sm:$0xff] }
  0x3b   :  { %1938 = vmatmul.mubr.f32.gmra.mxu0 %v27_v42  ;;  %2085 = vmatmul.mubr.f32.gmra.mxu1 %v125_v43  ;;  %v59_v42 = vld [vmem:[%s4019_s0 + $0x168] sm:$0xff]  ;;  %v157_v43 = vld [vmem:[%s4019_s0 + $0x478] sm:$0xff] }
  0x3c   :  { %1940 = vmatprep.mubr.f32.mxu0 %v28_v44  ;;  %2087 = vmatprep.mubr.f32.mxu1 %v126_v45  ;;  %v60_v44 = vld [vmem:[%s4019_s0 + $0x170] sm:$0xff]  ;;  %v158_v45 = vld [vmem:[%s4019_s0 + $0x480] sm:$0xff] }
  0x3f   :  { %1941 = vmatmul.mubr.f32.gmra.mxu0 %v29_v46  ;;  %2088 = vmatmul.mubr.f32.gmra.mxu1 %v127_v47  ;;  %v61_v46 = vld [vmem:[%s4019_s0 + $0x178] sm:$0xff]  ;;  %v159_v47 = vld [vmem:[%s4019_s0 + $0x488] sm:$0xff] }
  0x40   :  { %1943 = vmatprep.mubr.f32.mxu0 %v30_v48  ;;  %2090 = vmatprep.mubr.f32.mxu1 %v128_v49  ;;  %v62_v48 = vld [vmem:[%s4019_s0 + $0x180] sm:$0xff]  ;;  %v160_v49 = vld [vmem:[%s4019_s0 + $0x490] sm:$0xff] }
  0x43   :  { %1944 = vmatmul.mubr.f32.gmra.mxu0 %v31_v50  ;;  %2091 = vmatmul.mubr.f32.gmra.mxu1 %v129_v51  ;;  %v63_v50 = vld [vmem:[%s4019_s0 + $0x188] sm:$0xff]  ;;  %v161_v51 = vld [vmem:[%s4019_s0 + $0x498] sm:$0xff] }
  0x44   :  { %1946 = vmatprep.mubr.f32.mxu0 %v32_v52  ;;  %2093 = vmatprep.mubr.f32.mxu1 %v130_v53  ;;  %v64_v52 = vld [vmem:[%s4019_s0 + $0x190] sm:$0xff]  ;;  %v162_v53 = vld [vmem:[%s4019_s0 + $0x4a0] sm:$0xff] }
  0x47   :  { %1947 = vmatmul.mubr.f32.gmra.mxu0 %v33_v54  ;;  %2094 = vmatmul.mubr.f32.gmra.mxu1 %v131_v55  ;;  %v65_v54 = vld [vmem:[%s4019_s0 + $0x198] sm:$0xff]  ;;  %v163_v55 = vld [vmem:[%s4019_s0 + $0x4a8] sm:$0xff] }
  0x48   :  { %1949 = vmatprep.mubr.f32.mxu0 %v34_v56  ;;  %2096 = vmatprep.mubr.f32.mxu1 %v132_v57  ;;  %v66_v56 = vld [vmem:[%s4019_s0 + $0x1a0] sm:$0xff]  ;;  %v164_v57 = vld [vmem:[%s4019_s0 + $0x4b0] sm:$0xff] }
  0x4b   :  { %1950 = vmatmul.mubr.f32.gmra.mxu0 %v35_v58  ;;  %2097 = vmatmul.mubr.f32.gmra.mxu1 %v133_v59  ;;  %v67_v58 = vld [vmem:[%s4019_s0 + $0x1a8] sm:$0xff]  ;;  %v165_v59 = vld [vmem:[%s4019_s0 + $0x4b8] sm:$0xff] }
  0x4c   :  { %1952 = vmatprep.mubr.f32.mxu0 %v36_v60  ;;  %2099 = vmatprep.mubr.f32.mxu1 %v134_v61  ;;  %v68_v60 = vld [vmem:[%s4019_s0 + $0x1b0] sm:$0xff]  ;;  %v166_v61 = vld [vmem:[%s4019_s0 + $0x4c0] sm:$0xff] }
  0x4f   :  { %1953 = vmatmul.mubr.f32.gmra.mxu0 %v37_v62  ;;  %2100 = vmatmul.mubr.f32.gmra.mxu1 %v135_v63  ;;  %v69_v62 = vld [vmem:[%s4019_s0 + $0x1b8] sm:$0xff]  ;;  %v167_v63 = vld [vmem:[%s4019_s0 + $0x4c8] sm:$0xff] }
  0x50   :  { %1955 = vmatprep.mubr.f32.mxu0 %v38_v0  ;;  %2102 = vmatprep.mubr.f32.mxu1 %v136_v1  ;;  %v70_v0 = vld [vmem:[%s4019_s0 + $0x1c0] sm:$0xff]  ;;  %v168_v1 = vld [vmem:[%s4019_s0 + $0x4d0] sm:$0xff] }
  0x53   :  { %1956 = vmatmul.mubr.f32.gmra.mxu0 %v39_v2  ;;  %2103 = vmatmul.mubr.f32.gmra.mxu1 %v137_v3  ;;  %v71_v2 = vld [vmem:[%s4019_s0 + $0x1c8] sm:$0xff]  ;;  %v169_v3 = vld [vmem:[%s4019_s0 + $0x4d8] sm:$0xff] }
  0x54   :  { %1958 = vmatprep.mubr.f32.mxu0 %v40_v4  ;;  %2105 = vmatprep.mubr.f32.mxu1 %v138_v5  ;;  %v72_v4 = vld [vmem:[%s4019_s0 + $0x1d0] sm:$0xff]  ;;  %v170_v5 = vld [vmem:[%s4019_s0 + $0x4e0] sm:$0xff] }
  0x57   :  { %1959 = vmatmul.mubr.f32.gmra.mxu0 %v41_v6  ;;  %2106 = vmatmul.mubr.f32.gmra.mxu1 %v139_v7  ;;  %v73_v6 = vld [vmem:[%s4019_s0 + $0x1d8] sm:$0xff]  ;;  %v171_v7 = vld [vmem:[%s4019_s0 + $0x4e8] sm:$0xff] }
  0x58   :  { %1961 = vmatprep.mubr.f32.mxu0 %v42_v8  ;;  %2108 = vmatprep.mubr.f32.mxu1 %v140_v9  ;;  %v74_v8 = vld [vmem:[%s4019_s0 + $0x1e0] sm:$0xff]  ;;  %v172_v9 = vld [vmem:[%s4019_s0 + $0x4f0] sm:$0xff] }
  0x5b   :  { %1962 = vmatmul.mubr.f32.gmra.mxu0 %v43_v10  ;;  %2109 = vmatmul.mubr.f32.gmra.mxu1 %v141_v11  ;;  %v75_v10 = vld [vmem:[%s4019_s0 + $0x1e8] sm:$0xff]  ;;  %v173_v11 = vld [vmem:[%s4019_s0 + $0x4f8] sm:$0xff] }
  0x5c   :  { %1964 = vmatprep.mubr.f32.mxu0 %v44_v12  ;;  %2111 = vmatprep.mubr.f32.mxu1 %v142_v13  ;;  %v76_v12 = vld [vmem:[%s4019_s0 + $0x1f0] sm:$0xff]  ;;  %v174_v13 = vld [vmem:[%s4019_s0 + $0x500] sm:$0xff] }
  0x5f   :  { %1965 = vmatmul.mubr.f32.gmra.mxu0 %v45_v14  ;;  %2112 = vmatmul.mubr.f32.gmra.mxu1 %v143_v15  ;;  %v77_v14 = vld [vmem:[%s4019_s0 + $0x1f8] sm:$0xff]  ;;  %v175_v15 = vld [vmem:[%s4019_s0 + $0x508] sm:$0xff] }
  0x60   :  { %1967 = vmatprep.mubr.f32.mxu0 %v46_v16  ;;  %2114 = vmatprep.mubr.f32.mxu1 %v144_v17  ;;  %v78_v16 = vld [vmem:[%s4019_s0 + $0x200] sm:$0xff]  ;;  %v176_v17 = vld [vmem:[%s4019_s0 + $0x510] sm:$0xff] }
  0x63   :  { %1968 = vmatmul.mubr.f32.gmra.mxu0 %v47_v18  ;;  %2115 = vmatmul.mubr.f32.gmra.mxu1 %v145_v19  ;;  %v79_v18 = vld [vmem:[%s4019_s0 + $0x208] sm:$0xff]  ;;  %v177_v19 = vld [vmem:[%s4019_s0 + $0x518] sm:$0xff] }
  0x64   :  { %1970 = vmatprep.mubr.f32.mxu0 %v48_v20  ;;  %2117 = vmatprep.mubr.f32.mxu1 %v146_v21  ;;  %v80_v20 = vld [vmem:[%s4019_s0 + $0x210] sm:$0xff]  ;;  %v178_v21 = vld [vmem:[%s4019_s0 + $0x520] sm:$0xff] }
  0x67   :  { %1971 = vmatmul.mubr.f32.gmra.mxu0 %v49_v22  ;;  %2118 = vmatmul.mubr.f32.gmra.mxu1 %v147_v23  ;;  %v81_v22 = vld [vmem:[%s4019_s0 + $0x218] sm:$0xff]  ;;  %v179_v23 = vld [vmem:[%s4019_s0 + $0x528] sm:$0xff] }
  0x68   :  { %1973 = vmatprep.mubr.f32.mxu0 %v50_v24  ;;  %2120 = vmatprep.mubr.f32.mxu1 %v148_v25  ;;  %v82_v24 = vld [vmem:[%s4019_s0 + $0x220] sm:$0xff]  ;;  %v180_v25 = vld [vmem:[%s4019_s0 + $0x530] sm:$0xff] }
  0x6b   :  { %1974 = vmatmul.mubr.f32.gmra.mxu0 %v51_v26  ;;  %2121 = vmatmul.mubr.f32.gmra.mxu1 %v149_v27  ;;  %v83_v26 = vld [vmem:[%s4019_s0 + $0x228] sm:$0xff]  ;;  %v181_v27 = vld [vmem:[%s4019_s0 + $0x538] sm:$0xff] }
  0x6c   :  { %1976 = vmatprep.mubr.f32.mxu0 %v52_v28  ;;  %2123 = vmatprep.mubr.f32.mxu1 %v150_v29  ;;  %v84_v28 = vld [vmem:[%s4019_s0 + $0x230] sm:$0xff]  ;;  %v182_v29 = vld [vmem:[%s4019_s0 + $0x540] sm:$0xff] }
  0x6f   :  { %1977 = vmatmul.mubr.f32.gmra.mxu0 %v53_v30  ;;  %2124 = vmatmul.mubr.f32.gmra.mxu1 %v151_v31  ;;  %v85_v30 = vld [vmem:[%s4019_s0 + $0x238] sm:$0xff]  ;;  %v183_v31 = vld [vmem:[%s4019_s0 + $0x548] sm:$0xff] }
  0x70   :  { %1979 = vmatprep.mubr.f32.mxu0 %v54_v32  ;;  %2126 = vmatprep.mubr.f32.mxu1 %v152_v33  ;;  %v86_v32 = vld [vmem:[%s4019_s0 + $0x240] sm:$0xff]  ;;  %v184_v33 = vld [vmem:[%s4019_s0 + $0x550] sm:$0xff] }
  0x73   :  { %1980 = vmatmul.mubr.f32.gmra.mxu0 %v55_v34  ;;  %2127 = vmatmul.mubr.f32.gmra.mxu1 %v153_v35  ;;  %v87_v34 = vld [vmem:[%s4019_s0 + $0x248] sm:$0xff]  ;;  %v185_v35 = vld [vmem:[%s4019_s0 + $0x558] sm:$0xff] }
  0x74   :  { %1982 = vmatprep.mubr.f32.mxu0 %v56_v36  ;;  %2129 = vmatprep.mubr.f32.mxu1 %v154_v37  ;;  %v88_v36 = vld [vmem:[%s4019_s0 + $0x250] sm:$0xff]  ;;  %v186_v37 = vld [vmem:[%s4019_s0 + $0x560] sm:$0xff] }
  0x77   :  { %1983 = vmatmul.mubr.f32.gmra.mxu0 %v57_v38  ;;  %2130 = vmatmul.mubr.f32.gmra.mxu1 %v155_v39  ;;  %v89_v38 = vld [vmem:[%s4019_s0 + $0x258] sm:$0xff]  ;;  %v187_v39 = vld [vmem:[%s4019_s0 + $0x568] sm:$0xff] }
  0x78   :  { %1985 = vmatprep.mubr.f32.mxu0 %v58_v40  ;;  %2132 = vmatprep.mubr.f32.mxu1 %v156_v41  ;;  %v90_v40 = vld [vmem:[%s4019_s0 + $0x260] sm:$0xff]  ;;  %v188_v41 = vld [vmem:[%s4019_s0 + $0x570] sm:$0xff] }
  0x7b   :  { %1986 = vmatmul.mubr.f32.gmra.mxu0 %v59_v42  ;;  %2133 = vmatmul.mubr.f32.gmra.mxu1 %v157_v43  ;;  %v91_v42 = vld [vmem:[%s4019_s0 + $0x268] sm:$0xff]  ;;  %v189_v43 = vld [vmem:[%s4019_s0 + $0x578] sm:$0xff] }
  0x7c   :  { %1988 = vmatprep.mubr.f32.mxu0 %v60_v44  ;;  %2135 = vmatprep.mubr.f32.mxu1 %v158_v45  ;;  %v92_v44 = vld [vmem:[%s4019_s0 + $0x270] sm:$0xff]  ;;  %v190_v45 = vld [vmem:[%s4019_s0 + $0x580] sm:$0xff] }
  0x7f   :  { %1989 = vmatmul.mubr.f32.gmra.mxu0 %v61_v46  ;;  %2136 = vmatmul.mubr.f32.gmra.mxu1 %v159_v47  ;;  %v93_v46 = vld [vmem:[%s4019_s0 + $0x278] sm:$0xff]  ;;  %v191_v47 = vld [vmem:[%s4019_s0 + $0x588] sm:$0xff] }
  0x80   :  { %1991 = vmatprep.mubr.f32.mxu0 %v62_v48  ;;  %2138 = vmatprep.mubr.f32.mxu1 %v160_v49  ;;  %v94_v48 = vld [vmem:[%s4019_s0 + $0x280] sm:$0xff]  ;;  %v192_v49 = vld [vmem:[%s4019_s0 + $0x590] sm:$0xff] }
  0x83   :  { %1992 = vmatmul.mubr.f32.gmra.mxu0 %v63_v50  ;;  %2139 = vmatmul.mubr.f32.gmra.mxu1 %v161_v51  ;;  %v95_v50 = vld [vmem:[%s4019_s0 + $0x288] sm:$0xff]  ;;  %v193_v51 = vld [vmem:[%s4019_s0 + $0x598] sm:$0xff] }
  0x84   :  { %1994 = vmatprep.mubr.f32.mxu0 %v64_v52  ;;  %2141 = vmatprep.mubr.f32.mxu1 %v162_v53  ;;  %v96_v52 = vld [vmem:[%s4019_s0 + $0x290] sm:$0xff]  ;;  %v194_v53 = vld [vmem:[%s4019_s0 + $0x5a0] sm:$0xff] }
  0x87   :  { %1995 = vmatmul.mubr.f32.gmra.mxu0 %v65_v54  ;;  %2142 = vmatmul.mubr.f32.gmra.mxu1 %v163_v55  ;;  %v97_v54 = vld [vmem:[%s4019_s0 + $0x298] sm:$0xff]  ;;  %v195_v55 = vld [vmem:[%s4019_s0 + $0x5a8] sm:$0xff] }
  0x88   :  { %1997 = vmatprep.mubr.f32.mxu0 %v66_v56  ;;  %2144 = vmatprep.mubr.f32.mxu1 %v164_v57  ;;  %v98_v56 = vld [vmem:[%s4019_s0 + $0x2a0] sm:$0xff]  ;;  %v196_v57 = vld [vmem:[%s4019_s0 + $0x5b0] sm:$0xff] }
  0x8b   :  { %1998 = vmatmul.mubr.f32.gmra.mxu0 %v67_v58  ;;  %2145 = vmatmul.mubr.f32.gmra.mxu1 %v165_v59  ;;  %v99_v58 = vld [vmem:[%s4019_s0 + $0x2a8] sm:$0xff]  ;;  %v197_v59 = vld [vmem:[%s4019_s0 + $0x5b8] sm:$0xff] }
  0x8c   :  { %2000 = vmatprep.mubr.f32.mxu0 %v68_v60  ;;  %2147 = vmatprep.mubr.f32.mxu1 %v166_v61  ;;  %v100_v60 = vld [vmem:[%s4019_s0 + $0x2b0] sm:$0xff]  ;;  %v198_v61 = vld [vmem:[%s4019_s0 + $0x5c0] sm:$0xff] }
  0x8f   :  { %2001 = vmatmul.mubr.f32.gmra.mxu0 %v69_v62  ;;  %2148 = vmatmul.mubr.f32.gmra.mxu1 %v167_v63  ;;  %v101_v62 = vld [vmem:[%s4019_s0 + $0x2b8] sm:$0xff]  ;;  %v199_v63 = vld [vmem:[%s4019_s0 + $0x5c8] sm:$0xff] }
  0x90   :  { %2003 = vmatprep.mubr.f32.mxu0 %v70_v0  ;;  %2150 = vmatprep.mubr.f32.mxu1 %v168_v1  ;;  %v102_v0 = vld [vmem:[%s4019_s0 + $0x2c0] sm:$0xff]  ;;  %v200_v1 = vld [vmem:[%s4019_s0 + $0x5d0] sm:$0xff] }
  0x93   :  { %2004 = vmatmul.mubr.f32.gmra.mxu0 %v71_v2  ;;  %2151 = vmatmul.mubr.f32.gmra.mxu1 %v169_v3  ;;  %v103_v2 = vld [vmem:[%s4019_s0 + $0x2c8] sm:$0xff]  ;;  %v201_v3 = vld [vmem:[%s4019_s0 + $0x5d8] sm:$0xff] }
  0x94   :  { %2006 = vmatprep.mubr.f32.mxu0 %v72_v4  ;;  %2153 = vmatprep.mubr.f32.mxu1 %v170_v5  ;;  %v104_v4 = vld [vmem:[%s4019_s0 + $0x2d0] sm:$0xff]  ;;  %v202_v5 = vld [vmem:[%s4019_s0 + $0x5e0] sm:$0xff] }
  0x97   :  { %2007 = vmatmul.mubr.f32.gmra.mxu0 %v73_v6  ;;  %2154 = vmatmul.mubr.f32.gmra.mxu1 %v171_v7  ;;  %v105_v6 = vld [vmem:[%s4019_s0 + $0x2d8] sm:$0xff]  ;;  %v203_v7 = vld [vmem:[%s4019_s0 + $0x5e8] sm:$0xff] }
  0x98   :  { %2009 = vmatprep.mubr.f32.mxu0 %v74_v8  ;;  %2156 = vmatprep.mubr.f32.mxu1 %v172_v9  ;;  %v106_v8 = vld [vmem:[%s4019_s0 + $0x2e0] sm:$0xff]  ;;  %v204_v9 = vld [vmem:[%s4019_s0 + $0x5f0] sm:$0xff] }
  0x9b   :  { %2010 = vmatmul.mubr.f32.gmra.mxu0 %v75_v10  ;;  %2157 = vmatmul.mubr.f32.gmra.mxu1 %v173_v11  ;;  %v107_v10 = vld [vmem:[%s4019_s0 + $0x2e8] sm:$0xff]  ;;  %v205_v11 = vld [vmem:[%s4019_s0 + $0x5f8] sm:$0xff] }
  0x9c   :  { %2012 = vmatprep.mubr.f32.mxu0 %v76_v12  ;;  %2159 = vmatprep.mubr.f32.mxu1 %v174_v13  ;;  %v108_v12 = vld [vmem:[%s4019_s0 + $0x2f0] sm:$0xff]  ;;  %v206_v13 = vld [vmem:[%s4019_s0 + $0x600] sm:$0xff] }
  0x9f   :  { %2013 = vmatmul.mubr.f32.gmra.mxu0 %v77_v14  ;;  %2160 = vmatmul.mubr.f32.gmra.mxu1 %v175_v15  ;;  %v109_v14 = vld [vmem:[%s4019_s0 + $0x2f8] sm:$0xff]  ;;  %v207_v15 = vld [vmem:[%s4019_s0 + $0x608] sm:$0xff] }
  0xa0   :  { %2015 = vmatprep.mubr.f32.mxu0 %v78_v16  ;;  %2162 = vmatprep.mubr.f32.mxu1 %v176_v17  ;;  %v110_v16 = vld [vmem:[%s4019_s0 + $0x300] sm:$0xff]  ;;  %v208_v17 = vld [vmem:[%s4019_s0 + $0x610] sm:$0xff] }
  0xa3   :  { %2016 = vmatmul.mubr.f32.gmra.mxu0 %v79_v18  ;;  %2163 = vmatmul.mubr.f32.gmra.mxu1 %v177_v19  ;;  %v111_v18 = vld [vmem:[%s4019_s0 + $0x308] sm:$0xff]  ;;  %v209_v19 = vld [vmem:[%s4019_s0 + $0x618] sm:$0xff] }
  0xa4   :  { %2018 = vmatprep.mubr.f32.mxu0 %v80_v20  ;;  %2165 = vmatprep.mubr.f32.mxu1 %v178_v21 }
  0xa7   :  { %2019 = vmatmul.mubr.f32.gmra.mxu0 %v81_v22  ;;  %2166 = vmatmul.mubr.f32.gmra.mxu1 %v179_v23 }
  0xa8   :  { %2021 = vmatprep.mubr.f32.mxu0 %v82_v24  ;;  %2168 = vmatprep.mubr.f32.mxu1 %v180_v25 }
  0xab   :  { %2022 = vmatmul.mubr.f32.gmra.mxu0 %v83_v26  ;;  %2169 = vmatmul.mubr.f32.gmra.mxu1 %v181_v27 }
  0xac   :  { %2024 = vmatprep.mubr.f32.mxu0 %v84_v28  ;;  %2171 = vmatprep.mubr.f32.mxu1 %v182_v29 }
  0xaf   :  { %2025 = vmatmul.mubr.f32.gmra.mxu0 %v85_v30  ;;  %2172 = vmatmul.mubr.f32.gmra.mxu1 %v183_v31 }
  0xb0   :  { %2027 = vmatprep.mubr.f32.mxu0 %v86_v32  ;;  %2174 = vmatprep.mubr.f32.mxu1 %v184_v33 }
  0xb3   :  { %2028 = vmatmul.mubr.f32.gmra.mxu0 %v87_v34  ;;  %2175 = vmatmul.mubr.f32.gmra.mxu1 %v185_v35 }
  0xb4   :  { %2030 = vmatprep.mubr.f32.mxu0 %v88_v36  ;;  %2177 = vmatprep.mubr.f32.mxu1 %v186_v37 }
  0xb7   :  { %2031 = vmatmul.mubr.f32.gmra.mxu0 %v89_v38  ;;  %2178 = vmatmul.mubr.f32.gmra.mxu1 %v187_v39 }
  0xb8   :  { %2033 = vmatprep.mubr.f32.mxu0 %v90_v40  ;;  %2180 = vmatprep.mubr.f32.mxu1 %v188_v41 }
  0xbb   :  { %2034 = vmatmul.mubr.f32.gmra.mxu0 %v91_v42  ;;  %2181 = vmatmul.mubr.f32.gmra.mxu1 %v189_v43 }
  0xbc   :  { %2036 = vmatprep.mubr.f32.mxu0 %v92_v44  ;;  %2183 = vmatprep.mubr.f32.mxu1 %v190_v45 }
  0xbf   :  { %2037 = vmatmul.mubr.f32.gmra.mxu0 %v93_v46  ;;  %2184 = vmatmul.mubr.f32.gmra.mxu1 %v191_v47 }
  0xc0   :  { %2039 = vmatprep.mubr.f32.mxu0 %v94_v48  ;;  %2186 = vmatprep.mubr.f32.mxu1 %v192_v49 }
  0xc3   :  { %2040 = vmatmul.mubr.f32.gmra.mxu0 %v95_v50  ;;  %2187 = vmatmul.mubr.f32.gmra.mxu1 %v193_v51 }
  0xc4   :  { %2042 = vmatprep.mubr.f32.mxu0 %v96_v52  ;;  %2189 = vmatprep.mubr.f32.mxu1 %v194_v53 }
  0xc7   :  { %2043 = vmatmul.mubr.f32.gmra.mxu0 %v97_v54  ;;  %2190 = vmatmul.mubr.f32.gmra.mxu1 %v195_v55 }
  0xc8   :  { %2045 = vmatprep.mubr.f32.mxu0 %v98_v56  ;;  %2192 = vmatprep.mubr.f32.mxu1 %v196_v57 }
  0xcb   :  { %2046 = vmatmul.mubr.f32.gmra.mxu0 %v99_v58  ;;  %2193 = vmatmul.mubr.f32.gmra.mxu1 %v197_v59 }
  0xcc   :  { %2048 = vmatprep.mubr.f32.mxu0 %v100_v60  ;;  %2195 = vmatprep.mubr.f32.mxu1 %v198_v61 }
  0xcf   :  { %2049 = vmatmul.mubr.f32.gmra.mxu0 %v101_v62  ;;  %2196 = vmatmul.mubr.f32.gmra.mxu1 %v199_v63 }
  0xd0   :  { %2051 = vmatprep.mubr.f32.mxu0 %v102_v0  ;;  %2198 = vmatprep.mubr.f32.mxu1 %v200_v1 }
  0xd3   :  { %2052 = vmatmul.mubr.f32.gmra.mxu0 %v103_v2  ;;  %2199 = vmatmul.mubr.f32.gmra.mxu1 %v201_v3 }
  0xd4   :  { %2054 = vmatprep.mubr.f32.mxu0 %v104_v4  ;;  %2201 = vmatprep.mubr.f32.mxu1 %v202_v5 }
  0xd7   :  { %2055 = vmatmul.mubr.f32.gmra.mxu0 %v105_v6  ;;  %2202 = vmatmul.mubr.f32.gmra.mxu1 %v203_v7 }
  0xd8   :  { %2057 = vmatprep.mubr.f32.mxu0 %v106_v8  ;;  %2204 = vmatprep.mubr.f32.mxu1 %v204_v9 }
  0xdb   :  { %2058 = vmatmul.mubr.f32.gmra.mxu0 %v107_v10  ;;  %2205 = vmatmul.mubr.f32.gmra.mxu1 %v205_v11 }
  0xdc   :  { %2060 = vmatprep.mubr.f32.mxu0 %v108_v12  ;;  %2207 = vmatprep.mubr.f32.mxu1 %v206_v13 }
  0xdf   :  { %2061 = vmatmul.mubr.f32.gmra.mxu0 %v109_v14  ;;  %2208 = vmatmul.mubr.f32.gmra.mxu1 %v207_v15 }
  0xe0   :  { %2063 = vmatprep.mubr.f32.mxu0 %v110_v16  ;;  %2210 = vmatprep.mubr.f32.mxu1 %v208_v17  ;;  %v3025_v16 = vld [vmem:[%s4020_s2] ss:$0 sm:$0xff] }
  0xe3   :  { %v2902_v20 = vpop.f32.mrf.mxu0  ;;  %2064 = vmatmul.mubr.f32.gmra.mxu0 %v111_v18  ;;  %v2904_v21 = vpop.f32.mrf.mxu1  ;;  %2211 = vmatmul.mubr.f32.gmra.mxu1 %v209_v19 }
  0xe5   :  { %v2906_v22 = vpop.f32.mrf.mxu0  ;;  %v2908_v23 = vpop.f32.mrf.mxu1 }
  0xe7   :  { %v2910_v24 = vpop.f32.mrf.mxu0  ;;  %v2912_v25 = vpop.f32.mrf.mxu1 }
  0xe9   :  { %v2914_v26 = vpop.f32.mrf.mxu0  ;;  %v2916_v27 = vpop.f32.mrf.mxu1 }
  0xeb   :  { %v2918_v28 = vpop.f32.mrf.mxu0  ;;  %v2920_v29 = vpop.f32.mrf.mxu1 }
  0xed   :  { %v2922_v30 = vpop.f32.mrf.mxu0  ;;  %v2924_v31 = vpop.f32.mrf.mxu1 }
  0xef   :  { %v2926_v32 = vpop.f32.mrf.mxu0  ;;  %v2928_v33 = vpop.f32.mrf.mxu1 }
  0xf1   :  { %v2930_v34 = vpop.f32.mrf.mxu0  ;;  %v2932_v35 = vpop.f32.mrf.mxu1 }
  0xf3   :  { %v2934_v36 = vpop.f32.mrf.mxu0  ;;  %v2936_v37 = vpop.f32.mrf.mxu1 }
  0xf5   :  { %v2938_v38 = vpop.f32.mrf.mxu0  ;;  %v2940_v39 = vpop.f32.mrf.mxu1 }
  0xf7   :  { %v2942_v40 = vpop.f32.mrf.mxu0  ;;  %v2944_v41 = vpop.f32.mrf.mxu1 }
  0xf9   :  { %v2946_v42 = vpop.f32.mrf.mxu0  ;;  %v2948_v43 = vpop.f32.mrf.mxu1 }
  0xfb   :  { %v2950_v44 = vpop.f32.mrf.mxu0  ;;  %v2952_v45 = vpop.f32.mrf.mxu1 }
  0xfd   :  { %v2954_v46 = vpop.f32.mrf.mxu0  ;;  %v2956_v47 = vpop.f32.mrf.mxu1 }
  0xff   :  { %v2958_v48 = vpop.f32.mrf.mxu0  ;;  %v2960_v49 = vpop.f32.mrf.mxu1 }
 0x101   :  { %v2962_v50 = vpop.f32.mrf.mxu0  ;;  %v2964_v51 = vpop.f32.mrf.mxu1 }
 0x103   :  { %v2966_v52 = vpop.f32.mrf.mxu0  ;;  %v2968_v53 = vpop.f32.mrf.mxu1 }
 0x105   :  { %v2970_v54 = vpop.f32.mrf.mxu0  ;;  %v2972_v55 = vpop.f32.mrf.mxu1 }
 0x107   :  { %v2974_v56 = vpop.f32.mrf.mxu0  ;;  %v2976_v57 = vpop.f32.mrf.mxu1 }
 0x109   :  { %v2978_v58 = vpop.f32.mrf.mxu0  ;;  %v2980_v59 = vpop.f32.mrf.mxu1 }
 0x10b   :  { %v2982_v60 = vpop.f32.mrf.mxu0  ;;  %v2984_v61 = vpop.f32.mrf.mxu1 }
 0x10d   :  { %v2986_v62 = vpop.f32.mrf.mxu0  ;;  %v2988_v63 = vpop.f32.mrf.mxu1 }
 0x10f   :  { %v2990_v0 = vpop.f32.mrf.mxu0  ;;  %v2992_v1 = vpop.f32.mrf.mxu1 }
 0x111   :  { %v2994_v2 = vpop.f32.mrf.mxu0  ;;  %v2996_v3 = vpop.f32.mrf.mxu1 }
 0x113   :  { %v2998_v4 = vpop.f32.mrf.mxu0  ;;  %v3000_v5 = vpop.f32.mrf.mxu1 }
 0x115   :  { %v3002_v6 = vpop.f32.mrf.mxu0  ;;  %v3004_v7 = vpop.f32.mrf.mxu1 }
 0x117   :  { %v3006_v8 = vpop.f32.mrf.mxu0  ;;  %v3008_v9 = vpop.f32.mrf.mxu1 }
 0x119   :  { %v3010_v10 = vpop.f32.mrf.mxu0  ;;  %v3012_v11 = vpop.f32.mrf.mxu1 }
 0x11a   :  { %4062 = vst [vmem:[#allocation2_spill] sm:$0xff] %v3012_v11 }
 0x11b   :  { %v3014_v12 = vpop.f32.mrf.mxu0  ;;  %v3016_v13 = vpop.f32.mrf.mxu1 }
 0x11c   :  { %4063 = vst [vmem:[#allocation3_spill] sm:$0xff] %v3014_v12  ;;  %4064 = vst [vmem:[#allocation4_spill] sm:$0xff] %v3016_v13  ;;  %v3037_v13 = vadd.f32 %v2902_v20, %v3025_v16  ;;  %v3057_v20 = vadd.f32 %v2910_v24, %v3025_v16  ;;  %v3078_v24 = vadd.f32 %v2918_v28, %v3025_v16 }
 0x11d   :  { %v3018_v14 = vpop.f32.mrf.mxu0  ;;  %v3020_v15 = vpop.f32.mrf.mxu1  ;;  %v3096_v28 = vadd.f32 %v2926_v32, %v3025_v16  ;;  %v3113_v32 = vadd.f32 %v3025_v16, %v2930_v34  ;;  %v3150_v34 = vadd.f32 %v2942_v40, %v3025_v16 }
 0x11e   :  { %4065 = vst [vmem:[#allocation5_spill] sm:$0xff] %v3018_v14  ;;  %4066 = vst [vmem:[#allocation6_spill] sm:$0xff] %v3020_v15  ;;  %v3041_v15 = vadd.f32 %v2904_v21, %v3025_v16  ;;  %v3045_v14 = vadd.f32 %v3025_v16, %v2906_v22  ;;  %v3061_v21 = vadd.f32 %v2912_v25, %v3025_v16 }
 0x11f   :  { %v3027_v17 = vpop.f32.mrf.mxu0  ;;  %v3029_v18 = vpop.f32.mrf.mxu1  ;;  %4070 = vst [vmem:[#allocation10_spill] sm:$0xff] %v3037_v13  ;;  %4075 = vst [vmem:[#allocation15_spill] sm:$0xff] %v3057_v20  ;;  %v3065_v22 = vadd.f32 %v3025_v16, %v2914_v26  ;;  %v3082_v25 = vadd.f32 %v2920_v29, %v3025_v16  ;;  %v3086_v26 = vadd.f32 %v3025_v16, %v2922_v30 }
 0x120   :  { %4067 = vst [vmem:[#allocation7_spill] sm:$0xff] %v3027_v17  ;;  %4071 = vst [vmem:[#allocation11_spill] sm:$0xff] %v3041_v15  ;;  %v3138_v20 = vadd.f32 %v3025_v16, %v2938_v38  ;;  %v3158_v38 = vadd.f32 %v3025_v16, %v2946_v42  ;;  %v3174_v42 = vadd.f32 %v2950_v44, %v3025_v16 }
 0x121   :  { %v3031_v19 = vpop.f32.mrf.mxu0  ;;  %v3033_v11 = vpop.f32.mrf.mxu1  ;;  %4072 = vst [vmem:[#allocation12_spill] sm:$0xff] %v3045_v14  ;;  %4076 = vst [vmem:[#allocation16_spill] sm:$0xff] %v3061_v21  ;;  %v3117_v14 = vadd.f32 %v3025_v16, %v2932_v35  ;;  %v3134_v35 = vadd.f32 %v2936_v37, %v3025_v16  ;;  %v3154_v37 = vadd.f32 %v2944_v41, %v3025_v16 }
 0x122   :  { %4068 = vst [vmem:[#allocation8_spill] sm:$0xff] %v3031_v19  ;;  %4069 = vst [vmem:[#allocation9_spill] sm:$0xff] %v3033_v11  ;;  %v3053_v19 = vadd.f32 %v3025_v16, %v2908_v23  ;;  %v3178_v21 = vadd.f32 %v2952_v45, %v3025_v16  ;;  %v3192_v44 = vadd.f32 %v2958_v48, %v3025_v16 }
 0x123   :  { %v3047_v12 = vpop.f32.mrf.mxu0  ;;  %v3049_v17 = vpop.f32.mrf.mxu1  ;;  %4079 = vst [vmem:[#allocation19_spill] sm:$0xff] %v3082_v25  ;;  %4080 = vst [vmem:[#allocation20_spill] sm:$0xff] %v3096_v28  ;;  %v3182_v28 = vadd.f32 %v3025_v16, %v2954_v46  ;;  %v3209_v48 = vadd.f32 %v3025_v16, %v2962_v50  ;;  %v3246_v50 = vadd.f32 %v2974_v56, %v3025_v16 }
 0x124   :  { %4073 = vst [vmem:[#allocation13_spill] sm:$0xff] %v3047_v12  ;;  %4074 = vst [vmem:[#allocation14_spill] sm:$0xff] %v3049_v17  ;;  %v3069_v12 = vadd.f32 %v3025_v16, %v2916_v27 }
 0x125   :  { %v3071_v17 = vpop.f32.mrf.mxu0  ;;  %v3073_v23 = vpop.f32.mrf.mxu1  ;;  %4083 = vst [vmem:[#allocation23_spill] sm:$0xff] %v3134_v35  ;;  %4084 = vst [vmem:[#allocation24_spill] sm:$0xff] %v3138_v20  ;;  %v3213_v20 = vadd.f32 %v3025_v16, %v2964_v51  ;;  %v3230_v51 = vadd.f32 %v2968_v53, %v3025_v16  ;;  %v3250_v53 = vadd.f32 %v2976_v57, %v3025_v16 }
 0x126   :  { %4077 = vst [vmem:[#allocation17_spill] sm:$0xff] %v3071_v17  ;;  %4078 = vst [vmem:[#allocation18_spill] sm:$0xff] %v3073_v23  ;;  %v3092_v23 = vadd.f32 %v3025_v16, %v2924_v31  ;;  %v3109_v31 = vadd.f32 %v2928_v33, %v3025_v16  ;;  %v3128_v33 = vadd.f32 %v2934_v36, %v3025_v16  ;;  %v4115_v17 = vld [vmem:[#allocation5_spill] sm:$0xff] }
 0x127   :  { %v3098_v11 = vpop.f32.mrf.mxu0  ;;  %v3100_v29 = vpop.f32.mrf.mxu1  ;;  %v3146_v36 = vadd.f32 %v3025_v16, %v2940_v39  ;;  %4085 = vst [vmem:[#allocation25_spill] sm:$0xff] %v3150_v34  ;;  %4086 = vst [vmem:[#allocation26_spill] sm:$0xff] %v3154_v37  ;;  %v3165_v39 = vadd.f32 %v3025_v16, %v2948_v43  ;;  %v3234_v34 = vadd.f32 %v3025_v16, %v2970_v54 }
 0x128   :  { %4081 = vst [vmem:[#allocation21_spill] sm:$0xff] %v3109_v31  ;;  %4082 = vst [vmem:[#allocation22_spill] sm:$0xff] %v3128_v33  ;;  %v3188_v31 = vadd.f32 %v3025_v16, %v2956_v47  ;;  %v3205_v47 = vadd.f32 %v2960_v49, %v3025_v16  ;;  %v3224_v49 = vadd.f32 %v2966_v52, %v3025_v16 }
 0x129   :  { %v3119_v13 = vpop.f32.mrf.mxu0  ;;  %v3121_v30 = vpop.f32.mrf.mxu1  ;;  %4087 = vst [vmem:[#allocation27_spill] sm:$0xff] %v3192_v44  ;;  %4089 = vst [vmem:[#allocation29_spill] sm:$0xff] %v3230_v51  ;;  %v3242_v52 = vadd.f32 %v3025_v16, %v2972_v55  ;;  %v3254_v54 = vadd.f32 %v3025_v16, %v2978_v58  ;;  %v3261_v55 = vadd.f32 %v3025_v16, %v2980_v59 }
 0x12a   :  { %4088 = vst [vmem:[#allocation28_spill] sm:$0xff] %v3224_v49  ;;  %v3270_v58 = vadd.f32 %v2982_v60, %v3025_v16  ;;  %v3274_v37 = vadd.f32 %v2984_v61, %v3025_v16  ;;  %v3278_v44 = vadd.f32 %v3025_v16, %v2986_v62  ;;  %v3288_v60 = vadd.f32 %v2990_v0, %v3025_v16 }
 0x12b   :  { %v3140_v27 = vpop.f32.mrf.mxu0  ;;  %v3142_v15 = vpop.f32.mrf.mxu1  ;;  %v3305_v0 = vadd.f32 %v3025_v16, %v2994_v2  ;;  %v3342_v2 = vadd.f32 %v3006_v8, %v3025_v16 }
 0x12c   :  { %4092 = vst [vmem:[#allocation32_spill] sm:$0xff] %v3270_v58  ;;  %4093 = vst [vmem:[#allocation33_spill] sm:$0xff] %v3274_v37  ;;  %v4116_v37 = vld [vmem:[#allocation6_spill] sm:$0xff] }
 0x12d   :  { %v3167_v40 = vpop.f32.mrf.mxu0  ;;  %v3169_v25 = vpop.f32.mrf.mxu1  ;;  %4094 = vst [vmem:[#allocation34_spill] sm:$0xff] %v3288_v60  ;;  %4105 = vst [vmem:[#allocation45_spill] sm:$0xff] %v3342_v2  ;;  %v4111_v60 = vld [vmem:[#allocation3_spill] sm:$0xff] }
 0x12f   :  { %v3194_v41 = vpop.f32.mrf.mxu0  ;;  %v3196_v45 = vpop.f32.mrf.mxu1 }
 0x131   :  { %v3215_v33 = vpop.f32.mrf.mxu0  ;;  %v3217_v46 = vpop.f32.mrf.mxu1 }
 0x133   :  { %v3236_v43 = vpop.f32.mrf.mxu0  ;;  %v3238_v35 = vpop.f32.mrf.mxu1 }
 0x134   :  { %4090 = vst [vmem:[#allocation30_spill] sm:$0xff] %v3238_v35 }
 0x135   :  { %v3263_v56 = vpop.f32.mrf.mxu0  ;;  %v3265_v35 = vpop.f32.mrf.mxu1 }
 0x136   :  { %4091 = vst [vmem:[#allocation31_spill] sm:$0xff] %v3265_v35  ;;  %v3284_v35 = vadd.f32 %v3025_v16, %v2988_v63  ;;  %v3301_v63 = vadd.f32 %v2992_v1, %v3025_v16  ;;  %v3320_v1 = vadd.f32 %v2998_v4, %v3025_v16  ;;  %v3338_v4 = vadd.f32 %v3025_v16, %v3004_v7  ;;  %v4107_v7 = vld [vmem:[#allocation2_spill] sm:$0xff] }
 0x137   :  { %v3290_v57 = vpop.f32.mrf.mxu0  ;;  %v3292_v61 = vpop.f32.mrf.mxu1 }
 0x138   :  { %4095 = vst [vmem:[#allocation35_spill] sm:$0xff] %v3290_v57  ;;  %4096 = vst [vmem:[#allocation36_spill] sm:$0xff] %v3292_v61  ;;  %v3309_v61 = vadd.f32 %v3025_v16, %v2996_v3  ;;  %v3326_v3 = vadd.f32 %v3000_v5, %v3025_v16  ;;  %v3346_v5 = vadd.f32 %v3008_v9, %v3025_v16  ;;  %v4113_v57 = vld [vmem:[#allocation4_spill] sm:$0xff]  ;;  %v4118_v9 = vld [vmem:[#allocation7_spill] sm:$0xff] }
 0x139   :  { %4097 = vst [vmem:[#allocation37_spill] sm:$0xff] %v3301_v63  ;;  %v3311_v49 = vpop.f32.mrf.mxu0  ;;  %v3313_v62 = vpop.f32.mrf.mxu1  ;;  %4100 = vst [vmem:[#allocation40_spill] sm:$0xff] %v3320_v1  ;;  %v3370_v63 = vadd.f32 %v4113_v57, %v3025_v16 }
 0x13a   :  { %4098 = vst [vmem:[#allocation38_spill] sm:$0xff] %v3311_v49  ;;  %4099 = vst [vmem:[#allocation39_spill] sm:$0xff] %v3313_v62  ;;  %v3330_v62 = vadd.f32 %v3025_v16, %v3002_v6  ;;  %v3350_v6 = vadd.f32 %v3025_v16, %v3010_v10  ;;  %v3366_v10 = vadd.f32 %v4111_v60, %v3025_v16 }
 0x13b   :  { %4101 = vst [vmem:[#allocation41_spill] sm:$0xff] %v3326_v3  ;;  %v3332_v59 = vpop.f32.mrf.mxu0  ;;  %v3334_v51 = vpop.f32.mrf.mxu1  ;;  %4106 = vst [vmem:[#allocation46_spill] sm:$0xff] %v3346_v5  ;;  %v3384_v60 = vadd.f32 %v4118_v9, %v3025_v16  ;;  %v4123_v9 = vld [vmem:[#allocation8_spill] sm:$0xff] }
 0x13c   :  { %4102 = vst [vmem:[#allocation42_spill] sm:$0xff] %v3330_v62  ;;  %4103 = vst [vmem:[#allocation43_spill] sm:$0xff] %v3332_v59  ;;  %v3357_v59 = vadd.f32 %v3025_v16, %v4107_v7  ;;  %v3401_v62 = vadd.f32 %v3025_v16, %v4123_v9 }
 0x13d   :  { %4104 = vst [vmem:[#allocation44_spill] sm:$0xff] %v3334_v51  ;;  %v3359_v8 = vpop.f32.mrf.mxu0  ;;  %v3361_v49 = vpop.f32.mrf.mxu1  ;;  %4112 = vst [vmem:[#allocation3_spill] sm:$0xff] %v3366_v10  ;;  %v3374_v51 = vadd.f32 %v3025_v16, %v4115_v17  ;;  %v3443_v10 = vadd.f32 %v3100_v29, %v3025_v16  ;;  %v3458_v29 = vadd.f32 %v3025_v16, %v3121_v30 }
 0x13e   :  { %4108 = vst [vmem:[#allocation2_spill] sm:$0xff] %v3357_v59  ;;  %4109 = vst [vmem:[#allocation47_spill] sm:$0xff] %v3359_v8  ;;  %v3473_v30 = vadd.f32 %v3142_v15, %v3025_v16 }
 0x13f   :  { %4110 = vst [vmem:[#allocation48_spill] sm:$0xff] %v3361_v49  ;;  %4114 = vst [vmem:[#allocation4_spill] sm:$0xff] %v3370_v63  ;;  %v3380_v49 = vadd.f32 %v3025_v16, %v4116_v37  ;;  %v3386_v1 = vpop.f32.mrf.mxu0  ;;  %v3388_v57 = vpop.f32.mrf.mxu1  ;;  %v3397_v37 = vadd.f32 %v3029_v18, %v3025_v16  ;;  %v4128_v18 = vld [vmem:[#allocation13_spill] sm:$0xff]  ;;  %v4134_v63 = vld [vmem:[#allocation18_spill] sm:$0xff] }
 0x140   :  { %4119 = vst [vmem:[#allocation6_spill] sm:$0xff] %v3384_v60  ;;  %4120 = vst [vmem:[#allocation7_spill] sm:$0xff] %v3386_v1  ;;  %v4124_v1 = vld [vmem:[#allocation9_spill] sm:$0xff]  ;;  %v3416_v5 = vadd.f32 %v4128_v18, %v3025_v16  ;;  %v3430_v8 = vadd.f32 %v3025_v16, %v4134_v63  ;;  %v3434_v18 = vadd.f32 %v3098_v11, %v3025_v16  ;;  %v4143_v60 = vmax.f32 %v3053_v19, 0.0 }
 0x141   :  { %4117 = vst [vmem:[#allocation5_spill] sm:$0xff] %v3380_v49  ;;  %4121 = vst [vmem:[#allocation49_spill] sm:$0xff] %v3388_v57  ;;  %v3405_v57 = vadd.f32 %v3025_v16, %v4124_v1  ;;  %v3407_v58 = vpop.f32.mrf.mxu0  ;;  %v3409_v17 = vpop.f32.mrf.mxu1  ;;  %v4130_v1 = vld [vmem:[#allocation14_spill] sm:$0xff] }
 0x142   :  { %4122 = vst [vmem:[#allocation50_spill] sm:$0xff] %v3397_v37  ;;  %4126 = vst [vmem:[#allocation9_spill] sm:$0xff] %v3407_v58  ;;  %v3422_v59 = vadd.f32 %v4130_v1, %v3025_v16  ;;  %v4132_v58 = vld [vmem:[#allocation17_spill] sm:$0xff] }
 0x143   :  { %4125 = vst [vmem:[#allocation8_spill] sm:$0xff] %v3405_v57  ;;  %4127 = vst [vmem:[#allocation51_spill] sm:$0xff] %v3409_v17  ;;  %v3426_v17 = vadd.f32 %v3025_v16, %v4132_v58  ;;  %v1993_v7 = vpop.f32.mrf.mxu0  ;;  %v2140_v3 = vpop.f32.mrf.mxu1 }
 0x144   :  { %4129 = vst [vmem:[#allocation13_spill] sm:$0xff] %v3416_v5  ;;  %4131 = vst [vmem:[#allocation14_spill] sm:$0xff] %v3422_v59  ;;  %v545_v2 = vadd.f32 %v1993_v7, %v3025_v16  ;;  %v1035_v9 = vadd.f32 %v2140_v3, %v3025_v16  ;;  %v3452_v7 = vadd.f32 %v3025_v16, %v3119_v13 }
 0x145   :  { %4133 = vst [vmem:[#allocation17_spill] sm:$0xff] %v3426_v17  ;;  %4135 = vst [vmem:[#allocation18_spill] sm:$0xff] %v3434_v18  ;;  %v3445_v63 = vpop.f32.mrf.mxu0  ;;  %v3447_v49 = vpop.f32.mrf.mxu1 }
 0x146   :  { %4136 = vst [vmem:[#allocation52_spill] sm:$0xff] %v3443_v10  ;;  %4137 = vst [vmem:[#allocation53_spill] sm:$0xff] %v3445_v63  ;;  %v1327_v3 = vmax.f32 %v545_v2, 0.0  ;;  %v1425_v1 = vmax.f32 %v1035_v9, 0.0  ;;  %v3462_v63 = vadd.f32 %v3140_v27, %v3025_v16  ;;  %v4141_v2 = vld [vmem:[#allocation12_spill] sm:$0xff] }
 0x147   :  { %4138 = vst [vmem:[#allocation54_spill] sm:$0xff] %v3447_v49  ;;  %4139 = vst [vmem:[#allocation55_spill] sm:$0xff] %v3458_v29  ;;  %v1996_v49 = vpop.f32.mrf.mxu0  ;;  %v2143_v11 = vpop.f32.mrf.mxu1  ;;  %v4142_v9 = vmax.f32 %v4141_v2, 0.0 }
 0x148   :  { %4140 = vst [vmem:[#allocation56_spill] sm:$0xff] %v3462_v63  ;;  %v1523_v58 = vmax.f32 %v4143_v60, %v1425_v1  ;;  %4144 = vst [vmem:[#allocation12_spill] sm:$0xff] %v3473_v30  ;;  %v555_v27 = vadd.f32 %v1996_v49, %v3025_v16  ;;  %v1045_v17 = vadd.f32 %v2143_v11, %v3025_v16  ;;  %v4146_v1 = vmax.f32 %v3069_v12, 0.0 }
 0x149   :  { %v1474_v37 = vmax.f32 %v4142_v9, %v1327_v3  ;;  %v549_v57 = vpop.f32.mrf.mxu0  ;;  %v1039_v5 = vpop.f32.mrf.mxu1 }
 0x14a   :  { %v550_v3 = vadd.f32 %v3025_v16, %v549_v57  ;;  %v1040_v19 = vadd.f32 %v3025_v16, %v1039_v5  ;;  %v1329_v2 = vmax.f32 %v555_v27, 0.0  ;;  %v1427_v15 = vmax.f32 %v1045_v17, 0.0 }
 0x14b   :  { %v1572_v18 = vmax.f32 %v1474_v37, %v1523_v58  ;;  %v1999_v9 = vpop.f32.mrf.mxu0  ;;  %v2146_v59 = vpop.f32.mrf.mxu1  ;;  %v3490_v58 = vadd.f32 %v3025_v16, %v3167_v40  ;;  %v4145_v17 = vmax.f32 %v3065_v22, 0.0  ;;  %v3502_v40 = vadd.f32 %v3025_v16, %v3169_v25 }
 0x14c   :  { %v1328_v49 = vmax.f32 %v550_v3, 0.0  ;;  %v1426_v11 = vmax.f32 %v1040_v19, 0.0  ;;  %v565_v37 = vadd.f32 %v1999_v9, %v3025_v16  ;;  %v1055_v57 = vadd.f32 %v2146_v59, %v3025_v16  ;;  %v4147_v3 = vld [vmem:[#allocation10_spill] sm:$0xff]  ;;  %v4149_v9 = vld [vmem:[#allocation11_spill] sm:$0xff] }
 0x14d   :  { %1621 = vst [vmem:[%s4021_s3] sm:$0xff] %v1572_v18  ;;  %v1476_v27 = vmax.f32 %v4145_v17, %v1329_v2  ;;  %v1525_v60 = vmax.f32 %v4146_v1, %v1427_v15  ;;  %v559_v13 = vpop.f32.mrf.mxu0  ;;  %v1049_v18 = vpop.f32.mrf.mxu1  ;;  %v4148_v19 = vmax.f32 %v4147_v3, 0.0  ;;  %v4150_v10 = vmax.f32 %v4149_v9, 0.0  ;;  %v4155_v9 = vld [vmem:[#allocation16_spill] sm:$0xff] }
 0x14e   :  { %v1331_v29 = vmax.f32 %v565_v37, 0.0  ;;  %v1429_v5 = vmax.f32 %v1055_v57, 0.0  ;;  %v560_v22 = vadd.f32 %v3025_v16, %v559_v13  ;;  %v1050_v12 = vadd.f32 %v3025_v16, %v1049_v18  ;;  %v4153_v18 = vld [vmem:[#allocation15_spill] sm:$0xff] }
 0x14f   :  { %v1475_v63 = vmax.f32 %v4148_v19, %v1328_v49  ;;  %v1524_v59 = vmax.f32 %v4150_v10, %v1426_v11  ;;  %v1574_v30 = vmax.f32 %v1476_v27, %v1525_v60  ;;  %v2002_v1 = vpop.f32.mrf.mxu0  ;;  %v2149_v2 = vpop.f32.mrf.mxu1  ;;  %v4151_v17 = vmax.f32 %v3086_v26, 0.0 }
 0x150   :  { %v4152_v3 = vmax.f32 %v3092_v23, 0.0  ;;  %v575_v11 = vadd.f32 %v2002_v1, %v3025_v16  ;;  %v1314_v37 = vmax.f32 %v3490_v58, 0.0  ;;  %v1330_v25 = vmax.f32 %v560_v22, 0.0  ;;  %v4258_v58 = vld [vmem:[#allocation18_spill] sm:$0xff] }
 0x151   :  { %v1573_v15 = vmax.f32 %v1475_v63, %v1524_v59  ;;  %v1478_v49 = vmax.f32 %v4151_v17, %v1331_v29  ;;  %1623 = vst [vmem:[%s4021_s3 + $0x10] sm:$0xff] %v1574_v30  ;;  %v1428_v13 = vmax.f32 %v1050_v12, 0.0  ;;  %v1065_v60 = vadd.f32 %v2149_v2, %v3025_v16  ;;  %v569_v57 = vpop.f32.mrf.mxu0  ;;  %v1059_v63 = vpop.f32.mrf.mxu1 }
 0x152   :  { %v1527_v10 = vmax.f32 %v4152_v3, %v1429_v5  ;;  %v1333_v26 = vmax.f32 %v575_v11, 0.0  ;;  %v570_v29 = vadd.f32 %v3025_v16, %v569_v57  ;;  %v1060_v5 = vadd.f32 %v3025_v16, %v1059_v63 }
 0x153   :  { %1622 = vst [vmem:[%s4021_s3 + $0x8] sm:$0xff] %v1573_v15  ;;  %v1412_v27 = vmax.f32 %v3502_v40, 0.0  ;;  %v4154_v30 = vmax.f32 %v4153_v18, 0.0  ;;  %v4156_v59 = vmax.f32 %v4155_v9, 0.0  ;;  %v1431_v12 = vmax.f32 %v1065_v60, 0.0  ;;  %v2005_v1 = vpop.f32.mrf.mxu0  ;;  %v2152_v2 = vpop.f32.mrf.mxu1 }
 0x154   :  { %v1576_v23 = vmax.f32 %v1478_v49, %v1527_v10  ;;  %v4157_v15 = vmax.f32 %v3113_v32, 0.0  ;;  %v1332_v49 = vmax.f32 %v570_v29, 0.0  ;;  %v1430_v3 = vmax.f32 %v1060_v5, 0.0 }
 0x155   :  { %v1477_v19 = vmax.f32 %v4154_v30, %v1330_v25  ;;  %v1526_v22 = vmax.f32 %v4156_v59, %v1428_v13  ;;  %v585_v10 = vadd.f32 %v2005_v1, %v3025_v16  ;;  %v3534_v11 = vadd.f32 %v3194_v41, %v3025_v16  ;;  %v579_v63 = vpop.f32.mrf.mxu0  ;;  %v1069_v18 = vpop.f32.mrf.mxu1  ;;  %v4162_v1 = vld [vmem:[#allocation24_spill] sm:$0xff] }
 0x156   :  { %1625 = vst [vmem:[%s4021_s3 + $0x20] sm:$0xff] %v1576_v23  ;;  %v1480_v17 = vmax.f32 %v4157_v15, %v1333_v26  ;;  %v4158_v13 = vmax.f32 %v3117_v14, 0.0  ;;  %v1075_v57 = vadd.f32 %v2152_v2, %v3025_v16  ;;  %v4159_v23 = vmax.f32 %v3078_v24, 0.0  ;;  %v4160_v26 = vld [vmem:[#allocation19_spill] sm:$0xff] }
 0x157   :  { %v1575_v25 = vmax.f32 %v1477_v19, %v1526_v22  ;;  %v4161_v29 = vmax.f32 %v4160_v26, 0.0  ;;  %v1335_v30 = vmax.f32 %v585_v10, 0.0  ;;  %v580_v9 = vadd.f32 %v3025_v16, %v579_v63  ;;  %v2008_v24 = vpop.f32.mrf.mxu0  ;;  %v2155_v22 = vpop.f32.mrf.mxu1  ;;  %v4165_v63 = vld [vmem:[#allocation20_spill] sm:$0xff] }
 0x158   :  { %v1529_v60 = vmax.f32 %v4158_v13, %v1431_v12  ;;  %v1479_v32 = vmax.f32 %v4159_v23, %v1332_v49  ;;  %v3546_v41 = vadd.f32 %v3196_v45, %v3025_v16  ;;  %v1433_v19 = vmax.f32 %v1075_v57, 0.0 }
 0x159   :  { %v1528_v5 = vmax.f32 %v4161_v29, %v1430_v3  ;;  %1624 = vst [vmem:[%s4021_s3 + $0x18] sm:$0xff] %v1575_v25  ;;  %v1070_v59 = vadd.f32 %v3025_v16, %v1069_v18  ;;  %v4163_v2 = vmax.f32 %v4162_v1, 0.0  ;;  %v1334_v49 = vmax.f32 %v580_v9, 0.0  ;;  %v1079_v57 = vpop.f32.mrf.mxu1 }
 0x15a   :  { %v1578_v14 = vmax.f32 %v1480_v17, %v1529_v60  ;;  %v595_v3 = vadd.f32 %v2008_v24, %v3025_v16  ;;  %v1317_v45 = vmax.f32 %v3534_v11, 0.0  ;;  %v4164_v17 = vmax.f32 %v3146_v36, 0.0  ;;  %v589_v60 = vpop.f32.mrf.mxu0 }
 0x15b   :  { %v1577_v12 = vmax.f32 %v1479_v32, %v1528_v5  ;;  %v1482_v15 = vmax.f32 %v4163_v2, %v1335_v30  ;;  %v1432_v25 = vmax.f32 %v1070_v59, 0.0  ;;  %v1085_v13 = vadd.f32 %v2155_v22, %v3025_v16  ;;  %v4167_v30 = vld [vmem:[#allocation21_spill] sm:$0xff]  ;;  %v2158_v24 = vpop.f32.mrf.mxu1 }
 0x15c   :  { %1627 = vst [vmem:[%s4021_s3 + $0x30] sm:$0xff] %v1578_v14  ;;  %v1531_v10 = vmax.f32 %v4164_v17, %v1433_v19  ;;  %v4166_v18 = vmax.f32 %v4165_v63, 0.0  ;;  %v1337_v32 = vmax.f32 %v595_v3, 0.0  ;;  %v590_v26 = vadd.f32 %v3025_v16, %v589_v60  ;;  %v2011_v59 = vpop.f32.mrf.mxu0  ;;  %v4171_v60 = vld [vmem:[#allocation22_spill] sm:$0xff] }
 0x15d   :  { %1626 = vst [vmem:[%s4021_s3 + $0x28] sm:$0xff] %v1577_v12  ;;  %v1080_v29 = vadd.f32 %v3025_v16, %v1079_v57  ;;  %v1415_v36 = vmax.f32 %v3546_v41, 0.0  ;;  %v4168_v9 = vmax.f32 %v4167_v30, 0.0  ;;  %v1435_v19 = vmax.f32 %v1085_v13, 0.0  ;;  %v1089_v13 = vpop.f32.mrf.mxu1 }
 0x15e   :  { %v1481_v23 = vmax.f32 %v4166_v18, %v1334_v49  ;;  %v1580_v5 = vmax.f32 %v1482_v15, %v1531_v10  ;;  %v4169_v22 = vmax.f32 %v3158_v38, 0.0  ;;  %v1336_v1 = vmax.f32 %v590_v26, 0.0  ;;  %v599_v38 = vpop.f32.mrf.mxu0  ;;  %v4173_v18 = vld [vmem:[#allocation23_spill] sm:$0xff] }
 0x15f   :  { %v1530_v14 = vmax.f32 %v4168_v9, %v1432_v25  ;;  %v1434_v2 = vmax.f32 %v1080_v29, 0.0  ;;  %v605_v49 = vadd.f32 %v2011_v59, %v3025_v16  ;;  %v3577_v3 = vadd.f32 %v3025_v16, %v3215_v33 }
 0x160   :  { %v1484_v12 = vmax.f32 %v4169_v22, %v1337_v32  ;;  %1629 = vst [vmem:[%s4021_s3 + $0x40] sm:$0xff] %v1580_v5  ;;  %v4170_v17 = vmax.f32 %v3165_v39, 0.0  ;;  %v1095_v25 = vadd.f32 %v2158_v24, %v3025_v16  ;;  %v4172_v57 = vmax.f32 %v4171_v60, 0.0  ;;  %v2014_v9 = vpop.f32.mrf.mxu0 }
 0x161   :  { %v1579_v15 = vmax.f32 %v1481_v23, %v1530_v14  ;;  %v4174_v32 = vmax.f32 %v4173_v18, 0.0  ;;  %v1339_v33 = vmax.f32 %v605_v49, 0.0  ;;  %v600_v29 = vadd.f32 %v3025_v16, %v599_v38  ;;  %v2161_v14 = vpop.f32.mrf.mxu1  ;;  %v4179_v18 = vld [vmem:[#allocation26_spill] sm:$0xff] }
 0x162   :  { %v1533_v10 = vmax.f32 %v4170_v17, %v1435_v19  ;;  %v1483_v63 = vmax.f32 %v4172_v57, %v1336_v1  ;;  %v3592_v5 = vadd.f32 %v3025_v16, %v3217_v46  ;;  %v1437_v23 = vmax.f32 %v1095_v25, 0.0  ;;  %v609_v17 = vpop.f32.mrf.mxu0 }
 0x163   :  { %v1532_v26 = vmax.f32 %v4174_v32, %v1434_v2  ;;  %1628 = vst [vmem:[%s4021_s3 + $0x38] sm:$0xff] %v1579_v15  ;;  %v1090_v30 = vadd.f32 %v3025_v16, %v1089_v13  ;;  %v4175_v59 = vmax.f32 %v3182_v28, 0.0  ;;  %v1338_v22 = vmax.f32 %v600_v29, 0.0  ;;  %v4177_v28 = vld [vmem:[#allocation25_spill] sm:$0xff] }
 0x164   :  { %v1582_v39 = vmax.f32 %v1484_v12, %v1533_v10  ;;  %v615_v1 = vadd.f32 %v2014_v9, %v3025_v16  ;;  %v1316_v46 = vmax.f32 %v3577_v3, 0.0  ;;  %v4176_v12 = vmax.f32 %v3188_v31, 0.0  ;;  %v1099_v10 = vpop.f32.mrf.mxu1  ;;  %v2017_v29 = vpop.f32.mrf.mxu0 }
 0x165   :  { %v1581_v19 = vmax.f32 %v1483_v63, %v1532_v26  ;;  %v1486_v24 = vmax.f32 %v4175_v59, %v1339_v33  ;;  %v1436_v49 = vmax.f32 %v1090_v30, 0.0  ;;  %v1105_v15 = vadd.f32 %v2161_v14, %v3025_v16 }
 0x166   :  { %1631 = vst [vmem:[%s4021_s3 + $0x50] sm:$0xff] %v1582_v39  ;;  %v1535_v2 = vmax.f32 %v4176_v12, %v1437_v23  ;;  %v4178_v25 = vmax.f32 %v4177_v28, 0.0  ;;  %v1341_v13 = vmax.f32 %v615_v1, 0.0  ;;  %v610_v60 = vadd.f32 %v3025_v16, %v609_v17  ;;  %v2164_v39 = vpop.f32.mrf.mxu1 }
 0x167   :  { %1630 = vst [vmem:[%s4021_s3 + $0x48] sm:$0xff] %v1581_v19  ;;  %v1100_v57 = vadd.f32 %v3025_v16, %v1099_v10  ;;  %v1414_v31 = vmax.f32 %v3592_v5, 0.0  ;;  %v4180_v32 = vmax.f32 %v4179_v18, 0.0  ;;  %v1439_v33 = vmax.f32 %v1105_v15, 0.0 }
 0x168   :  { %v1485_v38 = vmax.f32 %v4178_v25, %v1338_v22  ;;  %v1584_v63 = vmax.f32 %v1486_v24, %v1535_v2  ;;  %v4181_v23 = vmax.f32 %v3209_v48, 0.0  ;;  %v1340_v9 = vmax.f32 %v610_v60, 0.0  ;;  %v619_v48 = vpop.f32.mrf.mxu0  ;;  %v1109_v2 = vpop.f32.mrf.mxu1  ;;  %v4185_v25 = vld [vmem:[#allocation30_spill] sm:$0xff] }
 0x169   :  { %v1534_v26 = vmax.f32 %v4180_v32, %v1436_v49  ;;  %v1438_v14 = vmax.f32 %v1100_v57, 0.0  ;;  %v625_v19 = vadd.f32 %v2017_v29, %v3025_v16  ;;  %v3623_v59 = vadd.f32 %v3236_v43, %v3025_v16 }
 0x16a   :  { %v1488_v30 = vmax.f32 %v4181_v23, %v1341_v13  ;;  %1633 = vst [vmem:[%s4021_s3 + $0x60] sm:$0xff] %v1584_v63  ;;  %v4182_v22 = vmax.f32 %v3213_v20, 0.0  ;;  %v1115_v12 = vadd.f32 %v2164_v39, %v3025_v16  ;;  %v4183_v49 = vmax.f32 %v3174_v42, 0.0  ;;  %v2020_v42 = vpop.f32.mrf.mxu0  ;;  %v2167_v57 = vpop.f32.mrf.mxu1 }
 0x16b   :  { %v1583_v24 = vmax.f32 %v1485_v38, %v1534_v26  ;;  %v4184_v17 = vmax.f32 %v3178_v21, 0.0  ;;  %v1343_v43 = vmax.f32 %v625_v19, 0.0  ;;  %v620_v28 = vadd.f32 %v3025_v16, %v619_v48 }
 0x16c   :  { %v1537_v1 = vmax.f32 %v4182_v22, %v1439_v33  ;;  %v1487_v15 = vmax.f32 %v4183_v49, %v1340_v9  ;;  %v3638_v13 = vadd.f32 %v4185_v25, %v3025_v16  ;;  %v1441_v38 = vmax.f32 %v1115_v12, 0.0  ;;  %v629_v9 = vpop.f32.mrf.mxu0 }
 0x16d   :  { %v1536_v10 = vmax.f32 %v4184_v17, %v1438_v14  ;;  %1632 = vst [vmem:[%s4021_s3 + $0x58] sm:$0xff] %v1583_v24  ;;  %v1110_v60 = vadd.f32 %v3025_v16, %v1109_v2  ;;  %v4186_v21 = vmax.f32 %v3234_v34, 0.0  ;;  %v1342_v32 = vmax.f32 %v620_v28, 0.0  ;;  %v1119_v14 = vpop.f32.mrf.mxu1  ;;  %v4188_v34 = vld [vmem:[#allocation27_spill] sm:$0xff] }
 0x16e   :  { %v1586_v20 = vmax.f32 %v1488_v30, %v1537_v1  ;;  %v635_v26 = vadd.f32 %v2020_v42, %v3025_v16  ;;  %v1319_v33 = vmax.f32 %v3623_v59, 0.0  ;;  %v4187_v29 = vmax.f32 %v3242_v52, 0.0  ;;  %v2023_v17 = vpop.f32.mrf.mxu0 }
 0x16f   :  { %v1585_v63 = vmax.f32 %v1487_v15, %v1536_v10  ;;  %v1490_v18 = vmax.f32 %v4186_v21, %v1343_v43  ;;  %v1440_v23 = vmax.f32 %v1110_v60, 0.0  ;;  %v1125_v30 = vadd.f32 %v2167_v57, %v3025_v16  ;;  %v2170_v10 = vpop.f32.mrf.mxu1 }
 0x170   :  { %1635 = vst [vmem:[%s4021_s3 + $0x70] sm:$0xff] %v1586_v20  ;;  %v1539_v39 = vmax.f32 %v4187_v29, %v1441_v38  ;;  %v4189_v19 = vmax.f32 %v4188_v34, 0.0  ;;  %v1345_v22 = vmax.f32 %v635_v26, 0.0  ;;  %v630_v1 = vadd.f32 %v3025_v16, %v629_v9  ;;  %v4195_v29 = vld [vmem:[#allocation29_spill] sm:$0xff]  ;;  %v4197_v9 = vld [vmem:[#allocation31_spill] sm:$0xff] }
 0x171   :  { %1634 = vst [vmem:[%s4021_s3 + $0x68] sm:$0xff] %v1585_v63  ;;  %v1120_v12 = vadd.f32 %v3025_v16, %v1119_v14  ;;  %v1417_v52 = vmax.f32 %v3638_v13, 0.0  ;;  %v4190_v2 = vmax.f32 %v3205_v47, 0.0  ;;  %v1443_v15 = vmax.f32 %v1125_v30, 0.0  ;;  %v1129_v21 = vpop.f32.mrf.mxu1 }
 0x172   :  { %v1489_v24 = vmax.f32 %v4189_v19, %v1342_v32  ;;  %v1588_v48 = vmax.f32 %v1490_v18, %v1539_v39  ;;  %v4191_v43 = vmax.f32 %v3254_v54, 0.0  ;;  %v1344_v25 = vmax.f32 %v630_v1, 0.0  ;;  %v639_v54 = vpop.f32.mrf.mxu0  ;;  %v4193_v18 = vld [vmem:[#allocation28_spill] sm:$0xff] }
 0x173   :  { %v1538_v49 = vmax.f32 %v4190_v2, %v1440_v23  ;;  %v1442_v20 = vmax.f32 %v1120_v12, 0.0  ;;  %v645_v38 = vadd.f32 %v2023_v17, %v3025_v16  ;;  %v3669_v60 = vadd.f32 %v3025_v16, %v3263_v56 }
 0x174   :  { %v1492_v28 = vmax.f32 %v4191_v43, %v1345_v22  ;;  %1637 = vst [vmem:[%s4021_s3 + $0x80] sm:$0xff] %v1588_v48  ;;  %v4192_v42 = vmax.f32 %v3261_v55, 0.0  ;;  %v1135_v63 = vadd.f32 %v2170_v10, %v3025_v16  ;;  %v4194_v32 = vmax.f32 %v4193_v18, 0.0  ;;  %v2173_v22 = vpop.f32.mrf.mxu1 }
 0x175   :  { %v1587_v47 = vmax.f32 %v1489_v24, %v1538_v49  ;;  %v4196_v39 = vmax.f32 %v4195_v29, 0.0  ;;  %v1347_v56 = vmax.f32 %v645_v38, 0.0  ;;  %v640_v30 = vadd.f32 %v3025_v16, %v639_v54  ;;  %v2026_v24 = vpop.f32.mrf.mxu0 }
 0x176   :  { %v1541_v57 = vmax.f32 %v4192_v42, %v1443_v15  ;;  %v1491_v26 = vmax.f32 %v4194_v32, %v1344_v25  ;;  %v3684_v14 = vadd.f32 %v3025_v16, %v4197_v9  ;;  %v1445_v34 = vmax.f32 %v1135_v63, 0.0 }
 0x177   :  { %v1540_v23 = vmax.f32 %v4196_v39, %v1442_v20  ;;  %1636 = vst [vmem:[%s4021_s3 + $0x78] sm:$0xff] %v1587_v47  ;;  %v1130_v19 = vadd.f32 %v3025_v16, %v1129_v21  ;;  %v4198_v12 = vmax.f32 %v3278_v44, 0.0  ;;  %v1346_v2 = vmax.f32 %v640_v30, 0.0  ;;  %v649_v25 = vpop.f32.mrf.mxu0  ;;  %v1139_v20 = vpop.f32.mrf.mxu1  ;;  %v4203_v30 = vld [vmem:[#allocation35_spill] sm:$0xff] }
 0x178   :  { %v1590_v55 = vmax.f32 %v1492_v28, %v1541_v57  ;;  %v655_v49 = vadd.f32 %v2026_v24, %v3025_v16  ;;  %v1318_v15 = vmax.f32 %v3669_v60, 0.0  ;;  %v4199_v17 = vmax.f32 %v3284_v35, 0.0 }
 0x179   :  { %v1589_v1 = vmax.f32 %v1491_v26, %v1540_v23  ;;  %v1494_v48 = vmax.f32 %v4198_v12, %v1347_v56  ;;  %v1444_v43 = vmax.f32 %v1130_v19, 0.0  ;;  %v1145_v28 = vadd.f32 %v2173_v22, %v3025_v16  ;;  %v2029_v32 = vpop.f32.mrf.mxu0  ;;  %v2176_v26 = vpop.f32.mrf.mxu1  ;;  %v4205_v22 = vld [vmem:[#allocation32_spill] sm:$0xff] }
 0x17a   :  { %1639 = vst [vmem:[%s4021_s3 + $0x90] sm:$0xff] %v1590_v55  ;;  %v1543_v10 = vmax.f32 %v4199_v17, %v1445_v34  ;;  %v4200_v44 = vmax.f32 %v3246_v50, 0.0  ;;  %v1349_v47 = vmax.f32 %v655_v49, 0.0  ;;  %v650_v42 = vadd.f32 %v3025_v16, %v649_v25 }
 0x17b   :  { %1638 = vst [vmem:[%s4021_s3 + $0x88] sm:$0xff] %v1589_v1  ;;  %v1140_v57 = vadd.f32 %v3025_v16, %v1139_v20  ;;  %v1416_v35 = vmax.f32 %v3684_v14, 0.0  ;;  %v4201_v54 = vmax.f32 %v3250_v53, 0.0  ;;  %v1447_v18 = vmax.f32 %v1145_v28, 0.0  ;;  %v1149_v24 = vpop.f32.mrf.mxu1 }
 0x17c   :  { %v1493_v38 = vmax.f32 %v4200_v44, %v1346_v2  ;;  %v1592_v63 = vmax.f32 %v1494_v48, %v1543_v10  ;;  %v4202_v29 = vmax.f32 %v3305_v0, 0.0  ;;  %v1348_v23 = vmax.f32 %v650_v42, 0.0  ;;  %v659_v0 = vpop.f32.mrf.mxu0  ;;  %v4207_v48 = vld [vmem:[#allocation33_spill] sm:$0xff]  ;;  %v4210_v42 = vld [vmem:[#allocation42_spill] sm:$0xff] }
 0x17d   :  { %v1542_v21 = vmax.f32 %v4201_v54, %v1444_v43  ;;  %v1446_v50 = vmax.f32 %v1140_v57, 0.0  ;;  %v665_v56 = vadd.f32 %v2029_v32, %v3025_v16  ;;  %v3715_v9 = vadd.f32 %v4203_v30, %v3025_v16  ;;  %v4209_v43 = vld [vmem:[#allocation36_spill] sm:$0xff] }
 0x17e   :  { %v1496_v39 = vmax.f32 %v4202_v29, %v1349_v47  ;;  %1641 = vst [vmem:[%s4021_s3 + $0xa0] sm:$0xff] %v1592_v63  ;;  %v4204_v55 = vmax.f32 %v3309_v61, 0.0  ;;  %v1155_v19 = vadd.f32 %v2176_v26, %v3025_v16  ;;  %v4206_v1 = vmax.f32 %v4205_v22, 0.0  ;;  %v2032_v44 = vpop.f32.mrf.mxu0 }
 0x17f   :  { %v1591_v53 = vmax.f32 %v1493_v38, %v1542_v21  ;;  %v4208_v2 = vmax.f32 %v4207_v48, 0.0  ;;  %v1351_v17 = vmax.f32 %v665_v56, 0.0  ;;  %v660_v10 = vadd.f32 %v3025_v16, %v659_v0  ;;  %v2179_v38 = vpop.f32.mrf.mxu1  ;;  %v4213_v56 = vld [vmem:[#allocation34_spill] sm:$0xff] }
 0x180   :  { %v1545_v34 = vmax.f32 %v4204_v55, %v1447_v18  ;;  %v1495_v12 = vmax.f32 %v4206_v1, %v1348_v23  ;;  %v3730_v28 = vadd.f32 %v4209_v43, %v3025_v16  ;;  %v1449_v25 = vmax.f32 %v1155_v19, 0.0  ;;  %v669_v23 = vpop.f32.mrf.mxu0 }
 0x181   :  { %v1544_v49 = vmax.f32 %v4208_v2, %v1446_v50  ;;  %1640 = vst [vmem:[%s4021_s3 + $0x98] sm:$0xff] %v1591_v53  ;;  %v1150_v20 = vadd.f32 %v3025_v16, %v1149_v24  ;;  %v4211_v57 = vmax.f32 %v4210_v42, 0.0  ;;  %v1350_v54 = vmax.f32 %v660_v10, 0.0  ;;  %v1159_v50 = vpop.f32.mrf.mxu1  ;;  %v4215_v24 = vld [vmem:[#allocation37_spill] sm:$0xff] }
 0x182   :  { %v1594_v61 = vmax.f32 %v1496_v39, %v1545_v34  ;;  %v675_v21 = vadd.f32 %v2032_v44, %v3025_v16  ;;  %v1321_v18 = vmax.f32 %v3715_v9, 0.0  ;;  %v4212_v32 = vmax.f32 %v3338_v4, 0.0  ;;  %v2035_v48 = vpop.f32.mrf.mxu0 }
 0x183   :  { %v1593_v47 = vmax.f32 %v1495_v12, %v1544_v49  ;;  %v1498_v63 = vmax.f32 %v4211_v57, %v1351_v17  ;;  %v1448_v29 = vmax.f32 %v1150_v20, 0.0  ;;  %v1165_v39 = vadd.f32 %v2179_v38, %v3025_v16  ;;  %v2182_v2 = vpop.f32.mrf.mxu1  ;;  %v4219_v38 = vld [vmem:[#allocation2_spill] sm:$0xff] }
 0x184   :  { %1643 = vst [vmem:[%s4021_s3 + $0xb0] sm:$0xff] %v1594_v61  ;;  %v1547_v26 = vmax.f32 %v4212_v32, %v1449_v25  ;;  %v4214_v30 = vmax.f32 %v4213_v56, 0.0  ;;  %v1353_v55 = vmax.f32 %v675_v21, 0.0  ;;  %v670_v34 = vadd.f32 %v3025_v16, %v669_v23  ;;  %v4218_v25 = vld [vmem:[#allocation38_spill] sm:$0xff]  ;;  %v4225_v56 = vld [vmem:[#allocation39_spill] sm:$0xff] }
 0x185   :  { %1642 = vst [vmem:[%s4021_s3 + $0xa8] sm:$0xff] %v1593_v47  ;;  %v1160_v19 = vadd.f32 %v3025_v16, %v1159_v50  ;;  %v1419_v4 = vmax.f32 %v3730_v28, 0.0  ;;  %v4216_v22 = vmax.f32 %v4215_v24, 0.0  ;;  %v1451_v12 = vmax.f32 %v1165_v39, 0.0 }
 0x186   :  { %v1497_v53 = vmax.f32 %v4214_v30, %v1350_v54  ;;  %v1596_v0 = vmax.f32 %v1498_v63, %v1547_v26  ;;  %v4217_v49 = vmax.f32 %v3350_v6, 0.0  ;;  %v1352_v10 = vmax.f32 %v670_v34, 0.0  ;;  %v679_v6 = vpop.f32.mrf.mxu0  ;;  %v1169_v63 = vpop.f32.mrf.mxu1  ;;  %v4221_v54 = vld [vmem:[#allocation40_spill] sm:$0xff]  ;;  %v4223_v26 = vld [vmem:[#allocation41_spill] sm:$0xff] }
 0x187   :  { %v1546_v1 = vmax.f32 %v4216_v22, %v1448_v29  ;;  %v1450_v43 = vmax.f32 %v1160_v19, 0.0  ;;  %v685_v61 = vadd.f32 %v2035_v48, %v3025_v16  ;;  %v3761_v20 = vadd.f32 %v3025_v16, %v4218_v25 }
 0x188   :  { %v1500_v17 = vmax.f32 %v4217_v49, %v1353_v55  ;;  %1645 = vst [vmem:[%s4021_s3 + $0xc0] sm:$0xff] %v1596_v0  ;;  %v4220_v47 = vmax.f32 %v4219_v38, 0.0  ;;  %v1175_v57 = vadd.f32 %v2182_v2, %v3025_v16  ;;  %v4222_v21 = vmax.f32 %v4221_v54, 0.0  ;;  %v2038_v19 = vpop.f32.mrf.mxu0  ;;  %v2185_v0 = vpop.f32.mrf.mxu1  ;;  %v4227_v49 = vld [vmem:[#allocation5_spill] sm:$0xff] }
 0x189   :  { %v1595_v44 = vmax.f32 %v1497_v53, %v1546_v1  ;;  %v4224_v29 = vmax.f32 %v4223_v26, 0.0  ;;  %v1355_v23 = vmax.f32 %v685_v61, 0.0  ;;  %v680_v50 = vadd.f32 %v3025_v16, %v679_v6 }
 0x18a   :  { %v1549_v42 = vmax.f32 %v4220_v47, %v1451_v12  ;;  %v1499_v32 = vmax.f32 %v4222_v21, %v1352_v10  ;;  %v3776_v30 = vadd.f32 %v3025_v16, %v4225_v56  ;;  %v1453_v55 = vmax.f32 %v1175_v57, 0.0  ;;  %v689_v25 = vpop.f32.mrf.mxu0  ;;  %v4231_v21 = vld [vmem:[#allocation46_spill] sm:$0xff] }
 0x18b   :  { %v1548_v39 = vmax.f32 %v4224_v29, %v1450_v43  ;;  %1644 = vst [vmem:[%s4021_s3 + $0xb8] sm:$0xff] %v1595_v44  ;;  %v1170_v34 = vadd.f32 %v3025_v16, %v1169_v63  ;;  %v4226_v22 = vmax.f32 %v3374_v51, 0.0  ;;  %v1354_v12 = vmax.f32 %v680_v50, 0.0  ;;  %v1179_v44 = vpop.f32.mrf.mxu1  ;;  %v4229_v51 = vld [vmem:[#allocation45_spill] sm:$0xff] }
 0x18c   :  { %v1598_v53 = vmax.f32 %v1500_v17, %v1549_v42  ;;  %v695_v48 = vadd.f32 %v2038_v19, %v3025_v16  ;;  %v1320_v2 = vmax.f32 %v3761_v20, 0.0  ;;  %v4228_v17 = vmax.f32 %v4227_v49, 0.0  ;;  %v4234_v19 = vld [vmem:[#allocation43_spill] sm:$0xff] }
 0x18d   :  { %v1597_v24 = vmax.f32 %v1499_v32, %v1548_v39  ;;  %v1502_v1 = vmax.f32 %v4226_v22, %v1355_v23  ;;  %v1452_v43 = vmax.f32 %v1170_v34, 0.0  ;;  %v1185_v61 = vadd.f32 %v2185_v0, %v3025_v16  ;;  %v2041_v39 = vpop.f32.mrf.mxu0  ;;  %v2188_v23 = vpop.f32.mrf.mxu1  ;;  %v3807_v34 = vld [vmem:[%s4020_s2] ss:$0 sm:$0xff] }
 0x18e   :  { %1647 = vst [vmem:[%s4021_s3 + $0xd0] sm:$0xff] %v1598_v53  ;;  %v1551_v10 = vmax.f32 %v4228_v17, %v1453_v55  ;;  %v4230_v38 = vmax.f32 %v4229_v51, 0.0  ;;  %v1357_v42 = vmax.f32 %v695_v48, 0.0  ;;  %v690_v57 = vadd.f32 %v3025_v16, %v689_v25  ;;  %v4237_v17 = vld [vmem:[#allocation3_spill] sm:$0xff] }
 0x18f   :  { %1646 = vst [vmem:[%s4021_s3 + $0xc8] sm:$0xff] %v1597_v24  ;;  %v1180_v6 = vadd.f32 %v3025_v16, %v1179_v44  ;;  %v1418_v63 = vmax.f32 %v3776_v30, 0.0  ;;  %v4232_v32 = vmax.f32 %v4231_v21, 0.0  ;;  %v1455_v29 = vmax.f32 %v1185_v61, 0.0  ;;  %v699_v48 = vpop.f32.mrf.mxu0  ;;  %v1189_v49 = vpop.f32.mrf.mxu1  ;;  %v4239_v61 = vld [vmem:[#allocation4_spill] sm:$0xff] }
 0x190   :  { %v1501_v47 = vmax.f32 %v4230_v38, %v1354_v12  ;;  %v1600_v54 = vmax.f32 %v1502_v1, %v1551_v10  ;;  %v4233_v50 = vmax.f32 %v3401_v62, 0.0  ;;  %v1356_v53 = vmax.f32 %v690_v57, 0.0  ;;  %v4235_v62 = vld [vmem:[#allocation8_spill] sm:$0xff] }
 0x191   :  { %v1550_v26 = vmax.f32 %v4232_v32, %v1452_v43  ;;  %v1454_v55 = vmax.f32 %v1180_v6, 0.0  ;;  %v705_v16 = vadd.f32 %v3807_v34, %v2041_v39  ;;  %v3812_v0 = vadd.f32 %v3807_v34, %v4234_v19  ;;  %v2044_v21 = vpop.f32.mrf.mxu0  ;;  %v2191_v32 = vpop.f32.mrf.mxu1 }
 0x192   :  { %v1504_v56 = vmax.f32 %v4233_v50, %v1357_v42  ;;  %1649 = vst [vmem:[%s4021_s3 + $0xe0] sm:$0xff] %v1600_v54  ;;  %v4236_v22 = vmax.f32 %v4235_v62, 0.0  ;;  %v1195_v12 = vadd.f32 %v3807_v34, %v2188_v23  ;;  %v4238_v10 = vmax.f32 %v4237_v17, 0.0  ;;  %v4241_v42 = vld [vmem:[#allocation44_spill] sm:$0xff] }
 0x193   :  { %v1599_v24 = vmax.f32 %v1501_v47, %v1550_v26  ;;  %v4240_v25 = vmax.f32 %v4239_v61, 0.0  ;;  %v1359_v51 = vmax.f32 %v705_v16, 0.0  ;;  %v700_v38 = vadd.f32 %v3807_v34, %v699_v48  ;;  %v709_v62 = vpop.f32.mrf.mxu0  ;;  %v4247_v61 = vld [vmem:[#allocation50_spill] sm:$0xff] }
 0x194   :  { %v1553_v1 = vmax.f32 %v4236_v22, %v1455_v29  ;;  %v1503_v43 = vmax.f32 %v4238_v10, %v1356_v53  ;;  %v3827_v57 = vadd.f32 %v3807_v34, %v4241_v42  ;;  %v1457_v6 = vmax.f32 %v1195_v12, 0.0  ;;  %v4242_v29 = vld [vmem:[#allocation17_spill] sm:$0xff]  ;;  %v1199_v22 = vpop.f32.mrf.mxu1 }
 0x195   :  { %v1552_v44 = vmax.f32 %v4240_v25, %v1454_v55  ;;  %1648 = vst [vmem:[%s4021_s3 + $0xd8] sm:$0xff] %v1599_v24  ;;  %v1190_v54 = vadd.f32 %v3807_v34, %v1189_v49  ;;  %v4243_v39 = vmax.f32 %v4242_v29, 0.0  ;;  %v1358_v50 = vmax.f32 %v700_v38, 0.0  ;;  %v2047_v38 = vpop.f32.mrf.mxu0 }
 0x196   :  { %v1602_v47 = vmax.f32 %v1504_v56, %v1553_v1  ;;  %v715_v53 = vadd.f32 %v3807_v34, %v2044_v21  ;;  %v1323_v55 = vmax.f32 %v3812_v0, 0.0  ;;  %v4244_v56 = vmax.f32 %v3430_v8, 0.0  ;;  %v4245_v1 = vld [vmem:[#allocation6_spill] sm:$0xff]  ;;  %v2194_v42 = vpop.f32.mrf.mxu1 }
 0x197   :  { %v1601_v26 = vmax.f32 %v1503_v43, %v1552_v44  ;;  %v1506_v23 = vmax.f32 %v4243_v39, %v1359_v51  ;;  %v1456_v19 = vmax.f32 %v1190_v54, 0.0  ;;  %v1205_v24 = vadd.f32 %v3807_v34, %v2191_v32 }
 0x198   :  { %1651 = vst [vmem:[%s4021_s3 + $0xf0] sm:$0xff] %v1602_v47  ;;  %v1555_v16 = vmax.f32 %v4244_v56, %v1457_v6  ;;  %v4246_v12 = vmax.f32 %v4245_v1, 0.0  ;;  %v1361_v49 = vmax.f32 %v715_v53, 0.0  ;;  %v710_v17 = vadd.f32 %v3807_v34, %v709_v62 }
 0x199   :  { %1650 = vst [vmem:[%s4021_s3 + $0xe8] sm:$0xff] %v1601_v26  ;;  %v1200_v10 = vadd.f32 %v3807_v34, %v1199_v22  ;;  %v1421_v8 = vmax.f32 %v3827_v57, 0.0  ;;  %v4248_v25 = vmax.f32 %v4247_v61, 0.0  ;;  %v1459_v51 = vmax.f32 %v1205_v24, 0.0  ;;  %v4250_v26 = vld [vmem:[#allocation47_spill] sm:$0xff]  ;;  %v4255_v22 = vld [vmem:[#allocation14_spill] sm:$0xff] }
 0x19a   :  { %v1505_v48 = vmax.f32 %v4246_v12, %v1358_v50  ;;  %v1604_v43 = vmax.f32 %v1506_v23, %v1555_v16  ;;  %v4249_v47 = vmax.f32 %v3452_v7, 0.0  ;;  %v1360_v54 = vmax.f32 %v710_v17, 0.0  ;;  %v4251_v23 = vld [vmem:[#allocation55_spill] sm:$0xff]  ;;  %v719_v7 = vpop.f32.mrf.mxu0  ;;  %v1209_v16 = vpop.f32.mrf.mxu1 }
 0x19b   :  { %v1554_v44 = vmax.f32 %v4248_v25, %v1456_v19  ;;  %v1458_v21 = vmax.f32 %v1200_v10, 0.0  ;;  %v725_v32 = vadd.f32 %v3807_v34, %v2047_v38  ;;  %v3858_v29 = vadd.f32 %v3807_v34, %v4250_v26  ;;  %v4253_v19 = vld [vmem:[#allocation13_spill] sm:$0xff]  ;;  %v4257_v10 = vld [vmem:[#allocation48_spill] sm:$0xff] }
 0x19c   :  { %v1508_v6 = vmax.f32 %v4249_v47, %v1361_v49  ;;  %1653 = vst [vmem:[%s4021_s3 + $0x100] sm:$0xff] %v1604_v43  ;;  %v4252_v50 = vmax.f32 %v4251_v23, 0.0  ;;  %v1215_v56 = vadd.f32 %v3807_v34, %v2194_v42  ;;  %v4254_v24 = vmax.f32 %v4253_v19, 0.0 }
 0x19d   :  { %v1603_v39 = vmax.f32 %v1505_v48, %v1554_v44  ;;  %v4256_v1 = vmax.f32 %v4255_v22, 0.0  ;;  %v1363_v49 = vmax.f32 %v725_v32, 0.0  ;;  %v720_v17 = vadd.f32 %v3807_v34, %v719_v7  ;;  %v2050_v44 = vpop.f32.mrf.mxu0 }
 0x19e   :  { %v1557_v53 = vmax.f32 %v4252_v50, %v1459_v51  ;;  %v1507_v62 = vmax.f32 %v4254_v24, %v1360_v54  ;;  %v3873_v43 = vadd.f32 %v3807_v34, %v4257_v10  ;;  %v1461_v61 = vmax.f32 %v1215_v56, 0.0  ;;  %v2197_v51 = vpop.f32.mrf.mxu1 }
 0x19f   :  { %v1556_v12 = vmax.f32 %v4256_v1, %v1458_v21  ;;  %1652 = vst [vmem:[%s4021_s3 + $0xf8] sm:$0xff] %v1603_v39  ;;  %v1210_v25 = vadd.f32 %v3807_v34, %v1209_v16  ;;  %v1510_v42 = vmax.f32 %v1314_v37, %v1363_v49  ;;  %v1362_v47 = vmax.f32 %v720_v17, 0.0  ;;  %v729_v39 = vpop.f32.mrf.mxu0  ;;  %v4260_v16 = vld [vmem:[#allocation52_spill] sm:$0xff] }
 0x1a0   :  { %v1606_v48 = vmax.f32 %v1508_v6, %v1557_v53  ;;  %v735_v54 = vadd.f32 %v3807_v34, %v2050_v44  ;;  %v1322_v21 = vmax.f32 %v3858_v29, 0.0  ;;  %v1559_v6 = vmax.f32 %v1412_v27, %v1461_v61  ;;  %v1219_v23 = vpop.f32.mrf.mxu1 }
 0x1a1   :  { %v1605_v38 = vmax.f32 %v1507_v62, %v1556_v12  ;;  %v1460_v32 = vmax.f32 %v1210_v25, 0.0  ;;  %v1225_v26 = vadd.f32 %v3807_v34, %v2197_v51  ;;  %v4259_v37 = vmax.f32 %v4258_v58, 0.0  ;;  %v2053_v22 = vpop.f32.mrf.mxu0 }
 0x1a2   :  { %1655 = vst [vmem:[%s4021_s3 + $0x110] sm:$0xff] %v1606_v48  ;;  %v1365_v53 = vmax.f32 %v735_v54, 0.0  ;;  %v730_v56 = vadd.f32 %v3807_v34, %v729_v39  ;;  %v1220_v7 = vadd.f32 %v3807_v34, %v1219_v23  ;;  %v1420_v40 = vmax.f32 %v3873_v43, 0.0  ;;  %v2200_v1 = vpop.f32.mrf.mxu1  ;;  %v4262_v48 = vld [vmem:[#allocation7_spill] sm:$0xff]  ;;  %v4265_v54 = vld [vmem:[#allocation12_spill] sm:$0xff]  ;;  %v4267_v23 = vld [vmem:[#allocation49_spill] sm:$0xff] }
 0x1a3   :  { %1654 = vst [vmem:[%s4021_s3 + $0x108] sm:$0xff] %v1605_v38  ;;  %v1509_v50 = vmax.f32 %v4259_v37, %v1362_v47  ;;  %v1608_v27 = vmax.f32 %v1510_v42, %v1559_v6  ;;  %v4261_v19 = vmax.f32 %v4260_v16, 0.0  ;;  %v1463_v62 = vmax.f32 %v1225_v26, 0.0  ;;  %v739_v3 = vpop.f32.mrf.mxu0  ;;  %v4263_v38 = vld [vmem:[#allocation56_spill] sm:$0xff] }
 0x1a4   :  { %v1512_v12 = vmax.f32 %v1316_v46, %v1365_v53  ;;  %v1364_v49 = vmax.f32 %v730_v56, 0.0  ;;  %v1462_v17 = vmax.f32 %v1220_v7, 0.0  ;;  %v745_v10 = vadd.f32 %v3807_v34, %v2053_v22  ;;  %v1229_v46 = vpop.f32.mrf.mxu1 }
 0x1a5   :  { %v1558_v24 = vmax.f32 %v4261_v19, %v1460_v32  ;;  %v3904_v61 = vadd.f32 %v3807_v34, %v4262_v48  ;;  %1657 = vst [vmem:[%s4021_s3 + $0x120] sm:$0xff] %v1608_v27  ;;  %v1561_v44 = vmax.f32 %v1414_v31, %v1463_v62  ;;  %v1235_v51 = vadd.f32 %v3807_v34, %v2200_v1  ;;  %v4268_v19 = vld [vmem:[#allocation9_spill] sm:$0xff]  ;;  %v4269_v48 = vld [vmem:[#allocation51_spill] sm:$0xff] }
 0x1a6   :  { %v4264_v42 = vmax.f32 %v4263_v38, 0.0  ;;  %v4266_v6 = vmax.f32 %v4265_v54, 0.0  ;;  %v1367_v26 = vmax.f32 %v745_v10, 0.0  ;;  %v740_v39 = vadd.f32 %v3807_v34, %v739_v3  ;;  %v2203_v53 = vpop.f32.mrf.mxu1 }
 0x1a7   :  { %v1607_v25 = vmax.f32 %v1509_v50, %v1558_v24  ;;  %v3919_v58 = vadd.f32 %v3807_v34, %v4267_v23  ;;  %v1610_v5 = vmax.f32 %v1512_v12, %v1561_v44  ;;  %v1465_v31 = vmax.f32 %v1235_v51, 0.0  ;;  %v2056_v50 = vpop.f32.mrf.mxu0 }
 0x1a8   :  { %v1511_v47 = vmax.f32 %v4264_v42, %v1364_v49  ;;  %v1560_v32 = vmax.f32 %v4266_v6, %v1462_v17  ;;  %v1230_v37 = vadd.f32 %v3807_v34, %v1229_v46  ;;  %v1514_v7 = vmax.f32 %v1318_v15, %v1367_v26  ;;  %v1239_v60 = vpop.f32.mrf.mxu1 }
 0x1a9   :  { %1656 = vst [vmem:[%s4021_s3 + $0x118] sm:$0xff] %v1607_v25  ;;  %v1366_v27 = vmax.f32 %v740_v39, 0.0  ;;  %v755_v16 = vadd.f32 %v3807_v34, %v2056_v50  ;;  %v3930_v24 = vadd.f32 %v3807_v34, %v4268_v19  ;;  %1659 = vst [vmem:[%s4021_s3 + $0x130] sm:$0xff] %v1610_v5  ;;  %v1563_v62 = vmax.f32 %v1416_v35, %v1465_v31  ;;  %v749_v12 = vpop.f32.mrf.mxu0 }
 0x1aa   :  { %v1609_v56 = vmax.f32 %v1511_v47, %v1560_v32  ;;  %v1464_v22 = vmax.f32 %v1230_v37, 0.0  ;;  %v1245_v1 = vadd.f32 %v3807_v34, %v2203_v53  ;;  %v750_v17 = vadd.f32 %v3807_v34, %v749_v12  ;;  %v2206_v3 = vpop.f32.mrf.mxu1 }
 0x1ab   :  { %v1513_v15 = vmax.f32 %v1317_v45, %v1366_v27  ;;  %v1369_v49 = vmax.f32 %v755_v16, 0.0  ;;  %v1240_v10 = vadd.f32 %v3807_v34, %v1239_v60  ;;  %v1020_v14 = vadd.f32 %v3807_v34, %v4269_v48  ;;  %v2059_v51 = vpop.f32.mrf.mxu0 }
 0x1ac   :  { %1658 = vst [vmem:[%s4021_s3 + $0x128] sm:$0xff] %v1609_v56  ;;  %v1612_v35 = vmax.f32 %v1514_v7, %v1563_v62  ;;  %v1562_v25 = vmax.f32 %v1415_v36, %v1464_v22  ;;  %v1467_v44 = vmax.f32 %v1245_v1, 0.0  ;;  %v1368_v11 = vmax.f32 %v750_v17, 0.0  ;;  %v1249_v6 = vpop.f32.mrf.mxu1  ;;  %v4271_v62 = vld [vmem:[#allocation54_spill] sm:$0xff] }
 0x1ad   :  { %v1516_v46 = vmax.f32 %v1320_v2, %v1369_v49  ;;  %v1466_v45 = vmax.f32 %v1240_v10, 0.0  ;;  %v765_v38 = vadd.f32 %v3807_v34, %v2059_v51  ;;  %v1324_v42 = vmax.f32 %v3930_v24, 0.0  ;;  %v759_v54 = vpop.f32.mrf.mxu0 }
 0x1ae   :  { %1661 = vst [vmem:[%s4021_s3 + $0x140] sm:$0xff] %v1612_v35  ;;  %v1611_v47 = vmax.f32 %v1513_v15, %v1562_v25  ;;  %v1565_v41 = vmax.f32 %v1418_v63, %v1467_v44  ;;  %v1255_v36 = vadd.f32 %v3807_v34, %v2206_v3  ;;  %v1515_v20 = vmax.f32 %v1319_v33, %v1368_v11  ;;  %v2209_v31 = vpop.f32.mrf.mxu1 }
 0x1af   :  { %v1564_v2 = vmax.f32 %v1417_v52, %v1466_v45  ;;  %v1371_v32 = vmax.f32 %v765_v38, 0.0  ;;  %v760_v26 = vadd.f32 %v3807_v34, %v759_v54  ;;  %v1422_v39 = vmax.f32 %v1020_v14, 0.0  ;;  %v2062_v5 = vpop.f32.mrf.mxu0  ;;  %v4270_v52 = vld [vmem:[#allocation53_spill] sm:$0xff] }
 0x1b0   :  { %1660 = vst [vmem:[%s4021_s3 + $0x138] sm:$0xff] %v1611_v47  ;;  %v1614_v30 = vmax.f32 %v1516_v46, %v1565_v41  ;;  %v1469_v63 = vmax.f32 %v1255_v36, 0.0  ;;  %v1250_v23 = vadd.f32 %v3807_v34, %v1249_v6  ;;  %v775_v33 = vadd.f32 %v3807_v34, %v2062_v5  ;;  %v1259_v16 = vpop.f32.mrf.mxu1 }
 0x1b1   :  { %v1613_v37 = vmax.f32 %v1515_v20, %v1564_v2  ;;  %v1518_v59 = vmax.f32 %v1322_v21, %v1371_v32  ;;  %v1370_v13 = vmax.f32 %v760_v26, 0.0  ;;  %v540_v50 = vadd.f32 %v3807_v34, %v4270_v52  ;;  %v769_v27 = vpop.f32.mrf.mxu0 }
 0x1b2   :  { %1663 = vst [vmem:[%s4021_s3 + $0x150] sm:$0xff] %v1614_v30  ;;  %v1567_v53 = vmax.f32 %v1420_v40, %v1469_v63  ;;  %v1468_v56 = vmax.f32 %v1250_v23, 0.0  ;;  %v1265_v7 = vadd.f32 %v3807_v34, %v2209_v31  ;;  %v1373_v21 = vmax.f32 %v775_v33, 0.0  ;;  %v2212_v60 = vpop.f32.mrf.mxu1 }
 0x1b3   :  { %1662 = vst [vmem:[%s4021_s3 + $0x148] sm:$0xff] %v1613_v37  ;;  %v1517_v29 = vmax.f32 %v1321_v18, %v1370_v13  ;;  %v770_v19 = vadd.f32 %v3807_v34, %v769_v27  ;;  %v1260_v24 = vadd.f32 %v3807_v34, %v1259_v16  ;;  %v1030_v43 = vadd.f32 %v3807_v34, %v4271_v62  ;;  %v2065_v12 = vpop.f32.mrf.mxu0 }
 0x1b4   :  { %v1616_v40 = vmax.f32 %v1518_v59, %v1567_v53  ;;  %v1566_v22 = vmax.f32 %v1419_v4, %v1468_v56  ;;  %v1471_v1 = vmax.f32 %v1265_v7, 0.0  ;;  %v1520_v15 = vmax.f32 %v1324_v42, %v1373_v21  ;;  %v1269_v28 = vpop.f32.mrf.mxu1 }
 0x1b5   :  { %v1372_v49 = vmax.f32 %v770_v19, 0.0  ;;  %v1470_v17 = vmax.f32 %v1260_v24, 0.0  ;;  %v785_v9 = vadd.f32 %v3807_v34, %v2065_v12  ;;  %v1326_v18 = vmax.f32 %v540_v50, 0.0  ;;  %v779_v35 = vpop.f32.mrf.mxu0 }
 0x1b6   :  { %1665 = vst [vmem:[%s4021_s3 + $0x160] sm:$0xff] %v1616_v40  ;;  %v1615_v10 = vmax.f32 %v1517_v29, %v1566_v22  ;;  %v1569_v48 = vmax.f32 %v1422_v39, %v1471_v1  ;;  %v1275_v14 = vadd.f32 %v3807_v34, %v2212_v60  ;;  %v780_v51 = vadd.f32 %v3807_v34, %v779_v35 }
 0x1b7   :  { %v1519_v4 = vmax.f32 %v1323_v55, %v1372_v49  ;;  %v1568_v25 = vmax.f32 %v1421_v8, %v1470_v17  ;;  %v1375_v44 = vmax.f32 %v785_v9, 0.0  ;;  %v1424_v3 = vmax.f32 %v1030_v43, 0.0 }
 0x1b8   :  { %1664 = vst [vmem:[%s4021_s3 + $0x158] sm:$0xff] %v1615_v10  ;;  %v1618_v46 = vmax.f32 %v1520_v15, %v1569_v48  ;;  %v1473_v11 = vmax.f32 %v1275_v14, 0.0  ;;  %v1270_v45 = vadd.f32 %v3807_v34, %v1269_v28  ;;  %v1325_v38 = vmax.f32 %v3904_v61, 0.0 }
 0x1b9   :  { %v1617_v42 = vmax.f32 %v1519_v4, %v1568_v25  ;;  %v1522_v0 = vmax.f32 %v1326_v18, %v1375_v44  ;;  %v1374_v55 = vmax.f32 %v780_v51, 0.0  ;;  %v1423_v57 = vmax.f32 %v3919_v58, 0.0 }
 0x1ba   :  { %1667 = vst [vmem:[%s4021_s3 + $0x170] sm:$0xff] %v1618_v46  ;;  %v1571_v8 = vmax.f32 %v1424_v3, %v1473_v11  ;;  %v1472_v47 = vmax.f32 %v1270_v45, 0.0 }
 0x1bb   :  { %1666 = vst [vmem:[%s4021_s3 + $0x168] sm:$0xff] %v1617_v42  ;;  %v1521_v41 = vmax.f32 %v1325_v38, %v1374_v55 }
 0x1bc   :  { %v1620_v36 = vmax.f32 %v1522_v0, %v1571_v8  ;;  %v1570_v34 = vmax.f32 %v1423_v57, %v1472_v47 }
 0x1be   :  { %1669 = vst [vmem:[%s4021_s3 + $0x180] sm:$0xff] %v1620_v36  ;;  %v1619_v61 = vmax.f32 %v1521_v41, %v1570_v34 }
 0x1c0   :  { %1668 = vst [vmem:[%s4021_s3 + $0x178] sm:$0xff] %v1619_v61 }

// kernel: net_forward.4
= control target key start
LH: loop header
LB: loop body
LE: loop exit
PB: predicated region body
PF: predicated region fallthrough
CT: control target
= control target key end

     0   :  { %v440_v0 = vmov 0.0   ;;  %s861_s1 = inlined_call_operand.vmem [shape: f32[256,128], index: 1, kind: input, shape index: {}]   ;;  %s862_s0 = inlined_call_operand.vmem [shape: f32[224,256], index: 0, kind: input, shape index: {}]   ;;  %s863_s2 = inlined_call_operand.vmem [shape: f32[1,128], index: 2, kind: input, shape index: {}]   ;;  %s864_s3 = inlined_call_operand.vmem [shape: f32[56,128], index: 3, kind: output, shape index: {}]  }
   0x1   :  { %109 = vmatprep.subr.mxu0 %v440_v0  ;;  %375 = vmatprep.subr.mxu1 %v440_v0  ;;  %v85_v1 = vld [vmem:[%s861_s1 + $0x78] sm:$0xff]  ;;  %v84_v2 = vld [vmem:[%s861_s1 + $0x70] sm:$0xff]  ;;  %v83_v3 = vld [vmem:[%s861_s1 + $0x68] sm:$0xff] }
   0x2   :  { %110 = vmatpush1.msra.mxu0 %v85_v1  ;;  %407 = vmatpush1.msra.mxu1 %v85_v1  ;;  %v82_v4 = vld [vmem:[%s861_s1 + $0x60] sm:$0xff]  ;;  %v81_v5 = vld [vmem:[%s861_s1 + $0x58] sm:$0xff]  ;;  %v80_v6 = vld [vmem:[%s861_s1 + $0x50] sm:$0xff] }
   0x3   :  { %111 = vmatprep.subr.mxu0 %v440_v0  ;;  %376 = vmatprep.subr.mxu1 %v440_v0  ;;  %v79_v7 = vld [vmem:[%s861_s1 + $0x48] sm:$0xff]  ;;  %v78_v8 = vld [vmem:[%s861_s1 + $0x40] sm:$0xff]  ;;  %v77_v9 = vld [vmem:[%s861_s1 + $0x38] sm:$0xff] }
   0x4   :  { %112 = vmatpush1.msra.mxu0 %v84_v2  ;;  %408 = vmatpush1.msra.mxu1 %v84_v2  ;;  %v76_v10 = vld [vmem:[%s861_s1 + $0x30] sm:$0xff]  ;;  %v75_v11 = vld [vmem:[%s861_s1 + $0x28] sm:$0xff]  ;;  %v74_v12 = vld [vmem:[%s861_s1 + $0x20] sm:$0xff] }
   0x5   :  { %113 = vmatprep.subr.mxu0 %v440_v0  ;;  %377 = vmatprep.subr.mxu1 %v440_v0  ;;  %v73_v13 = vld [vmem:[%s861_s1 + $0x18] sm:$0xff]  ;;  %v72_v14 = vld [vmem:[%s861_s1 + $0x10] sm:$0xff]  ;;  %v71_v15 = vld [vmem:[%s861_s1 + $0x8] sm:$0xff] }
   0x6   :  { %114 = vmatpush1.msra.mxu0 %v83_v3  ;;  %409 = vmatpush1.msra.mxu1 %v83_v3  ;;  %v70_v16 = vld [vmem:[%s861_s1] sm:$0xff]  ;;  %v101_v17 = vld [vmem:[%s861_s1 + $0xf8] sm:$0xff]  ;;  %v100_v18 = vld [vmem:[%s861_s1 + $0xf0] sm:$0xff] }
   0x7   :  { %115 = vmatprep.subr.mxu0 %v440_v0  ;;  %378 = vmatprep.subr.mxu1 %v440_v0  ;;  %v99_v19 = vld [vmem:[%s861_s1 + $0xe8] sm:$0xff]  ;;  %v98_v20 = vld [vmem:[%s861_s1 + $0xe0] sm:$0xff]  ;;  %v97_v21 = vld [vmem:[%s861_s1 + $0xd8] sm:$0xff] }
   0x8   :  { %116 = vmatpush1.msra.mxu0 %v82_v4  ;;  %410 = vmatpush1.msra.mxu1 %v82_v4  ;;  %v96_v22 = vld [vmem:[%s861_s1 + $0xd0] sm:$0xff]  ;;  %v95_v23 = vld [vmem:[%s861_s1 + $0xc8] sm:$0xff]  ;;  %v94_v24 = vld [vmem:[%s861_s1 + $0xc0] sm:$0xff] }
   0x9   :  { %117 = vmatprep.subr.mxu0 %v440_v0  ;;  %379 = vmatprep.subr.mxu1 %v440_v0  ;;  %v93_v25 = vld [vmem:[%s861_s1 + $0xb8] sm:$0xff]  ;;  %v92_v26 = vld [vmem:[%s861_s1 + $0xb0] sm:$0xff]  ;;  %v91_v27 = vld [vmem:[%s861_s1 + $0xa8] sm:$0xff] }
   0xa   :  { %118 = vmatpush1.msra.mxu0 %v81_v5  ;;  %411 = vmatpush1.msra.mxu1 %v81_v5  ;;  %v90_v28 = vld [vmem:[%s861_s1 + $0xa0] sm:$0xff]  ;;  %v89_v29 = vld [vmem:[%s861_s1 + $0x98] sm:$0xff]  ;;  %v88_v30 = vld [vmem:[%s861_s1 + $0x90] sm:$0xff] }
   0xb   :  { %119 = vmatprep.subr.mxu0 %v440_v0  ;;  %380 = vmatprep.subr.mxu1 %v440_v0  ;;  %v87_v31 = vld [vmem:[%s861_s1 + $0x88] sm:$0xff]  ;;  %v86_v32 = vld [vmem:[%s861_s1 + $0x80] sm:$0xff]  ;;  %v17_v37 = vld [vmem:[%s862_s0 + $0x18] sm:$0xff] }
   0xc   :  { %120 = vmatpush1.msra.mxu0 %v80_v6  ;;  %412 = vmatpush1.msra.mxu1 %v80_v6  ;;  %v15_v33 = vld [vmem:[%s862_s0 + $0x8] sm:$0xff]  ;;  %v14_v35 = vld [vmem:[%s862_s0] sm:$0xff]  ;;  %v45_v38 = vld [vmem:[%s862_s0 + $0xf8] sm:$0xff] }
   0xd   :  { %121 = vmatprep.subr.mxu0 %v440_v0  ;;  %381 = vmatprep.subr.mxu1 %v440_v0  ;;  %v43_v34 = vld [vmem:[%s862_s0 + $0xe8] sm:$0xff]  ;;  %v42_v36 = vld [vmem:[%s862_s0 + $0xe0] sm:$0xff]  ;;  %v16_v39 = vld [vmem:[%s862_s0 + $0x10] sm:$0xff] }
   0xe   :  { %122 = vmatpush1.msra.mxu0 %v79_v7  ;;  %413 = vmatpush1.msra.mxu1 %v79_v7  ;;  %v44_v40 = vld [vmem:[%s862_s0 + $0xf0] sm:$0xff]  ;;  %v19_v41 = vld [vmem:[%s862_s0 + $0x28] sm:$0xff]  ;;  %v18_v43 = vld [vmem:[%s862_s0 + $0x20] sm:$0xff] }
   0xf   :  { %123 = vmatprep.subr.mxu0 %v440_v0  ;;  %382 = vmatprep.subr.mxu1 %v440_v0  ;;  %v47_v42 = vld [vmem:[%s862_s0 + $0x108] sm:$0xff]  ;;  %v46_v44 = vld [vmem:[%s862_s0 + $0x100] sm:$0xff]  ;;  %v21_v45 = vld [vmem:[%s862_s0 + $0x38] sm:$0xff] }
  0x10   :  { %124 = vmatpush1.msra.mxu0 %v78_v8  ;;  %414 = vmatpush1.msra.mxu1 %v78_v8  ;;  %v49_v46 = vld [vmem:[%s862_s0 + $0x118] sm:$0xff]  ;;  %v20_v47 = vld [vmem:[%s862_s0 + $0x30] sm:$0xff]  ;;  %v23_v49 = vld [vmem:[%s862_s0 + $0x48] sm:$0xff] }
  0x11   :  { %125 = vmatprep.subr.mxu0 %v440_v0  ;;  %383 = vmatprep.subr.mxu1 %v440_v0  ;;  %v48_v48 = vld [vmem:[%s862_s0 + $0x110] sm:$0xff]  ;;  %v51_v50 = vld [vmem:[%s862_s0 + $0x128] sm:$0xff]  ;;  %v22_v51 = vld [vmem:[%s862_s0 + $0x40] sm:$0xff] }
  0x12   :  { %126 = vmatpush1.msra.mxu0 %v77_v9  ;;  %415 = vmatpush1.msra.mxu1 %v77_v9  ;;  %v50_v52 = vld [vmem:[%s862_s0 + $0x120] sm:$0xff]  ;;  %v25_v53 = vld [vmem:[%s862_s0 + $0x58] sm:$0xff]  ;;  %v24_v55 = vld [vmem:[%s862_s0 + $0x50] sm:$0xff] }
  0x13   :  { %127 = vmatprep.subr.mxu0 %v440_v0  ;;  %384 = vmatprep.subr.mxu1 %v440_v0  ;;  %v53_v54 = vld [vmem:[%s862_s0 + $0x138] sm:$0xff]  ;;  %v52_v56 = vld [vmem:[%s862_s0 + $0x130] sm:$0xff]  ;;  %v27_v57 = vld [vmem:[%s862_s0 + $0x68] sm:$0xff] }
  0x14   :  { %128 = vmatpush1.msra.mxu0 %v76_v10  ;;  %416 = vmatpush1.msra.mxu1 %v76_v10  ;;  %v55_v58 = vld [vmem:[%s862_s0 + $0x148] sm:$0xff]  ;;  %v26_v59 = vld [vmem:[%s862_s0 + $0x60] sm:$0xff]  ;;  %v29_v61 = vld [vmem:[%s862_s0 + $0x78] sm:$0xff] }
  0x15   :  { %129 = vmatprep.subr.mxu0 %v440_v0  ;;  %385 = vmatprep.subr.mxu1 %v440_v0  ;;  %v54_v60 = vld [vmem:[%s862_s0 + $0x140] sm:$0xff]  ;;  %v57_v62 = vld [vmem:[%s862_s0 + $0x158] sm:$0xff]  ;;  %v28_v63 = vld [vmem:[%s862_s0 + $0x70] sm:$0xff] }
  0x16   :  { %130 = vmatpush1.msra.mxu0 %v75_v11  ;;  %417 = vmatpush1.msra.mxu1 %v75_v11  ;;  %v31_v1 = vld [vmem:[%s862_s0 + $0x88] sm:$0xff]  ;;  %v30_v3 = vld [vmem:[%s862_s0 + $0x80] sm:$0xff]  ;;  %v33_v5 = vld [vmem:[%s862_s0 + $0x98] sm:$0xff] }
  0x17   :  { %131 = vmatprep.subr.mxu0 %v440_v0  ;;  %386 = vmatprep.subr.mxu1 %v440_v0  ;;  %v59_v2 = vld [vmem:[%s862_s0 + $0x168] sm:$0xff]  ;;  %v58_v4 = vld [vmem:[%s862_s0 + $0x160] sm:$0xff]  ;;  %v61_v6 = vld [vmem:[%s862_s0 + $0x178] sm:$0xff] }
  0x18   :  { %132 = vmatpush1.msra.mxu0 %v74_v12  ;;  %418 = vmatpush1.msra.mxu1 %v74_v12  ;;  %v32_v7 = vld [vmem:[%s862_s0 + $0x90] sm:$0xff]  ;;  %v35_v9 = vld [vmem:[%s862_s0 + $0xa8] sm:$0xff]  ;;  %v34_v11 = vld [vmem:[%s862_s0 + $0xa0] sm:$0xff] }
  0x19   :  { %133 = vmatprep.subr.mxu0 %v440_v0  ;;  %387 = vmatprep.subr.mxu1 %v440_v0  ;;  %v60_v8 = vld [vmem:[%s862_s0 + $0x170] sm:$0xff]  ;;  %v63_v10 = vld [vmem:[%s862_s0 + $0x188] sm:$0xff]  ;;  %v62_v12 = vld [vmem:[%s862_s0 + $0x180] sm:$0xff] }
  0x1a   :  { %134 = vmatpush1.msra.mxu0 %v73_v13  ;;  %419 = vmatpush1.msra.mxu1 %v73_v13  ;;  %v37_v13 = vld [vmem:[%s862_s0 + $0xb8] sm:$0xff] }
  0x1b   :  { %135 = vmatprep.subr.mxu0 %v440_v0  ;;  %388 = vmatprep.subr.mxu1 %v440_v0 }
  0x1c   :  { %136 = vmatpush1.msra.mxu0 %v72_v14  ;;  %420 = vmatpush1.msra.mxu1 %v72_v14  ;;  %v65_v14 = vld [vmem:[%s862_s0 + $0x198] sm:$0xff] }
  0x1d   :  { %137 = vmatprep.subr.mxu0 %v440_v0  ;;  %389 = vmatprep.subr.mxu1 %v440_v0 }
  0x1e   :  { %138 = vmatpush1.msra.mxu0 %v71_v15  ;;  %421 = vmatpush1.msra.mxu1 %v71_v15  ;;  %v36_v15 = vld [vmem:[%s862_s0 + $0xb0] sm:$0xff] }
  0x1f   :  { %139 = vmatprep.subr.mxu0 %v440_v0  ;;  %390 = vmatprep.subr.mxu1 %v440_v0 }
  0x20   :  { %140 = vmatpush1.msra.mxu0 %v70_v16  ;;  %422 = vmatpush1.msra.mxu1 %v70_v16  ;;  %v64_v16 = vld [vmem:[%s862_s0 + $0x190] sm:$0xff] }
  0x21   :  { %141 = vmatprep.subr.mxu0 %v440_v0  ;;  %391 = vmatprep.subr.mxu1 %v440_v0 }
  0x22   :  { %142 = vmatpush2.msra.mxu0 %v101_v17  ;;  %423 = vmatpush2.msra.mxu1 %v101_v17  ;;  %v39_v17 = vld [vmem:[%s862_s0 + $0xc8] sm:$0xff] }
  0x23   :  { %143 = vmatprep.subr.mxu0 %v440_v0  ;;  %392 = vmatprep.subr.mxu1 %v440_v0 }
  0x24   :  { %144 = vmatpush2.msra.mxu0 %v100_v18  ;;  %424 = vmatpush2.msra.mxu1 %v100_v18  ;;  %v67_v18 = vld [vmem:[%s862_s0 + $0x1a8] sm:$0xff] }
  0x25   :  { %145 = vmatprep.subr.mxu0 %v440_v0  ;;  %393 = vmatprep.subr.mxu1 %v440_v0 }
  0x26   :  { %146 = vmatpush2.msra.mxu0 %v99_v19  ;;  %425 = vmatpush2.msra.mxu1 %v99_v19  ;;  %v38_v19 = vld [vmem:[%s862_s0 + $0xc0] sm:$0xff] }
  0x27   :  { %147 = vmatprep.subr.mxu0 %v440_v0  ;;  %394 = vmatprep.subr.mxu1 %v440_v0 }
  0x28   :  { %148 = vmatpush2.msra.mxu0 %v98_v20  ;;  %426 = vmatpush2.msra.mxu1 %v98_v20  ;;  %v66_v20 = vld [vmem:[%s862_s0 + $0x1a0] sm:$0xff] }
  0x29   :  { %149 = vmatprep.subr.mxu0 %v440_v0  ;;  %395 = vmatprep.subr.mxu1 %v440_v0 }
  0x2a   :  { %150 = vmatpush2.msra.mxu0 %v97_v21  ;;  %427 = vmatpush2.msra.mxu1 %v97_v21  ;;  %v41_v21 = vld [vmem:[%s862_s0 + $0xd8] sm:$0xff] }
  0x2b   :  { %151 = vmatprep.subr.mxu0 %v440_v0  ;;  %396 = vmatprep.subr.mxu1 %v440_v0 }
  0x2c   :  { %152 = vmatpush2.msra.mxu0 %v96_v22  ;;  %428 = vmatpush2.msra.mxu1 %v96_v22  ;;  %v69_v22 = vld [vmem:[%s862_s0 + $0x1b8] sm:$0xff] }
  0x2d   :  { %153 = vmatprep.subr.mxu0 %v440_v0  ;;  %397 = vmatprep.subr.mxu1 %v440_v0 }
  0x2e   :  { %154 = vmatpush2.msra.mxu0 %v95_v23  ;;  %429 = vmatpush2.msra.mxu1 %v95_v23  ;;  %v40_v23 = vld [vmem:[%s862_s0 + $0xd0] sm:$0xff] }
  0x2f   :  { %155 = vmatprep.subr.mxu0 %v440_v0  ;;  %398 = vmatprep.subr.mxu1 %v440_v0 }
  0x30   :  { %156 = vmatpush2.msra.mxu0 %v94_v24  ;;  %430 = vmatpush2.msra.mxu1 %v94_v24  ;;  %v68_v24 = vld [vmem:[%s862_s0 + $0x1b0] sm:$0xff] }
  0x31   :  { %157 = vmatprep.subr.mxu0 %v440_v0  ;;  %399 = vmatprep.subr.mxu1 %v440_v0 }
  0x32   :  { %158 = vmatpush2.msra.mxu0 %v93_v25  ;;  %431 = vmatpush2.msra.mxu1 %v93_v25 }
  0x33   :  { %159 = vmatprep.subr.mxu0 %v440_v0  ;;  %400 = vmatprep.subr.mxu1 %v440_v0 }
  0x34   :  { %160 = vmatpush2.msra.mxu0 %v92_v26  ;;  %432 = vmatpush2.msra.mxu1 %v92_v26 }
  0x35   :  { %161 = vmatprep.subr.mxu0 %v440_v0  ;;  %401 = vmatprep.subr.mxu1 %v440_v0 }
  0x36   :  { %162 = vmatpush2.msra.mxu0 %v91_v27  ;;  %433 = vmatpush2.msra.mxu1 %v91_v27 }
  0x37   :  { %163 = vmatprep.subr.mxu0 %v440_v0  ;;  %402 = vmatprep.subr.mxu1 %v440_v0 }
  0x38   :  { %164 = vmatpush2.msra.mxu0 %v90_v28  ;;  %434 = vmatpush2.msra.mxu1 %v90_v28 }
  0x39   :  { %165 = vmatprep.subr.mxu0 %v440_v0  ;;  %403 = vmatprep.subr.mxu1 %v440_v0 }
  0x3a   :  { %166 = vmatpush2.msra.mxu0 %v89_v29  ;;  %435 = vmatpush2.msra.mxu1 %v89_v29 }
  0x3b   :  { %167 = vmatprep.subr.mxu0 %v440_v0  ;;  %404 = vmatprep.subr.mxu1 %v440_v0 }
  0x3c   :  { %168 = vmatpush2.msra.mxu0 %v88_v30  ;;  %436 = vmatpush2.msra.mxu1 %v88_v30 }
  0x3d   :  { %169 = vmatprep.subr.mxu0 %v440_v0  ;;  %405 = vmatprep.subr.mxu1 %v440_v0 }
  0x3e   :  { %170 = vmatpush2.msra.mxu0 %v87_v31  ;;  %437 = vmatpush2.msra.mxu1 %v87_v31 }
  0x3f   :  { %171 = vmatprep.subr.mxu0 %v440_v0  ;;  %406 = vmatprep.subr.mxu1 %v440_v0  ;;  %v56_v0 = vld [vmem:[%s862_s0 + $0x150] sm:$0xff] }
  0x40   :  { %172 = vmatpush2.msra.mxu0 %v86_v32  ;;  %438 = vmatpush2.msra.mxu1 %v86_v32 }
  0x41   :  { %173 = vmatprep.mubr.f32.mxu0 %v15_v33  ;;  %243 = vmatprep.mubr.f32.mxu1 %v43_v34 }
  0x42   :  { %174 = vmatmul.mubr.f32.vlgmr.msra.gmra.mxu0 %v14_v35  ;;  %244 = vmatmul.mubr.f32.vlgmr.msra.gmra.mxu1 %v42_v36 }
  0x43   :  { %178 = vmatprep.mubr.f32.mxu0 %v17_v37  ;;  %248 = vmatprep.mubr.f32.mxu1 %v45_v38 }
  0x46   :  { %179 = vmatmul.mubr.f32.gmra.mxu0 %v16_v39  ;;  %249 = vmatmul.mubr.f32.gmra.mxu1 %v44_v40 }
  0x47   :  { %183 = vmatprep.mubr.f32.mxu0 %v19_v41  ;;  %253 = vmatprep.mubr.f32.mxu1 %v47_v42 }
  0x4a   :  { %184 = vmatmul.mubr.f32.gmra.mxu0 %v18_v43  ;;  %254 = vmatmul.mubr.f32.gmra.mxu1 %v46_v44 }
  0x4b   :  { %188 = vmatprep.mubr.f32.mxu0 %v21_v45  ;;  %258 = vmatprep.mubr.f32.mxu1 %v49_v46 }
  0x4e   :  { %189 = vmatmul.mubr.f32.gmra.mxu0 %v20_v47  ;;  %259 = vmatmul.mubr.f32.gmra.mxu1 %v48_v48 }
  0x4f   :  { %193 = vmatprep.mubr.f32.mxu0 %v23_v49  ;;  %263 = vmatprep.mubr.f32.mxu1 %v51_v50  ;;  %v800_v49 = vld [vmem:[%s863_s2] ss:$0 sm:$0xff] }
  0x52   :  { %194 = vmatmul.mubr.f32.gmra.mxu0 %v22_v51  ;;  %264 = vmatmul.mubr.f32.gmra.mxu1 %v50_v52 }
  0x53   :  { %198 = vmatprep.mubr.f32.mxu0 %v25_v53  ;;  %268 = vmatprep.mubr.f32.mxu1 %v53_v54 }
  0x56   :  { %199 = vmatmul.mubr.f32.gmra.mxu0 %v24_v55  ;;  %269 = vmatmul.mubr.f32.gmra.mxu1 %v52_v56 }
  0x57   :  { %203 = vmatprep.mubr.f32.mxu0 %v27_v57  ;;  %273 = vmatprep.mubr.f32.mxu1 %v55_v58 }
  0x5a   :  { %204 = vmatmul.mubr.f32.gmra.mxu0 %v26_v59  ;;  %274 = vmatmul.mubr.f32.gmra.mxu1 %v54_v60 }
  0x5b   :  { %208 = vmatprep.mubr.f32.mxu0 %v29_v61  ;;  %278 = vmatprep.mubr.f32.mxu1 %v57_v62 }
  0x5e   :  { %209 = vmatmul.mubr.f32.gmra.mxu0 %v28_v63  ;;  %279 = vmatmul.mubr.f32.gmra.mxu1 %v56_v0 }
  0x5f   :  { %213 = vmatprep.mubr.f32.mxu0 %v31_v1  ;;  %283 = vmatprep.mubr.f32.mxu1 %v59_v2 }
  0x62   :  { %214 = vmatmul.mubr.f32.gmra.mxu0 %v30_v3  ;;  %284 = vmatmul.mubr.f32.gmra.mxu1 %v58_v4 }
  0x63   :  { %218 = vmatprep.mubr.f32.mxu0 %v33_v5  ;;  %288 = vmatprep.mubr.f32.mxu1 %v61_v6 }
  0x66   :  { %219 = vmatmul.mubr.f32.gmra.mxu0 %v32_v7  ;;  %289 = vmatmul.mubr.f32.gmra.mxu1 %v60_v8 }
  0x67   :  { %223 = vmatprep.mubr.f32.mxu0 %v35_v9  ;;  %293 = vmatprep.mubr.f32.mxu1 %v63_v10 }
  0x6a   :  { %224 = vmatmul.mubr.f32.gmra.mxu0 %v34_v11  ;;  %294 = vmatmul.mubr.f32.gmra.mxu1 %v62_v12 }
  0x6b   :  { %228 = vmatprep.mubr.f32.mxu0 %v37_v13  ;;  %298 = vmatprep.mubr.f32.mxu1 %v65_v14 }
  0x6e   :  { %229 = vmatmul.mubr.f32.gmra.mxu0 %v36_v15  ;;  %299 = vmatmul.mubr.f32.gmra.mxu1 %v64_v16 }
  0x6f   :  { %233 = vmatprep.mubr.f32.mxu0 %v39_v17  ;;  %303 = vmatprep.mubr.f32.mxu1 %v67_v18 }
  0x72   :  { %234 = vmatmul.mubr.f32.gmra.mxu0 %v38_v19  ;;  %304 = vmatmul.mubr.f32.gmra.mxu1 %v66_v20 }
  0x73   :  { %238 = vmatprep.mubr.f32.mxu0 %v41_v21  ;;  %308 = vmatprep.mubr.f32.mxu1 %v69_v22 }
  0x76   :  { %239 = vmatmul.mubr.f32.gmra.mxu0 %v40_v23  ;;  %309 = vmatmul.mubr.f32.gmra.mxu1 %v68_v24 }
 0x102   :  { %v175_v25 = vpop.f32.mrf.mxu0  ;;  %v245_v26 = vpop.f32.mrf.mxu1 }
 0x103   :  { %v176_v54 = vadd.f32 %v800_v49, %v175_v25  ;;  %v246_v55 = vadd.f32 %v800_v49, %v245_v26 }
 0x104   :  { %v177_v27 = vpop.f32.mrf.mxu0  ;;  %v247_v28 = vpop.f32.mrf.mxu1 }
 0x105   :  { %v314_v0 = vmax.f32 %v176_v54, 0.0  ;;  %v328_v1 = vmax.f32 %v246_v55, 0.0 }
 0x106   :  { %v180_v29 = vpop.f32.mrf.mxu0  ;;  %v250_v30 = vpop.f32.mrf.mxu1 }
 0x107   :  { %v181_v60 = vadd.f32 %v800_v49, %v180_v29  ;;  %v251_v61 = vadd.f32 %v800_v49, %v250_v30 }
 0x108   :  { %v182_v31 = vpop.f32.mrf.mxu0  ;;  %v252_v32 = vpop.f32.mrf.mxu1 }
 0x109   :  { %v315_v10 = vmax.f32 %v181_v60, 0.0  ;;  %v329_v11 = vmax.f32 %v251_v61, 0.0 }
 0x10a   :  { %v185_v33 = vpop.f32.mrf.mxu0  ;;  %v255_v34 = vpop.f32.mrf.mxu1 }
 0x10b   :  { %v186_v12 = vadd.f32 %v800_v49, %v185_v33  ;;  %v256_v15 = vadd.f32 %v800_v49, %v255_v34 }
 0x10c   :  { %v187_v35 = vpop.f32.mrf.mxu0  ;;  %v257_v36 = vpop.f32.mrf.mxu1 }
 0x10d   :  { %v316_v25 = vmax.f32 %v186_v12, 0.0  ;;  %v330_v30 = vmax.f32 %v256_v15, 0.0 }
 0x10e   :  { %v190_v37 = vpop.f32.mrf.mxu0  ;;  %v260_v38 = vpop.f32.mrf.mxu1 }
 0x10f   :  { %v191_v26 = vadd.f32 %v800_v49, %v190_v37  ;;  %v261_v27 = vadd.f32 %v800_v49, %v260_v38 }
 0x110   :  { %v192_v39 = vpop.f32.mrf.mxu0  ;;  %v262_v40 = vpop.f32.mrf.mxu1 }
 0x111   :  { %v331_v38 = vmax.f32 %v261_v27, 0.0 }
 0x112   :  { %v789_v41 = vpop.f32.mrf.mxu0  ;;  %v791_v42 = vpop.f32.mrf.mxu1 }
 0x114   :  { %v197_v43 = vpop.f32.mrf.mxu0  ;;  %v267_v44 = vpop.f32.mrf.mxu1 }
 0x115   :  { %v317_v43 = vmax.f32 %v191_v26, 0.0  ;;  %v196_v44 = vadd.f32 %v800_v49, %v789_v41 }
 0x116   :  { %v793_v45 = vpop.f32.mrf.mxu0  ;;  %v795_v46 = vpop.f32.mrf.mxu1 }
 0x117   :  { %v318_v61 = vmax.f32 %v196_v44, 0.0 }
 0x118   :  { %v202_v47 = vpop.f32.mrf.mxu0  ;;  %v272_v48 = vpop.f32.mrf.mxu1 }
 0x11a   :  { %v802_v50 = vpop.f32.mrf.mxu0  ;;  %v804_v51 = vpop.f32.mrf.mxu1 }
 0x11c   :  { %v207_v52 = vpop.f32.mrf.mxu0  ;;  %v277_v53 = vpop.f32.mrf.mxu1 }
 0x11d   :  { %v266_v52 = vadd.f32 %v800_v49, %v791_v42  ;;  %v271_v42 = vadd.f32 %v800_v49, %v795_v46 }
 0x11e   :  { %v210_v56 = vpop.f32.mrf.mxu0  ;;  %v280_v57 = vpop.f32.mrf.mxu1 }
 0x11f   :  { %v211_v58 = vadd.f32 %v800_v49, %v210_v56  ;;  %v281_v59 = vadd.f32 %v800_v49, %v280_v57  ;;  %v333_v46 = vmax.f32 %v271_v42, 0.0 }
 0x120   :  { %v212_v62 = vpop.f32.mrf.mxu0  ;;  %v282_v63 = vpop.f32.mrf.mxu1 }
 0x121   :  { %v321_v2 = vmax.f32 %v211_v58, 0.0  ;;  %v335_v3 = vmax.f32 %v281_v59, 0.0  ;;  %v201_v62 = vadd.f32 %v800_v49, %v793_v45 }
 0x122   :  { %v215_v4 = vpop.f32.mrf.mxu0  ;;  %v285_v5 = vpop.f32.mrf.mxu1 }
 0x123   :  { %v342_v6 = vmax.f32 %v314_v0, %v321_v2  ;;  %v349_v7 = vmax.f32 %v328_v1, %v335_v3  ;;  %v216_v8 = vadd.f32 %v800_v49, %v215_v4  ;;  %v286_v9 = vadd.f32 %v800_v49, %v285_v5 }
 0x124   :  { %v217_v13 = vpop.f32.mrf.mxu0  ;;  %v287_v14 = vpop.f32.mrf.mxu1  ;;  %v332_v1 = vmax.f32 %v266_v52, 0.0 }
 0x125   :  { %v356_v16 = vmax.f32 %v342_v6, %v349_v7  ;;  %v322_v17 = vmax.f32 %v216_v8, 0.0  ;;  %v336_v18 = vmax.f32 %v286_v9, 0.0  ;;  %v276_v14 = vadd.f32 %v800_v49, %v804_v51 }
 0x126   :  { %v220_v19 = vpop.f32.mrf.mxu0  ;;  %v290_v20 = vpop.f32.mrf.mxu1 }
 0x127   :  { %363 = vst [vmem:[%s864_s3] sm:$0xff] %v356_v16  ;;  %v343_v21 = vmax.f32 %v315_v10, %v322_v17  ;;  %v350_v22 = vmax.f32 %v329_v11, %v336_v18  ;;  %v221_v23 = vadd.f32 %v800_v49, %v220_v19  ;;  %v291_v24 = vadd.f32 %v800_v49, %v290_v20 }
 0x128   :  { %v222_v28 = vpop.f32.mrf.mxu0  ;;  %v292_v29 = vpop.f32.mrf.mxu1  ;;  %v319_v10 = vmax.f32 %v201_v62, 0.0  ;;  %v206_v11 = vadd.f32 %v800_v49, %v802_v50  ;;  %v334_v26 = vmax.f32 %v276_v14, 0.0 }
 0x129   :  { %v357_v31 = vmax.f32 %v343_v21, %v350_v22  ;;  %v323_v32 = vmax.f32 %v221_v23, 0.0  ;;  %v337_v33 = vmax.f32 %v291_v24, 0.0 }
 0x12a   :  { %v225_v34 = vpop.f32.mrf.mxu0  ;;  %v295_v35 = vpop.f32.mrf.mxu1  ;;  %v320_v23 = vmax.f32 %v206_v11, 0.0 }
 0x12b   :  { %364 = vst [vmem:[%s864_s3 + $0x8] sm:$0xff] %v357_v31  ;;  %v344_v36 = vmax.f32 %v316_v25, %v323_v32  ;;  %v351_v39 = vmax.f32 %v330_v30, %v337_v33  ;;  %v226_v40 = vadd.f32 %v800_v49, %v225_v34  ;;  %v296_v37 = vadd.f32 %v800_v49, %v295_v35 }
 0x12c   :  { %v227_v47 = vpop.f32.mrf.mxu0  ;;  %v297_v48 = vpop.f32.mrf.mxu1 }
 0x12d   :  { %v358_v53 = vmax.f32 %v344_v36, %v351_v39  ;;  %v324_v54 = vmax.f32 %v226_v40, 0.0  ;;  %v338_v55 = vmax.f32 %v296_v37, 0.0 }
 0x12e   :  { %v230_v56 = vpop.f32.mrf.mxu0  ;;  %v300_v57 = vpop.f32.mrf.mxu1 }
 0x12f   :  { %365 = vst [vmem:[%s864_s3 + $0x10] sm:$0xff] %v358_v53  ;;  %v345_v58 = vmax.f32 %v317_v43, %v324_v54  ;;  %v352_v59 = vmax.f32 %v331_v38, %v338_v55  ;;  %v231_v60 = vadd.f32 %v800_v49, %v230_v56  ;;  %v301_v41 = vadd.f32 %v800_v49, %v300_v57 }
 0x130   :  { %v232_v63 = vpop.f32.mrf.mxu0  ;;  %v302_v0 = vpop.f32.mrf.mxu1 }
 0x131   :  { %v359_v2 = vmax.f32 %v345_v58, %v352_v59  ;;  %v325_v3 = vmax.f32 %v231_v60, 0.0  ;;  %v339_v4 = vmax.f32 %v301_v41, 0.0 }
 0x132   :  { %v235_v5 = vpop.f32.mrf.mxu0  ;;  %v305_v6 = vpop.f32.mrf.mxu1 }
 0x133   :  { %366 = vst [vmem:[%s864_s3 + $0x18] sm:$0xff] %v359_v2  ;;  %v346_v7 = vmax.f32 %v318_v61, %v325_v3  ;;  %v353_v8 = vmax.f32 %v332_v1, %v339_v4  ;;  %v236_v9 = vadd.f32 %v800_v49, %v235_v5  ;;  %v306_v45 = vadd.f32 %v800_v49, %v305_v6 }
 0x134   :  { %v237_v12 = vpop.f32.mrf.mxu0  ;;  %v307_v13 = vpop.f32.mrf.mxu1 }
 0x135   :  { %v360_v15 = vmax.f32 %v346_v7, %v353_v8  ;;  %v326_v16 = vmax.f32 %v236_v9, 0.0  ;;  %v340_v17 = vmax.f32 %v306_v45, 0.0 }
 0x136   :  { %v240_v18 = vpop.f32.mrf.mxu0  ;;  %v310_v19 = vpop.f32.mrf.mxu1 }
 0x137   :  { %367 = vst [vmem:[%s864_s3 + $0x20] sm:$0xff] %v360_v15  ;;  %v347_v20 = vmax.f32 %v319_v10, %v326_v16  ;;  %v354_v21 = vmax.f32 %v333_v46, %v340_v17  ;;  %v241_v22 = vadd.f32 %v800_v49, %v240_v18  ;;  %v311_v50 = vadd.f32 %v800_v49, %v310_v19 }
 0x138   :  { %v242_v24 = vpop.f32.mrf.mxu0  ;;  %v312_v25 = vpop.f32.mrf.mxu1 }
 0x139   :  { %v361_v51 = vmax.f32 %v347_v20, %v354_v21  ;;  %v327_v27 = vmax.f32 %v241_v22, 0.0  ;;  %v341_v28 = vmax.f32 %v311_v50, 0.0 }
 0x13b   :  { %368 = vst [vmem:[%s864_s3 + $0x28] sm:$0xff] %v361_v51  ;;  %v348_v29 = vmax.f32 %v320_v23, %v327_v27  ;;  %v355_v30 = vmax.f32 %v334_v26, %v341_v28 }
 0x13d   :  { %v362_v31 = vmax.f32 %v348_v29, %v355_v30 }
 0x13f   :  { %369 = vst [vmem:[%s864_s3 + $0x30] sm:$0xff] %v362_v31 }

// kernel: net_forward.5
= control target key start
LH: loop header
LB: loop body
LE: loop exit
PB: predicated region body
PF: predicated region fallthrough
CT: control target
= control target key end

     0   :  { %vm614_vm0 = vmmov 0   ;;  %s1001_s1 = inlined_call_operand.vmem [shape: f32[512,128], index: 1, kind: input, shape index: {}]   ;;  %s1002_s0 = inlined_call_operand.vmem [shape: f32[8,512], index: 0, kind: input, shape index: {}]   ;;  %s1003_s3 = inlined_call_operand.vmem [shape: f32[128,128], index: 3, kind: input, shape index: {}]   ;;  %s1004_s5 = inlined_call_operand.vmem [shape: f32[128,128], index: 5, kind: input, shape index: {}]   ;;  %s1005_s2 = inlined_call_operand.vmem [shape: f32[1,128], index: 2, kind: input, shape index: {}]   ;;  %s1006_s4 = inlined_call_operand.vmem [shape: f32[1,128], index: 4, kind: input, shape index: {}]   ;;  %s1007_s6 = inlined_call_operand.vmem [shape: f32[1,128], index: 6, kind: input, shape index: {}]   ;;  %s1008_s7 = inlined_call_operand.vmem [shape: f32[8,128], index: 7, kind: output, shape index: {}]  }
   0x1   :  { %v61_v0 = vld [vmem:[%s1001_s1 + $0xf8] sm:$0xff]  ;;  %v60_v4 = vld [vmem:[%s1001_s1 + $0xf0] sm:$0xff]  ;;  %v59_v8 = vld [vmem:[%s1001_s1 + $0xe8] sm:$0xff] }
   0x2   :  { %v93_v1 = vld [vmem:[%s1001_s1 + $0x1f8] sm:$0xff]  ;;  %437 = vmatprep.subr.mxu0 %v61_v0  ;;  %v92_v5 = vld [vmem:[%s1001_s1 + $0x1f0] sm:$0xff]  ;;  %v91_v9 = vld [vmem:[%s1001_s1 + $0x1e8] sm:$0xff] }
   0x3   :  { %v45_v2 = vld [vmem:[%s1001_s1 + $0x78] sm:$0xff]  ;;  %472 = vmatprep.subr.mxu1 %v93_v1  ;;  %v44_v6 = vld [vmem:[%s1001_s1 + $0x70] sm:$0xff]  ;;  %v43_v10 = vld [vmem:[%s1001_s1 + $0x68] sm:$0xff] }
   0x4   :  { %v77_v3 = vld [vmem:[%s1001_s1 + $0x178] sm:$0xff]  ;;  %438 = vmatpush3.msra.mxu0 %v45_v2  ;;  %v76_v7 = vld [vmem:[%s1001_s1 + $0x170] sm:$0xff]  ;;  %v75_v11 = vld [vmem:[%s1001_s1 + $0x168] sm:$0xff] }
   0x5   :  { %473 = vmatpush3.msra.mxu1 %v77_v3  ;;  %439 = vmatprep.subr.mxu0 %v60_v4  ;;  %v58_v12 = vld [vmem:[%s1001_s1 + $0xe0] sm:$0xff]  ;;  %v57_v16 = vld [vmem:[%s1001_s1 + $0xd8] sm:$0xff]  ;;  %v56_v20 = vld [vmem:[%s1001_s1 + $0xd0] sm:$0xff] }
   0x6   :  { %474 = vmatprep.subr.mxu1 %v92_v5  ;;  %440 = vmatpush3.msra.mxu0 %v44_v6  ;;  %v90_v13 = vld [vmem:[%s1001_s1 + $0x1e0] sm:$0xff]  ;;  %v89_v17 = vld [vmem:[%s1001_s1 + $0x1d8] sm:$0xff]  ;;  %v88_v21 = vld [vmem:[%s1001_s1 + $0x1d0] sm:$0xff]  ;;  %v613_v5 = vmov 0.0  }
   0x7   :  { %475 = vmatpush3.msra.mxu1 %v76_v7  ;;  %441 = vmatprep.subr.mxu0 %v59_v8  ;;  %v42_v14 = vld [vmem:[%s1001_s1 + $0x60] sm:$0xff]  ;;  %v41_v18 = vld [vmem:[%s1001_s1 + $0x58] sm:$0xff]  ;;  %v40_v22 = vld [vmem:[%s1001_s1 + $0x50] sm:$0xff] }
   0x8   :  { %476 = vmatprep.subr.mxu1 %v91_v9  ;;  %v74_v15 = vld [vmem:[%s1001_s1 + $0x160] sm:$0xff]  ;;  %442 = vmatpush3.msra.mxu0 %v43_v10  ;;  %v73_v19 = vld [vmem:[%s1001_s1 + $0x158] sm:$0xff]  ;;  %v72_v23 = vld [vmem:[%s1001_s1 + $0x150] sm:$0xff] }
   0x9   :  { %477 = vmatpush3.msra.mxu1 %v75_v11  ;;  %443 = vmatprep.subr.mxu0 %v58_v12  ;;  %v55_v24 = vld [vmem:[%s1001_s1 + $0xc8] sm:$0xff]  ;;  %v54_v28 = vld [vmem:[%s1001_s1 + $0xc0] sm:$0xff]  ;;  %v53_v32 = vld [vmem:[%s1001_s1 + $0xb8] sm:$0xff] }
   0xa   :  { %478 = vmatprep.subr.mxu1 %v90_v13  ;;  %444 = vmatpush3.msra.mxu0 %v42_v14  ;;  %v87_v25 = vld [vmem:[%s1001_s1 + $0x1c8] sm:$0xff]  ;;  %v86_v29 = vld [vmem:[%s1001_s1 + $0x1c0] sm:$0xff]  ;;  %v85_v33 = vld [vmem:[%s1001_s1 + $0x1b8] sm:$0xff] }
   0xb   :  { %479 = vmatpush3.msra.mxu1 %v74_v15  ;;  %445 = vmatprep.subr.mxu0 %v57_v16  ;;  %v39_v26 = vld [vmem:[%s1001_s1 + $0x48] sm:$0xff]  ;;  %v38_v30 = vld [vmem:[%s1001_s1 + $0x40] sm:$0xff]  ;;  %v37_v34 = vld [vmem:[%s1001_s1 + $0x38] sm:$0xff] }
   0xc   :  { %480 = vmatprep.subr.mxu1 %v89_v17  ;;  %446 = vmatpush3.msra.mxu0 %v41_v18  ;;  %v71_v27 = vld [vmem:[%s1001_s1 + $0x148] sm:$0xff]  ;;  %v70_v31 = vld [vmem:[%s1001_s1 + $0x140] sm:$0xff]  ;;  %v69_v35 = vld [vmem:[%s1001_s1 + $0x138] sm:$0xff] }
   0xd   :  { %481 = vmatpush3.msra.mxu1 %v73_v19  ;;  %447 = vmatprep.subr.mxu0 %v56_v20  ;;  %v52_v36 = vld [vmem:[%s1001_s1 + $0xb0] sm:$0xff]  ;;  %v51_v40 = vld [vmem:[%s1001_s1 + $0xa8] sm:$0xff]  ;;  %v50_v44 = vld [vmem:[%s1001_s1 + $0xa0] sm:$0xff] }
   0xe   :  { %482 = vmatprep.subr.mxu1 %v88_v21  ;;  %448 = vmatpush3.msra.mxu0 %v40_v22  ;;  %v84_v37 = vld [vmem:[%s1001_s1 + $0x1b0] sm:$0xff]  ;;  %v83_v41 = vld [vmem:[%s1001_s1 + $0x1a8] sm:$0xff]  ;;  %v82_v45 = vld [vmem:[%s1001_s1 + $0x1a0] sm:$0xff] }
   0xf   :  { %483 = vmatpush3.msra.mxu1 %v72_v23  ;;  %449 = vmatprep.subr.mxu0 %v55_v24  ;;  %v36_v38 = vld [vmem:[%s1001_s1 + $0x30] sm:$0xff]  ;;  %v35_v42 = vld [vmem:[%s1001_s1 + $0x28] sm:$0xff]  ;;  %v34_v46 = vld [vmem:[%s1001_s1 + $0x20] sm:$0xff] }
  0x10   :  { %484 = vmatprep.subr.mxu1 %v87_v25  ;;  %450 = vmatpush3.msra.mxu0 %v39_v26  ;;  %v68_v39 = vld [vmem:[%s1001_s1 + $0x130] sm:$0xff]  ;;  %v67_v43 = vld [vmem:[%s1001_s1 + $0x128] sm:$0xff]  ;;  %v66_v47 = vld [vmem:[%s1001_s1 + $0x120] sm:$0xff] }
  0x11   :  { %485 = vmatpush3.msra.mxu1 %v71_v27  ;;  %451 = vmatprep.subr.mxu0 %v54_v28  ;;  %v49_v48 = vld [vmem:[%s1001_s1 + $0x98] sm:$0xff]  ;;  %v48_v52 = vld [vmem:[%s1001_s1 + $0x90] sm:$0xff]  ;;  %v47_v56 = vld [vmem:[%s1001_s1 + $0x88] sm:$0xff] }
  0x12   :  { %486 = vmatprep.subr.mxu1 %v86_v29  ;;  %452 = vmatpush3.msra.mxu0 %v38_v30  ;;  %v81_v49 = vld [vmem:[%s1001_s1 + $0x198] sm:$0xff]  ;;  %v80_v53 = vld [vmem:[%s1001_s1 + $0x190] sm:$0xff]  ;;  %v79_v57 = vld [vmem:[%s1001_s1 + $0x188] sm:$0xff] }
  0x13   :  { %487 = vmatpush3.msra.mxu1 %v70_v31  ;;  %453 = vmatprep.subr.mxu0 %v53_v32  ;;  %v33_v50 = vld [vmem:[%s1001_s1 + $0x18] sm:$0xff]  ;;  %v32_v54 = vld [vmem:[%s1001_s1 + $0x10] sm:$0xff]  ;;  %v31_v58 = vld [vmem:[%s1001_s1 + $0x8] sm:$0xff] }
  0x14   :  { %488 = vmatprep.subr.mxu1 %v85_v33  ;;  %454 = vmatpush3.msra.mxu0 %v37_v34  ;;  %v65_v51 = vld [vmem:[%s1001_s1 + $0x118] sm:$0xff]  ;;  %v64_v55 = vld [vmem:[%s1001_s1 + $0x110] sm:$0xff]  ;;  %v63_v59 = vld [vmem:[%s1001_s1 + $0x108] sm:$0xff] }
  0x15   :  { %489 = vmatpush3.msra.mxu1 %v69_v35  ;;  %455 = vmatprep.subr.mxu0 %v52_v36  ;;  %v46_v60 = vld [vmem:[%s1001_s1 + $0x80] sm:$0xff]  ;;  %v27_v63 = vld [vmem:[%s1002_s0 + $0x8] sm:$0xff]  ;;  %v29_v1 = vld [vmem:[%s1002_s0 + $0x18] sm:$0xff] }
  0x16   :  { %490 = vmatprep.subr.mxu1 %v84_v37  ;;  %456 = vmatpush3.msra.mxu0 %v36_v38  ;;  %v78_v61 = vld [vmem:[%s1001_s1 + $0x180] sm:$0xff]  ;;  %v28_v3 = vld [vmem:[%s1002_s0 + $0x10] sm:$0xff]  ;;  %v257_v4 = vld [vmem:[%s1003_s3 + $0x78] sm:$0xff] }
  0x17   :  { %491 = vmatpush3.msra.mxu1 %v68_v39  ;;  %457 = vmatprep.subr.mxu0 %v51_v40  ;;  %v30_v62 = vld [vmem:[%s1001_s1] sm:$0xff]  ;;  %v256_v6 = vld [vmem:[%s1003_s3 + $0x70] sm:$0xff]  ;;  %v255_v7 = vld [vmem:[%s1003_s3 + $0x68] sm:$0xff] }
  0x18   :  { %492 = vmatprep.subr.mxu1 %v83_v41  ;;  %458 = vmatpush3.msra.mxu0 %v35_v42  ;;  %v62_v0 = vld [vmem:[%s1001_s1 + $0x100] sm:$0xff]  ;;  %v253_v9 = vld [vmem:[%s1003_s3 + $0x58] sm:$0xff]  ;;  %v252_v10 = vld [vmem:[%s1003_s3 + $0x50] sm:$0xff] }
  0x19   :  { %493 = vmatpush3.msra.mxu1 %v67_v43  ;;  %459 = vmatprep.subr.mxu0 %v50_v44  ;;  %v26_v2 = vld [vmem:[%s1002_s0] sm:$0xff]  ;;  %v251_v11 = vld [vmem:[%s1003_s3 + $0x48] sm:$0xff]  ;;  %v249_v13 = vld [vmem:[%s1003_s3 + $0x38] sm:$0xff] }
  0x1a   :  { %494 = vmatprep.subr.mxu1 %v82_v45  ;;  %460 = vmatpush3.msra.mxu0 %v34_v46  ;;  %v254_v8 = vld [vmem:[%s1003_s3 + $0x60] sm:$0xff]  ;;  %v248_v14 = vld [vmem:[%s1003_s3 + $0x30] sm:$0xff]  ;;  %v247_v15 = vld [vmem:[%s1003_s3 + $0x28] sm:$0xff] }
  0x1b   :  { %495 = vmatpush3.msra.mxu1 %v66_v47  ;;  %461 = vmatprep.subr.mxu0 %v49_v48  ;;  %v250_v12 = vld [vmem:[%s1003_s3 + $0x40] sm:$0xff]  ;;  %v245_v17 = vld [vmem:[%s1003_s3 + $0x18] sm:$0xff]  ;;  %v244_v18 = vld [vmem:[%s1003_s3 + $0x10] sm:$0xff] }
  0x1c   :  { %496 = vmatprep.subr.mxu1 %v81_v49  ;;  %462 = vmatpush3.msra.mxu0 %v33_v50  ;;  %v246_v16 = vld [vmem:[%s1003_s3 + $0x20] sm:$0xff]  ;;  %v243_v19 = vld [vmem:[%s1003_s3 + $0x8] sm:$0xff]  ;;  %v351_v21 = vld [vmem:[%s1004_s5 + $0x78] sm:$0xff] }
  0x1d   :  { %497 = vmatpush3.msra.mxu1 %v65_v51  ;;  %463 = vmatprep.subr.mxu0 %v48_v52  ;;  %v242_v20 = vld [vmem:[%s1003_s3] sm:$0xff]  ;;  %v350_v22 = vld [vmem:[%s1004_s5 + $0x70] sm:$0xff]  ;;  %v349_v23 = vld [vmem:[%s1004_s5 + $0x68] sm:$0xff] }
  0x1e   :  { %498 = vmatprep.subr.mxu1 %v80_v53  ;;  %464 = vmatpush3.msra.mxu0 %v32_v54  ;;  %v348_v24 = vld [vmem:[%s1004_s5 + $0x60] sm:$0xff]  ;;  %v347_v25 = vld [vmem:[%s1004_s5 + $0x58] sm:$0xff]  ;;  %v346_v26 = vld [vmem:[%s1004_s5 + $0x50] sm:$0xff] }
  0x1f   :  { %499 = vmatpush3.msra.mxu1 %v64_v55  ;;  %465 = vmatprep.subr.mxu0 %v47_v56  ;;  %v345_v27 = vld [vmem:[%s1004_s5 + $0x48] sm:$0xff]  ;;  %v344_v28 = vld [vmem:[%s1004_s5 + $0x40] sm:$0xff]  ;;  %v343_v29 = vld [vmem:[%s1004_s5 + $0x38] sm:$0xff] }
  0x20   :  { %500 = vmatprep.subr.mxu1 %v79_v57  ;;  %466 = vmatpush3.msra.mxu0 %v31_v58  ;;  %v342_v30 = vld [vmem:[%s1004_s5 + $0x30] sm:$0xff]  ;;  %v341_v31 = vld [vmem:[%s1004_s5 + $0x28] sm:$0xff]  ;;  %v340_v32 = vld [vmem:[%s1004_s5 + $0x20] sm:$0xff] }
  0x21   :  { %501 = vmatpush3.msra.mxu1 %v63_v59  ;;  %467 = vmatprep.subr.mxu0 %v46_v60  ;;  %v339_v33 = vld [vmem:[%s1004_s5 + $0x18] sm:$0xff]  ;;  %v434_v36 = vld [vmem:[%s1005_s2] ss:$0 sm:$0xff]  ;;  %v338_v44 = vld [vmem:[%s1004_s5 + $0x10] sm:$0xff] }
  0x22   :  { %502 = vmatprep.subr.mxu1 %v78_v61  ;;  %468 = vmatpush3.msra.mxu0 %v30_v62  ;;  %v337_v45 = vld [vmem:[%s1004_s5 + $0x8] sm:$0xff]  ;;  %v336_v46 = vld [vmem:[%s1004_s5] sm:$0xff] }
  0x23   :  { %165 = vmatprep.mubr.f32.mxu0 %v27_v63  ;;  %503 = vmatpush3.msra.mxu1 %v62_v0  ;;  %v435_v47 = vld [vmem:[%s1006_s4] ss:$0 sm:$0xff] }
  0x24   :  { %235 = vmatprep.mubr.f32.mxu1 %v29_v1  ;;  %166 = vmatmul.mubr.f32.vlgmr.msra.gmra.mxu0 %v26_v2  ;;  %v436_v52 = vld [vmem:[%s1007_s6] ss:$0 sm:$0xff] }
  0x25   :  { %236 = vmatmul.mubr.f32.vlgmr.msra.gmra.mxu1 %v28_v3  ;;  %541 = vmatprep.subr.mxu0 %v613_v5 }
  0x26   :  { %576 = vmatprep.subr.mxu1 %v613_v5  ;;  %542 = vmatpush3.msra.mxu0 %v257_v4 }
  0x27   :  { %543 = vmatprep.subr.mxu0 %v613_v5  ;;  %573 = vmatprep.mubr.msk.f32.mxu0 %vm614_vm0, %v613_v5 }
  0x28   :  { %544 = vmatpush3.msra.mxu0 %v256_v6  ;;  %608 = vmatprep.mubr.msk.f32.mxu1 %vm614_vm0, %v613_v5 }
  0x29   :  { %545 = vmatprep.subr.mxu0 %v613_v5  ;;  %577 = vmatpush3.msra.mxu1 %v351_v21 }
  0x2a   :  { %546 = vmatpush3.msra.mxu0 %v255_v7  ;;  %578 = vmatprep.subr.mxu1 %v613_v5 }
  0x2b   :  { %547 = vmatprep.subr.mxu0 %v613_v5  ;;  %579 = vmatpush3.msra.mxu1 %v350_v22 }
  0x2c   :  { %548 = vmatpush3.msra.mxu0 %v254_v8  ;;  %580 = vmatprep.subr.mxu1 %v613_v5 }
  0x2d   :  { %549 = vmatprep.subr.mxu0 %v613_v5  ;;  %581 = vmatpush3.msra.mxu1 %v349_v23 }
  0x2e   :  { %550 = vmatpush3.msra.mxu0 %v253_v9  ;;  %582 = vmatprep.subr.mxu1 %v613_v5 }
  0x2f   :  { %551 = vmatprep.subr.mxu0 %v613_v5  ;;  %583 = vmatpush3.msra.mxu1 %v348_v24 }
  0x30   :  { %552 = vmatpush3.msra.mxu0 %v252_v10  ;;  %584 = vmatprep.subr.mxu1 %v613_v5 }
  0x31   :  { %553 = vmatprep.subr.mxu0 %v613_v5  ;;  %585 = vmatpush3.msra.mxu1 %v347_v25 }
  0x32   :  { %554 = vmatpush3.msra.mxu0 %v251_v11  ;;  %586 = vmatprep.subr.mxu1 %v613_v5 }
  0x33   :  { %555 = vmatprep.subr.mxu0 %v613_v5  ;;  %587 = vmatpush3.msra.mxu1 %v346_v26 }
  0x34   :  { %556 = vmatpush3.msra.mxu0 %v250_v12  ;;  %588 = vmatprep.subr.mxu1 %v613_v5 }
  0x35   :  { %557 = vmatprep.subr.mxu0 %v613_v5  ;;  %589 = vmatpush3.msra.mxu1 %v345_v27 }
  0x36   :  { %558 = vmatpush3.msra.mxu0 %v249_v13  ;;  %590 = vmatprep.subr.mxu1 %v613_v5 }
  0x37   :  { %559 = vmatprep.subr.mxu0 %v613_v5  ;;  %591 = vmatpush3.msra.mxu1 %v344_v28 }
  0x38   :  { %560 = vmatpush3.msra.mxu0 %v248_v14  ;;  %592 = vmatprep.subr.mxu1 %v613_v5 }
  0x39   :  { %561 = vmatprep.subr.mxu0 %v613_v5  ;;  %593 = vmatpush3.msra.mxu1 %v343_v29 }
  0x3a   :  { %562 = vmatpush3.msra.mxu0 %v247_v15  ;;  %594 = vmatprep.subr.mxu1 %v613_v5 }
  0x3b   :  { %563 = vmatprep.subr.mxu0 %v613_v5  ;;  %595 = vmatpush3.msra.mxu1 %v342_v30 }
  0x3c   :  { %564 = vmatpush3.msra.mxu0 %v246_v16  ;;  %596 = vmatprep.subr.mxu1 %v613_v5 }
  0x3d   :  { %565 = vmatprep.subr.mxu0 %v613_v5  ;;  %597 = vmatpush3.msra.mxu1 %v341_v31 }
  0x3e   :  { %566 = vmatpush3.msra.mxu0 %v245_v17  ;;  %598 = vmatprep.subr.mxu1 %v613_v5 }
  0x3f   :  { %567 = vmatprep.subr.mxu0 %v613_v5  ;;  %599 = vmatpush3.msra.mxu1 %v340_v32 }
  0x40   :  { %568 = vmatpush3.msra.mxu0 %v244_v18  ;;  %600 = vmatprep.subr.mxu1 %v613_v5 }
  0x41   :  { %569 = vmatprep.subr.mxu0 %v613_v5  ;;  %601 = vmatpush3.msra.mxu1 %v339_v33 }
  0x42   :  { %570 = vmatpush3.msra.mxu0 %v243_v19  ;;  %602 = vmatprep.subr.mxu1 %v613_v5 }
  0x43   :  { %571 = vmatprep.subr.mxu0 %v613_v5  ;;  %603 = vmatpush3.msra.mxu1 %v338_v44 }
  0x44   :  { %572 = vmatpush3.msra.mxu0 %v242_v20  ;;  %604 = vmatprep.subr.mxu1 %v613_v5 }
  0x45   :  { %605 = vmatpush3.msra.mxu1 %v337_v45 }
  0x46   :  { %606 = vmatprep.subr.mxu1 %v613_v5 }
  0x47   :  { %607 = vmatpush3.msra.mxu1 %v336_v46 }
  0xe4   :  { %v469_v34 = vpop.f32.mrf.mxu0 }
  0xe5   :  { %v504_v35 = vpop.f32.mrf.mxu1 }
  0xe6   :  { %v470_v37 = vpop.f32.mrf.mxu0 }
  0xe7   :  { %v505_v38 = vpop.f32.mrf.mxu1  ;;  %v471_v39 = vadd.f32 %v470_v37, %v469_v34 }
  0xe8   :  { %v506_v41 = vadd.f32 %v505_v38, %v504_v35 }
  0xe9   :  { %v168_v40 = vadd.f32 %v471_v39, %v434_v36 }
  0xeb   :  { %v238_v42 = vadd.f32 %v506_v41, %v168_v40 }
  0xed   :  { %v241_v43 = vmax.f32 %v238_v42, 0.0 }
  0xef   :  { %574 = vmatmul.mubr.f32.vlgmr.msra.gmra.mxu0 %v241_v43 }
 0x1af   :  { %v331_v48 = vpop.f32.mrf.mxu0 }
 0x1b0   :  { %v332_v49 = vadd.f32 %v435_v47, %v331_v48 }
 0x1b1   :  { %v575_v50 = vpop.f32.mrf.mxu0 }
 0x1b2   :  { %v335_v51 = vmax.f32 %v332_v49, 0.0 }
 0x1b4   :  { %609 = vmatmul.mubr.f32.vlgmr.msra.gmra.mxu1 %v335_v51 }
 0x274   :  { %v425_v53 = vpop.f32.mrf.mxu1 }
 0x275   :  { %v426_v54 = vadd.f32 %v436_v52, %v425_v53 }
 0x276   :  { %v610_v55 = vpop.f32.mrf.mxu1 }
 0x277   :  { %429 = vst [vmem:[%s1008_s7] sm:$0xff] %v426_v54 }

</bundles_post_ra>
